<compile_context>
chip_gen: v5e
topology: v5e:2x2
jax: 0.10.0
libtpu: 0.0.40
codegen_flags: <defaults>
</compile_context>

<pallas_src>
import functools
import math

import jax
import jax.numpy as jnp
from jax.experimental import pallas as pl
from jax.experimental.pallas import tpu as pltpu

_VMEM_LIMIT = 64 * 1024 * 1024            # fits v7x (64 MiB physical); plenty on v5e/v6e
_TM_CAP, _TK_CAP, _TN_CAP = 1024, 1024, 1024
_GTN = 128                                # output-channel tile for grouped convs

# torchvision resnext50_32x4d architecture constants
_GROUPS = 32
_BASE_WIDTH = 4
_EXPANSION = 4
_LAYER_CFG = ((64, 3, 1), (128, 4, 2), (256, 6, 2), (512, 3, 2))

_COMPILER_PARAMS = pltpu.CompilerParams(vmem_limit_bytes=_VMEM_LIMIT)


# -----------------------------------------------------------------------------
# In-kernel math helpers
# -----------------------------------------------------------------------------
def _erf(x):
    # Abramowitz & Stegun 7.1.26 polynomial erf, |err| < 1.5e-7 (~fp32 eps).
    a1, a2, a3, a4, a5 = (0.254829592, -0.284496736, 1.421413741,
                          -1.453152027, 1.061405429)
    p = 0.3275911
    s = jnp.sign(x)
    ax = jnp.abs(x)
    t = 1.0 / (1.0 + p * ax)
    poly = ((((a5 * t + a4) * t + a3) * t + a2) * t + a1) * t
    return s * (1.0 - poly * jnp.exp(-ax * ax))


def _gelu(x):
    # TODO(synk): torch F.gelu is exact erf-GELU; in-kernel erf polynomial
    # (|err|<1.5e-7) is used since lax.erf lowering is not guaranteed.
    return 0.5 * x * (1.0 + _erf(x * (1.0 / math.sqrt(2.0))))


def _layernorm_math(x, w, b):
    mu = jnp.mean(x, axis=-1, keepdims=True)
    xc = x - mu
    var = jnp.mean(xc * xc, axis=-1, keepdims=True)
    return xc * jax.lax.rsqrt(var + 1e-5) * w + b


# -----------------------------------------------------------------------------
# Pallas kernels
# -----------------------------------------------------------------------------
def _matmul_bn_kernel(*refs, relu, has_res):
    """Tiled matmul + per-column affine (+ residual)(+ ReLU), fp32 accumulator."""
    if has_res:
        x_ref, w_ref, s_ref, b_ref, r_ref, o_ref, acc_ref = refs
    else:
        x_ref, w_ref, s_ref, b_ref, o_ref, acc_ref = refs
        r_ref = None

    @pl.when(pl.program_id(2) == 0)
    def _():
        acc_ref[...] = jnp.zeros_like(acc_ref)

    acc_ref[...] += jnp.dot(x_ref[...], w_ref[...],
                            preferred_element_type=jnp.float32)

    @pl.when(pl.program_id(2) == pl.num_programs(2) - 1)
    def _():
        y = acc_ref[...] * s_ref[...] + b_ref[...]
        if r_ref is not None:
            y = y + r_ref[...].astype(jnp.float32)
        if relu:
            y = jnp.maximum(y, 0.0)
        o_ref[...] = y.astype(o_ref.dtype)


def _gconv_kernel(x_ref, w_ref, s_ref, b_ref, o_ref, acc_ref, *, OH, Wp, TN, relu):
    """Fused grouped 3x3 stride-1 conv: 9 shifted in-VMEM taps, group-restricted K.

    x_ref:  (1, L, TN)        flattened padded NHWC rows, channels of this tile only
    w_ref:  (1, 9*TN, TN)     per-output-tile block-diagonal weight slab (tap-major)
    output: (1, OH*Wp, TN)    'overcomputed' at Wp columns; garbage cols dropped outside
    """
    M = OH * Wp
    acc_ref[...] = jnp.zeros_like(acc_ref)
    for dy in range(3):
        for dx in range(3):
            t = dy * 3 + dx
            off = dy * Wp + dx
            xwin = x_ref[0, off:off + M, :]                 # (M, TN) shifted window
            wt = w_ref[0, t * TN:(t + 1) * TN, :]           # (TN, TN)
            acc_ref[...] += jnp.dot(xwin, wt, preferred_element_type=jnp.float32)
    y = acc_ref[...] * s_ref[...] + b_ref[...]
    if relu:
        y = jnp.maximum(y, 0.0)
    o_ref[0] = y.astype(o_ref.dtype)


def _maxpool_kernel(a0_ref, a1_ref, a2_ref, o_ref, *, OH):
    """3x3/s2 maxpool: inputs are the three W-strided slices; H handled in-kernel."""
    wm = jnp.maximum(jnp.maximum(a0_ref[0], a1_ref[0]), a2_ref[0])   # (Hp, OW, C)
    res = None
    for dy in range(3):
        rows = wm[dy:dy + 2 * OH]                                    # (2*OH, OW, C)
        rows = rows.reshape(OH, 2, rows.shape[1], rows.shape[2])[:, 0]
        res = rows if res is None else jnp.maximum(res, rows)
    o_ref[0] = res


def _layernorm_kernel(x_ref, w_ref, b_ref, o_ref):
    o_ref[...] = _layernorm_math(x_ref[...].astype(jnp.float32),
                                 w_ref[...], b_ref[...]).astype(o_ref.dtype)


def _encoder_layer_kernel(*refs, H, add_pos):
    """Fused PreNormEncoderLayer for one batch element (grid over batch).

    LN1 -> QKV -> per-head attention -> out-proj + residual -> LN2 -> FFN + residual.
    """
    if add_pos:
        (x_ref, pos_ref, ln1w, ln1b, inw, inb, outw, outb, ln2w, ln2b,
         l1w, l1b, l2w, l2b, o_ref) = refs
    else:
        (x_ref, ln1w, ln1b, inw, inb, outw, outb, ln2w, ln2b,
         l1w, l1b, l2w, l2b, o_ref) = refs
        pos_ref = None

    x = x_ref[0].astype(jnp.float32)                                  # (S, E)
    if pos_ref is not None:
        x = x + pos_ref[...]
    E = x.shape[-1]
    dh = E // H
    scale = 1.0 / math.sqrt(dh)

    h = _layernorm_math(x, ln1w[...], ln1b[...])
    qkv = jnp.dot(h.astype(jnp.bfloat16), inw[...],
                  preferred_element_type=jnp.float32) + inb[...]      # (S, 3E)

    heads = []
    for hd in range(H):          # static, small unroll (batch handled by the grid)
        c0 = hd * dh
        q = qkv[:, c0:c0 + dh].astype(jnp.bfloat16)
        k = qkv[:, E + c0:E + c0 + dh].astype(jnp.bfloat16)
        v = qkv[:, 2 * E + c0:2 * E + c0 + dh].astype(jnp.bfloat16)
        s = jax.lax.dot_general(q, k, (((1,), (1,)), ((), ())),
                                preferred_element_type=jnp.float32) * scale
        s = s - jnp.max(s, axis=-1, keepdims=True)
        p = jnp.exp(s)
        p = p * pl.reciprocal(jnp.sum(p, axis=-1, keepdims=True), approx=True)
        heads.append(jnp.dot(p.astype(jnp.bfloat16), v,
                             preferred_element_type=jnp.float32))
    ctx = jnp.concatenate(heads, axis=1)                              # (S, E)

    att = jnp.dot(ctx.astype(jnp.bfloat16), outw[...],
                  preferred_element_type=jnp.float32) + outb[...] + x

    h2 = _layernorm_math(att, ln2w[...], ln2b[...])
    ff = jnp.dot(h2.astype(jnp.bfloat16), l1w[...],
                 preferred_element_type=jnp.float32) + l1b[...]
    ff = _gelu(ff)
    out = jnp.dot(ff.astype(jnp.bfloat16), l2w[...],
                  preferred_element_type=jnp.float32) + l2b[...] + att
    o_ref[0] = out.astype(o_ref.dtype)


# -----------------------------------------------------------------------------
# pallas_call wrappers (jit-cached per shape / static flags)
# -----------------------------------------------------------------------------
def _vmem_specs(n):
    return [pl.BlockSpec(memory_space=pltpu.MemorySpace.VMEM) for _ in range(n)]


def _pick_tile(dim, cap, align):
    """Largest tile <= cap that divides `dim` and is `align`-aligned (or full dim)."""
    if dim <= cap:
        return dim
    t = (cap // align) * align
    while t >= align:
        if dim % t == 0:
            return t
        t -= align
    return dim


@functools.partial(jax.jit, static_argnames=("relu", "out_dtype"))
def _matmul_call(x, w, scale, bias, res, *, relu, out_dtype):
    m, k = x.shape
    n = w.shape[1]
    tm = _pick_tile(m, _TM_CAP, 8)
    tk = _pick_tile(k, _TK_CAP, 128)
    tn = _pick_tile(n, _TN_CAP, 128)
    has_res = res is not None
    kern = functools.partial(_matmul_bn_kernel, relu=relu, has_res=has_res)
    in_specs = [
        pl.BlockSpec((tm, tk), lambda i, j, kk: (i, kk)),
        pl.BlockSpec((tk, tn), lambda i, j, kk: (kk, j)),
        pl.BlockSpec((1, tn), lambda i, j, kk: (0, j)),
        pl.BlockSpec((1, tn), lambda i, j, kk: (0, j)),
    ]
    args = [x, w, scale, bias]
    if has_res:
        in_specs.append(pl.BlockSpec((tm, tn), lambda i, j, kk: (i, j)))
        args.append(res)
    return pl.pallas_call(
        kern,
        out_shape=jax.ShapeDtypeStruct((m, n), out_dtype),
        grid=(m // tm, n // tn, k // tk),
        in_specs=in_specs,
        out_specs=pl.BlockSpec((tm, tn), lambda i, j, kk: (i, j)),
        scratch_shapes=[pltpu.VMEM((tm, tn), jnp.float32)],
        compiler_params=pltpu.CompilerParams(
            dimension_semantics=("parallel", "parallel", "arbitrary"),
            vmem_limit_bytes=_VMEM_LIMIT),
    )(*args)


@functools.partial(jax.jit, static_argnames=("OH", "Wp", "relu"))
def _gconv_call(xf, w_tiles, scale, bias, *, OH, Wp, relu):
    n, L, cin = xf.shape
    ntiles, kk, tn = w_tiles.shape
    M = OH * Wp
    cout = ntiles * tn
    kern = functools.partial(_gconv_kernel, OH=OH, Wp=Wp, TN=tn, relu=relu)
    return pl.pallas_call(
        kern,
        out_shape=jax.ShapeDtypeStruct((n, M, cout), jnp.bfloat16),
        grid=(n, ntiles),
        in_specs=[
            pl.BlockSpec((1, L, tn), lambda b, j: (b, 0, j)),
            pl.BlockSpec((1, kk, tn), lambda b, j: (j, 0, 0)),
            pl.BlockSpec((1, tn), lambda b, j: (0, j)),
            pl.BlockSpec((1, tn), lambda b, j: (0, j)),
        ],
        out_specs=pl.BlockSpec((1, M, tn), lambda b, j: (b, 0, j)),
        scratch_shapes=[pltpu.VMEM((M, tn), jnp.float32)],
        compiler_params=pltpu.CompilerParams(
            dimension_semantics=("parallel", "parallel"),
            vmem_limit_bytes=_VMEM_LIMIT),
    )(xf, w_tiles, scale, bias)


@jax.jit
def _maxpool_call(a0, a1, a2):
    n, hp, ow, c = a0.shape
    oh = (hp - 2) // 2
    kern = functools.partial(_maxpool_kernel, OH=oh)
    return pl.pallas_call(
        kern,
        out_shape=jax.ShapeDtypeStruct((n, oh, ow, c), a0.dtype),
        grid=(n,),
        in_specs=[pl.BlockSpec((1, hp, ow, c), lambda b: (b, 0, 0, 0))] * 3,
        out_specs=pl.BlockSpec((1, oh, ow, c), lambda b: (b, 0, 0, 0)),
        compiler_params=pltpu.CompilerParams(
            dimension_semantics=("parallel",),
            vmem_limit_bytes=_VMEM_LIMIT),
    )(a0, a1, a2)


@jax.jit
def _layernorm_call(x, w, b):
    return pl.pallas_call(
        _layernorm_kernel,
        out_shape=jax.ShapeDtypeStruct(x.shape, jnp.float32),
        in_specs=_vmem_specs(3),
        out_specs=pl.BlockSpec(memory_space=pltpu.MemorySpace.VMEM),
        compiler_params=_COMPILER_PARAMS,
    )(x, w, b)


@functools.partial(jax.jit, static_argnames=("H", "add_pos"))
def _encoder_layer_call(x, pos, lp, *, H, add_pos):
    B, S, E = x.shape
    kern = functools.partial(_encoder_layer_kernel, H=H, add_pos=add_pos)
    weights = [lp["ln1_w"], lp["ln1_b"], lp["in_wt"], lp["in_b"],
               lp["out_wt"], lp["out_b"], lp["ln2_w"], lp["ln2_b"],
               lp["l1_wt"], lp["l1_b"], lp["l2_wt"], lp["l2_b"]]
    in_specs = [pl.BlockSpec((1, S, E), lambda b: (b, 0, 0))]
    args = [x]
    if add_pos:
        in_specs.append(pl.BlockSpec((S, E), lambda b: (0, 0)))
        args.append(pos)
    for wgt in weights:
        in_specs.append(pl.BlockSpec(wgt.shape, lambda b: (0, 0)))
        args.append(wgt)
    return pl.pallas_call(
        kern,
        out_shape=jax.ShapeDtypeStruct((B, S, E), jnp.bfloat16),
        grid=(B,),
        in_specs=in_specs,
        out_specs=pl.BlockSpec((1, S, E), lambda b: (b, 0, 0)),
        compiler_params=pltpu.CompilerParams(
            dimension_semantics=("parallel",),
            vmem_limit_bytes=_VMEM_LIMIT),
    )(*args)


# -----------------------------------------------------------------------------
# Glue: im2col (stem only), conv / pooling wrappers, ResNeXt-50 backbone
# -----------------------------------------------------------------------------
def _extract_patches(x, kh, kw, sh, sw, ph, pw):
    """x: NHWC -> (N, OH, OW, kh*kw, C) patches (tap-major, channel-minor).

    Only used for the 7x7 stem conv (C=3, cheap).  All 3x3 grouped convs are
    fully fused (no patch materialization)."""
    n, h, w, c = x.shape
    xp = jnp.pad(x, ((0, 0), (ph, ph), (pw, pw), (0, 0)))
    oh = (h + 2 * ph - kh) // sh + 1
    ow = (w + 2 * pw - kw) // sw + 1
    cols = []
    for i in range(kh):
        for j in range(kw):
            cols.append(xp[:, i:i + sh * (oh - 1) + 1:sh,
                           j:j + sw * (ow - 1) + 1:sw, :])
    return jnp.stack(cols, axis=3), oh, ow


def conv_bn_act(x, cp, ksize, stride, padding, relu=True, residual=None):
    """1x1 / 7x7 conv via dense matmul; fused BN affine / residual / ReLU."""
    n, h, w_, cin = x.shape
    wd = cp["w"]                                 # (ksize*ksize*cin, cout) bf16
    cout = wd.shape[1]
    if ksize == 1:
        xs = x[:, ::stride, ::stride, :] if stride > 1 else x
        oh, ow = xs.shape[1], xs.shape[2]
        cols = xs.reshape(n * oh * ow, cin)
    else:
        pt, oh, ow = _extract_patches(x, ksize, ksize, stride, stride,
                                      padding, padding)
        cols = pt.reshape(n * oh * ow, ksize * ksize * cin)
    res = residual.reshape(n * oh * ow, cout) if residual is not None else None
    out = _matmul_call(cols, wd, cp["scale"], cp["bias"], res,
                       relu=relu, out_dtype=jnp.bfloat16)
    return out.reshape(n, oh, ow, cout)


def gconv3x3_bn_relu(x, cp, stride):
    """Grouped 3x3 conv (pad 1) + BN + ReLU, fully fused (stride-2 via subsample)."""
    n, h, w, c = x.shape
    xp = jnp.pad(x, ((0, 0), (1, 1), (1, 1), (0, 0)))
    Wp = w + 2
    L = (h + 2) * Wp
    xf = jnp.pad(xp.reshape(n, L, c), ((0, 0), (0, 8), (0, 0)))   # slack rows for taps
    out = _gconv_call(xf, cp["w"], cp["scale"], cp["bias"], OH=h, Wp=Wp, relu=True)
    cout = cp["scale"].shape[1]
    out = out.reshape(n, h, Wp, cout)[:, :, :w, :]                # drop overcompute cols
    if stride > 1:
        out = out[:, ::stride, ::stride, :]   # stride-2 conv == stride-1 at even positions
    return out


def maxpool2d_3x3s2(x):
    n, h, w, c = x.shape
    ow = w // 2
    xp = jnp.pad(x, ((0, 0), (1, 1), (1, 1), (0, 0)), constant_values=-jnp.inf)
    slices = [xp[:, :, dx:dx + 2 * ow - 1:2, :] for dx in range(3)]
    return _maxpool_call(*slices)


def resnet_forward(x_nhwc, rp):
    out = conv_bn_act(x_nhwc, rp["conv1"], 7, 2, 3, relu=True)
    out = maxpool2d_3x3s2(out)
    for layer_params, (_, _, stride) in zip(rp["layers"], _LAYER_CFG):
        for bi, blk in enumerate(layer_params):
            s = stride if bi == 0 else 1
            identity = out
            y = conv_bn_act(out, blk["conv1"], 1, 1, 0, relu=True)
            y = gconv3x3_bn_relu(y, blk["conv2"], s)
            if "down" in blk:
                identity = conv_bn_act(out, blk["down"], 1, s, 0, relu=False)
            # conv3 + BN + residual add + ReLU fused in one Pallas kernel
            out = conv_bn_act(y, blk["conv3"], 1, 1, 0, relu=True,
                              residual=identity)
    return out  # (N, H/32, W/32, 2048) bf16


def bms_encoder_forward(imgs_nchw, params, num_heads):
    """BMSEncoder.forward: imgs (B, 3, H, W) NCHW -> (S, B, d_model) fp32."""
    x = jnp.transpose(imgs_nchw, (0, 2, 3, 1)).astype(jnp.bfloat16)  # NCHW -> NHWC
    feats = resnet_forward(x, params["resnet"])                      # (B, h, w, 2048)
    B, hf, wf, C = feats.shape
    S = hf * wf
    d_model = params["fc_b"].shape[1]
    if S > params["pos_emb"].shape[0]:
        raise ValueError(f"seq_len {S} exceeds max_seq_len {params['pos_emb'].shape[0]}")
    # Batch-major (B, S, ·) layout internally; equals PyTorch's (S, B, ·) per-row
    # ops since only attention mixes positions and it is applied per batch.
    feats_flat = feats.reshape(B * S, C)
    x2 = _matmul_call(feats_flat, params["fc_wt"],
                      jnp.ones((1, d_model), jnp.float32), params["fc_b"], None,
                      relu=False, out_dtype=jnp.bfloat16)
    x2 = x2.reshape(B, S, d_model)
    pos = params["pos_emb"][:S].astype(jnp.float32)
    # nn.Dropout is identity in eval mode; pos add fused into first encoder layer
    for li, lp in enumerate(params["enc_layers"]):
        x2 = _encoder_layer_call(x2, pos, lp, H=num_heads, add_pos=(li == 0))
    x2 = _layernorm_call(x2.reshape(B * S, d_model),
                         params["norm_w"], params["norm_b"])
    return x2.reshape(B, S, d_model).transpose(1, 0, 2)              # (S, B, E)


# -----------------------------------------------------------------------------
# Deterministic parameter construction
# -----------------------------------------------------------------------------
def _pack_dense_weight(w):
    """(Cout, Cin, KH, KW) torch conv weight -> dense (KH*KW*Cin, Cout).

    K ordering matches im2col: index = tap * Cin + channel."""
    cout, cin, kh, kw = w.shape
    return w.transpose(2, 3, 1, 0).reshape(kh * kw * cin, cout)


def _pack_grouped_pertile(w, groups, tn=_GTN):
    """(Cout, Cin/G, 3, 3) grouped weight -> (Ntiles, 9*tn, tn) per-output-tile slabs.

    Each 128-wide output tile only carries the K rows (taps x its groups' input
    channels), so the grouped matmul never streams or multiplies other groups'
    channels.  Row order: (tap, group-in-tile, channel); col order: (group, ng)."""
    cout, cg, kh, kw = w.shape
    g = groups
    ng = cout // g
    assert cg == ng, "resnext50_32x4d grouped convs have cg == ng"
    assert tn % ng == 0 and cout % tn == 0
    gpt = tn // ng
    ntiles = cout // tn
    t = kh * kw
    wr = w.reshape(ntiles, gpt, ng, cg, t)                # [tile, group, n, c, tap]
    eye = jnp.eye(gpt, dtype=w.dtype)
    slab = jnp.einsum('jgnct,gh->jtgchn', wr, eye)        # block-diag within tile
    return slab.reshape(ntiles, t * tn, tn)


def _bn_affine(k, cout):
    k2, k3 = jax.random.split(k)
    scale = 1.0 + 0.1 * jax.random.normal(k2, (cout,), jnp.float32)
    bias = 0.05 * jax.random.normal(k3, (cout,), jnp.float32)
    return scale.reshape(1, cout), bias.reshape(1, cout)


def _conv_bn_params(key, cout, cin, ksize):
    k1, k2 = jax.random.split(key)
    fan_in = cin * ksize * ksize
    w = jax.random.normal(k1, (cout, cin, ksize, ksize), jnp.float32) * math.sqrt(2.0 / fan_in)
    scale, bias = _bn_affine(k2, cout)
    return {"w": _pack_dense_weight(w).astype(jnp.bfloat16),
            "scale": scale, "bias": bias}


def _gconv_bn_params(key, width, groups):
    k1, k2 = jax.random.split(key)
    cg = width // groups
    fan_in = cg * 9
    w = jax.random.normal(k1, (width, cg, 3, 3), jnp.float32) * math.sqrt(2.0 / fan_in)
    scale, bias = _bn_affine(k2, width)
    return {"w": _pack_grouped_pertile(w, groups).astype(jnp.bfloat16),
            "scale": scale, "bias": bias}


def _init_resnext50(key):
    keys = iter(jax.random.split(key, 256))
    params = {"conv1": _conv_bn_params(next(keys), 64, 3, 7)}
    inplanes = 64
    layers = []
    for planes, nblocks, stride in _LAYER_CFG:
        width = int(planes * _BASE_WIDTH / 64) * _GROUPS
        out_c = planes * _EXPANSION
        blocks = []
        for i in range(nblocks):
            s = stride if i == 0 else 1
            blk = {
                "conv1": _conv_bn_params(next(keys), width, inplanes, 1),
                "conv2": _gconv_bn_params(next(keys), width, _GROUPS),
                "conv3": _conv_bn_params(next(keys), out_c, width, 1),
            }
            if s != 1 or inplanes != out_c:
                blk["down"] = _conv_bn_params(next(keys), out_c, inplanes, 1)
            blocks.append(blk)
            inplanes = out_c
        layers.append(blocks)
    params["layers"] = layers
    return params


def _linear_params(key, fan_in, fan_out):
    k1, k2 = jax.random.split(key)
    bound = 1.0 / math.sqrt(fan_in)
    w = jax.random.uniform(k1, (fan_out, fan_in), jnp.float32, -bound, bound)
    b = jax.random.uniform(k2, (fan_out,), jnp.float32, -bound, bound)
    return w, b


def _positional_embs(d_model, max_seq_len):
    encs = jnp.array([dim / d_model for dim in range(0, d_model, 2)], jnp.float32)
    encs = 10000.0 ** encs
    rows = []
    for pos in range(max_seq_len):
        row = jnp.stack([jnp.sin(pos / encs), jnp.cos(pos / encs)], axis=1)
        rows.append(row.flatten()[:d_model])
    return jnp.stack(rows)


def init_bms_encoder(key, d_model, d_ff, num_layers, num_heads, max_seq_len):
    kres, kfc, kenc, knrm = jax.random.split(key, 4)
    fc_w, fc_b = _linear_params(kfc, 2048, d_model)
    enc_layers = []
    for lk in jax.random.split(kenc, num_layers):
        k1, k2, k3, k4, k5 = jax.random.split(lk, 5)
        in_w, in_b = _linear_params(k1, d_model, 3 * d_model)
        out_w, out_b = _linear_params(k2, d_model, d_model)
        l1_w, l1_b = _linear_params(k3, d_model, d_ff)
        l2_w, l2_b = _linear_params(k4, d_ff, d_model)
        n1, n2, n3, n4 = jax.random.split(k5, 4)
        enc_layers.append({
            "in_wt": in_w.T.astype(jnp.bfloat16), "in_b": in_b.reshape(1, -1),
            "out_wt": out_w.T.astype(jnp.bfloat16), "out_b": out_b.reshape(1, -1),
            "l1_wt": l1_w.T.astype(jnp.bfloat16), "l1_b": l1_b.reshape(1, -1),
            "l2_wt": l2_w.T.astype(jnp.bfloat16), "l2_b": l2_b.reshape(1, -1),
            "ln1_w": (1.0 + 0.05 * jax.random.normal(n1, (d_model,), jnp.float32)).reshape(1, -1),
            "ln1_b": (0.05 * jax.random.normal(n2, (d_model,), jnp.float32)).reshape(1, -1),
            "ln2_w": (1.0 + 0.05 * jax.random.normal(n3, (d_model,), jnp.float32)).reshape(1, -1),
            "ln2_b": (0.05 * jax.random.normal(n4, (d_model,), jnp.float32)).reshape(1, -1),
        })
    kn1, kn2 = jax.random.split(knrm)
    return {
        "resnet": _init_resnext50(kres),
        "fc_wt": fc_w.T.astype(jnp.bfloat16), "fc_b": fc_b.reshape(1, -1),
        "pos_emb": _positional_embs(d_model, max_seq_len),
        "enc_layers": enc_layers,
        "norm_w": (1.0 + 0.05 * jax.random.normal(kn1, (d_model,), jnp.float32)).reshape(1, -1),
        "norm_b": (0.05 * jax.random.normal(kn2, (d_model,), jnp.float32)).reshape(1, -1),
    }


if __name__ == "__main__":
    key = jax.random.PRNGKey(0)
    d_model, d_feedforward, num_layers, num_heads, max_seq_len = 32, 64, 2, 4, 16
    kp, kx = jax.random.split(key)
    params = init_bms_encoder(kp, d_model, d_feedforward, num_layers, num_heads, max_seq_len)
    # small deterministic input: (batch=2, channels=3, 64x64) -> seq_len = (64/32)^2 = 4
    imgs = jax.random.normal(kx, (2, 3, 64, 64), jnp.float32)
    fwd = jax.jit(bms_encoder_forward, static_argnums=(2,))
    out = fwd(imgs, params, num_heads)
    out = jax.block_until_ready(out)
    assert out.shape == (4, 2, d_model), out.shape
    assert bool(jnp.all(jnp.isfinite(out)))
    print("KERNEL_OK")
</pallas_src>

<mosaic_0001>
module attributes {stable_mosaic.version = 11 : i64} {
  func.func @_matmul_bn_kernel(%arg0: i32, %arg1: i32, %arg2: i32, %arg3: memref<1024x147xbf16, #tpu.memory_space<vmem>>, %arg4: memref<147x64xbf16, #tpu.memory_space<vmem>>, %arg5: memref<1x64xf32, #tpu.memory_space<vmem>>, %arg6: memref<1x64xf32, #tpu.memory_space<vmem>>, %arg7: memref<1024x64xbf16, #tpu.memory_space<vmem>>, %arg8: memref<1024x64xf32, #tpu.memory_space<vmem>>) attributes {dimension_semantics = [#tpu.dimension_semantics<parallel>, #tpu.dimension_semantics<parallel>, #tpu.dimension_semantics<arbitrary>], iteration_bounds = array<i64: 2, 1, 1>, scalar_prefetch = 0 : i64, scratch_operands = 1 : i64, tpu.core_type = #tpu.core_type<tc>, window_params = [{transform_indices = @transform_0, window_bounds = array<i64: 1024, 147>}, {transform_indices = @transform_1, window_bounds = array<i64: 147, 64>}, {transform_indices = @transform_2, window_bounds = array<i64: 1, 64>}, {transform_indices = @transform_3, window_bounds = array<i64: 1, 64>}, {transform_indices = @transform_4, window_bounds = array<i64: 1024, 64>}]} {
    %c0_i32 = arith.constant 0 : i32
    %0 = arith.cmpi eq, %arg2, %c0_i32 : i32
    %1 = arith.extui %0 : i1 to i32
    %c0_i32_0 = arith.constant 0 : i32
    %2 = arith.cmpi ne, %1, %c0_i32_0 : i32
    scf.if %2 {
      %cst_10 = arith.constant 0.000000e+00 : f32
      %12 = vector.broadcast %cst_10 : f32 to vector<1024x64xf32>
      %c0_11 = arith.constant 0 : index
      %c0_12 = arith.constant 0 : index
      %13 = vector.load %arg8[%c0_11, %c0_12] : memref<1024x64xf32, #tpu.memory_space<vmem>>, vector<1024x64xf32>
      tpu.vector_store %arg8[%c0_11, %c0_12], %12 {strides = array<i32>} : memref<1024x64xf32, #tpu.memory_space<vmem>>, vector<1024x64xf32>,
    } else {
    }
    %c0 = arith.constant 0 : index
    %c0_1 = arith.constant 0 : index
    %3 = vector.load %arg8[%c0, %c0_1] : memref<1024x64xf32, #tpu.memory_space<vmem>>, vector<1024x64xf32>
    %c0_2 = arith.constant 0 : index
    %c0_3 = arith.constant 0 : index
    %4 = vector.load %arg3[%c0_2, %c0_3] : memref<1024x147xbf16, #tpu.memory_space<vmem>>, vector<1024x147xbf16>
    %c0_4 = arith.constant 0 : index
    %c0_5 = arith.constant 0 : index
    %5 = vector.load %arg4[%c0_4, %c0_5] : memref<147x64xbf16, #tpu.memory_space<vmem>>, vector<147x64xbf16>
    %cst = arith.constant dense<0.000000e+00> : vector<1024x64xf32>
    %6 = tpu.matmul %4, %5, %cst {dimension_numbers = #tpu.dot_dimension_numbers<[1], [0], [0], [1], [0, 0, 1, 1], [], []>} : vector<1024x147xbf16>, vector<147x64xbf16>, vector<1024x64xf32> -> vector<1024x64xf32>
    %7 = arith.addf %3, %6 : vector<1024x64xf32>
    %c0_6 = arith.constant 0 : index
    %c0_7 = arith.constant 0 : index
    %8 = vector.load %arg8[%c0_6, %c0_7] : memref<1024x64xf32, #tpu.memory_space<vmem>>, vector<1024x64xf32>
    tpu.vector_store %arg8[%c0_6, %c0_7], %7 {strides = array<i32>} : memref<1024x64xf32, #tpu.memory_space<vmem>>, vector<1024x64xf32>,
    %c0_i32_8 = arith.constant 0 : i32
    %9 = arith.cmpi eq, %arg2, %c0_i32_8 : i32
    %10 = arith.extui %9 : i1 to i32
    %c0_i32_9 = arith.constant 0 : i32
    %11 = arith.cmpi ne, %10, %c0_i32_9 : i32
    scf.if %11 {
      %c0_10 = arith.constant 0 : index
      %c0_11 = arith.constant 0 : index
      %12 = vector.load %arg8[%c0_10, %c0_11] : memref<1024x64xf32, #tpu.memory_space<vmem>>, vector<1024x64xf32>
      %c0_12 = arith.constant 0 : index
      %c0_13 = arith.constant 0 : index
      %13 = vector.load %arg5[%c0_12, %c0_13] : memref<1x64xf32, #tpu.memory_space<vmem>>, vector<1x64xf32>
      %14 = vector.broadcast %13 : vector<1x64xf32> to vector<1024x64xf32>
      %15 = arith.mulf %12, %14 : vector<1024x64xf32>
      %c0_14 = arith.constant 0 : index
      %c0_15 = arith.constant 0 : index
      %16 = vector.load %arg6[%c0_14, %c0_15] : memref<1x64xf32, #tpu.memory_space<vmem>>, vector<1x64xf32>
      %17 = vector.broadcast %16 : vector<1x64xf32> to vector<1024x64xf32>
      %18 = arith.addf %15, %17 : vector<1024x64xf32>
      %cst_16 = arith.constant 0.000000e+00 : f32
      %19 = vector.broadcast %cst_16 : f32 to vector<1024x64xf32>
      %20 = arith.maximumf %18, %19 : vector<1024x64xf32>
      %21 = arith.truncf %20 : vector<1024x64xf32> to vector<1024x64xbf16>
      %c0_17 = arith.constant 0 : index
      %c0_18 = arith.constant 0 : index
      %22 = vector.load %arg7[%c0_17, %c0_18] : memref<1024x64xbf16, #tpu.memory_space<vmem>>, vector<1024x64xbf16>
      tpu.vector_store %arg7[%c0_17, %c0_18], %21 {strides = array<i32>} : memref<1024x64xbf16, #tpu.memory_space<vmem>>, vector<1024x64xbf16>,
    } else {
    }
    return
  }
  func.func @transform_0(%arg0: i32, %arg1: i32, %arg2: i32) -> (i32, i32) {
    %c0_i32 = arith.constant 0 : i32
    return %arg0, %arg2 : i32, i32
  }
  func.func @transform_1(%arg0: i32, %arg1: i32, %arg2: i32) -> (i32, i32) {
    %c0_i32 = arith.constant 0 : i32
    return %arg2, %arg1 : i32, i32
  }
  func.func @transform_2(%arg0: i32, %arg1: i32, %arg2: i32) -> (i32, i32) {
    %c0_i32 = arith.constant 0 : i32
    %c0_i32_0 = arith.constant 0 : i32
    return %c0_i32, %arg1 : i32, i32
  }
  func.func @transform_3(%arg0: i32, %arg1: i32, %arg2: i32) -> (i32, i32) {
    %c0_i32 = arith.constant 0 : i32
    %c0_i32_0 = arith.constant 0 : i32
    return %c0_i32, %arg1 : i32, i32
  }
  func.func @transform_4(%arg0: i32, %arg1: i32, %arg2: i32) -> (i32, i32) {
    %c0_i32 = arith.constant 0 : i32
    return %arg0, %arg1 : i32, i32
  }
}

</mosaic_0001>

<bundles_post_ra>
// kernel: _matmul_call.1
= control target key start
LH: loop header
LB: loop body
LE: loop exit
PB: predicated region body
PF: predicated region fallthrough
CT: control target
= control target key end

     0   :  { %s4231_s15 = smov 0   ;;  %s4233_s16 = smov 0   ;;  %s5711_s0 = inlined_call_operand.vmem [shape: bf16[2048,147], index: 0, kind: input, shape index: {}]   ;;  %s5712_s1 = inlined_call_operand.vmem [shape: bf16[147,64], index: 1, kind: input, shape index: {}]   ;;  %s5713_s2 = inlined_call_operand.vmem [shape: f32[1,64], index: 2, kind: input, shape index: {}]   ;;  %s5714_s3 = inlined_call_operand.vmem [shape: f32[1,64], index: 3, kind: input, shape index: {}]   ;;  %s5715_s4 = inlined_call_operand.vmem [shape: bf16[2048,64], index: 4, kind: output, shape index: {}]  }
   0x1   :  { %s4235_s17 = smov 0  }
   0x2 LB: > { %s33_s18 = sadd.s32 1, %s4198_s16  ;;  %p3378_p0 = scmp.ge.s32.totalorder %s4202_s17, 1  ;;  %s4202_s17 = sphi %s4235_s17, %s14_s17   ;;  %s4198_s16 = sphi %s4233_s16, %s5717_s16   ;;  %s4194_s15 = sphi %s4231_s15, %s5716_s15  }
   0x3   : > { %p35_p1 = scmp.ge.s32.totalorder %s33_s18, 2  ;;  %p224_p2 = scmp.lt.s32.totalorder %s4202_s17, 3 }
   0x5   : > { %s5719_s18 = smov (%p35_p1, %s33_s18), 0  ;;  %p225_p3 = pnand %p3378_p0, %p224_p2 }
   0x6   : > { %s3379_s23 = sshll.u32 (!%p225_p3), %s4194_s15, 7 }
   0x7   : > { %228 = sbr.rel (%p225_p3) target bundleno = 702 (0x2be), region = 36  ;;  %p274_p4 = scmp.lt.s32.totalorder (!%p225_p3), %s3379_s23, 255 }
   0xc   : > { %v4134_v0 = vld [vmem:[%s5712_s1 + $0x38] sm:$0xff]  ;;  %v716_v1 = vld [vmem:[%s5712_s1 + $0x48] sm:$0x3]  ;;  %vm1543_vm0 = vcmask 1040384   ;;  %vm1544_vm1 = vcmask 1041408   ;;  %v4133_v3 = vld [vmem:[%s5712_s1 + $0x30] sm:$0xff] }
   0xd   : > { %v1330_v2 = vunpack.c.l.b16 %v716_v1  ;;  %1550 = vmatpush.bf16.msra.mxu0 %v4134_v0  ;;  %4136 = vmatpush.bf16.msra.mxu2 %v4134_v0  ;;  %v4204_v4 = vmov 65535   ;;  %s5721_s23 = smov (!%p274_p4, %s3379_s23), 255  ;;  %v4132_v9 = vld [vmem:[%s5712_s1 + $0x28] sm:$0xff]  ;;  %v4135_v10 = vld [vmem:[%s5712_s1 + $0x40] sm:$0xff]  ;;  %vm1350_vm2 = vcmask 154624   ;;  %v4130_v18 = vld [vmem:[%s5712_s1 + $0x18] sm:$0xff] }
   0xe   : > { %v1545_v5 = vsel %vm1543_vm0, 4294967295, %v4204_v4  ;;  %s3998_s28 = sshll.u32 %s5721_s23, 3  ;;  %v4131_v14 = vld [vmem:[%s5712_s1 + $0x20] sm:$0xff]  ;;  %v4129_v19 = vld [vmem:[%s5712_s1 + $0x10] sm:$0xff]  ;;  %v4128_v20 = vld [vmem:[%s5712_s1 + $0x8] sm:$0xff]  ;;  %vm313_vm3 = vcmask 523264  }
   0xf   : > { %v1340_v6 = vpack.c.b16 %v1330_v2, %v1330_v2  ;;  %v1546_v7 = vsel %vm1544_vm1, %v1545_v5, 0  ;;  %s4270_s7 = scalar_lea.vmem %s5711_s0, %s3998_s28  ;;  %v4127_v26 = vld [vmem:[%s5712_s1] sm:$0xff]  ;;  %s3383_s26 = sshll.u32 %s5721_s23, 2  ;;  %vm3116_vm4 = vcmask 519168  }
  0x10   : > { %v3999_v11 = vld [vmem:[%s4270_s7 + $0x4] sm:$0xf]  ;;  %v3388_v12 = vld [vmem:[%s4270_s7 + $0x8] sm:$0xf0]  ;;  %v4065_v15 = vld [vmem:[%s4270_s7 + $0x214] sm:$0xf]  ;;  %s4500_s29 = scalar_lea.vmem %s5715_s4, %s3383_s26 }
  0x11   : > { %v1548_v8 = vand.u32 %v1546_v7, %v1340_v6  ;;  %1551 = vmatpush.bf16.msra.mxu0 %v4133_v3  ;;  %4137 = vmatpush.bf16.msra.mxu2 %v4133_v3  ;;  %v3391_v13 = vor.u32 %v3999_v11, %v3388_v12  ;;  %v3652_v16 = vld [vmem:[%s4270_s7 + $0x218] sm:$0xf0]  ;;  %v4001_v21 = vld [vmem:[%s4270_s7 + $0x14] sm:$0xf]  ;;  %v4067_v23 = vld [vmem:[%s4270_s7 + $0x224] sm:$0xf] }
  0x12   : > { %v3655_v17 = vor.u32 %v4065_v15, %v3652_v16  ;;  %v3396_v22 = vld [vmem:[%s4270_s7 + $0x18] sm:$0xf0]  ;;  %v3660_v24 = vld [vmem:[%s4270_s7 + $0x228] sm:$0xf0]  ;;  %v3386_v27 = vld [vmem:[%s4270_s7] sm:$0xf] }
  0x13   : > { %1885 = vmatpush.bf16.msra.mxu1 %v1548_v8  ;;  %4144 = vmatpush.bf16.msra.mxu3 %v1548_v8  ;;  %v3399_v25 = vor.u32 %v4001_v21, %v3396_v22  ;;  %v4000_v28 = vld [vmem:[%s4270_s7 + $0x4] sm:$0xf0]  ;;  %v3642_v29 = vld [vmem:[%s4270_s7 + $0x200] sm:$0xf]  ;;  %v3663_v31 = vor.u32 %v4067_v23, %v3660_v24  ;;  %v4003_v34 = vld [vmem:[%s4270_s7 + $0x24] sm:$0xf] }
  0x14   : > { %v4064_v30 = vld [vmem:[%s4270_s7 + $0x204] sm:$0xf0]  ;;  %v3387_v32 = vor.u32 %v4000_v28, %v3386_v27  ;;  %v3404_v35 = vld [vmem:[%s4270_s7 + $0x28] sm:$0xf0]  ;;  %v4069_v36 = vld [vmem:[%s4270_s7 + $0x234] sm:$0xf] }
  0x15   : > { %1552 = vmatpush.bf16.msra.mxu0 %v4132_v9  ;;  %4138 = vmatpush.bf16.msra.mxu2 %v4132_v9  ;;  %v3643_v33 = vor.u32 %v4064_v30, %v3642_v29  ;;  %v3668_v37 = vld [vmem:[%s4270_s7 + $0x238] sm:$0xf0]  ;;  %v3407_v38 = vor.u32 %v4003_v34, %v3404_v35  ;;  %v3394_v39 = vld [vmem:[%s4270_s7 + $0x10] sm:$0xf]  ;;  %v4002_v40 = vld [vmem:[%s4270_s7 + $0x14] sm:$0xf0] }
  0x16   : > { %v3650_v41 = vld [vmem:[%s4270_s7 + $0x210] sm:$0xf]  ;;  %v4066_v42 = vld [vmem:[%s4270_s7 + $0x214] sm:$0xf0]  ;;  %v3671_v43 = vor.u32 %v4069_v36, %v3668_v37  ;;  %v3395_v44 = vor.u32 %v4002_v40, %v3394_v39  ;;  %v4005_v46 = vld [vmem:[%s4270_s7 + $0x34] sm:$0xf] }
  0x17   : > { %1886 = vmatpush.bf16.msra.mxu1 %v4135_v10  ;;  %4145 = vmatpush.bf16.msra.mxu3 %v4135_v10  ;;  %v3651_v45 = vor.u32 %v4066_v42, %v3650_v41  ;;  %v3412_v47 = vld [vmem:[%s4270_s7 + $0x38] sm:$0xf0]  ;;  %v4071_v48 = vld [vmem:[%s4270_s7 + $0x244] sm:$0xf]  ;;  %v3676_v49 = vld [vmem:[%s4270_s7 + $0x248] sm:$0xf0] }
  0x18   : > { %v3415_v50 = vor.u32 %v4005_v46, %v3412_v47  ;;  %v3402_v51 = vld [vmem:[%s4270_s7 + $0x20] sm:$0xf]  ;;  %v4004_v52 = vld [vmem:[%s4270_s7 + $0x24] sm:$0xf0]  ;;  %v3679_v55 = vor.u32 %v4071_v48, %v3676_v49  ;;  %v4007_v58 = vld [vmem:[%s4270_s7 + $0x44] sm:$0xf] }
  0x19   : > { %1553 = vmatpush.bf16.msra.mxu0 %v4131_v14  ;;  %4139 = vmatpush.bf16.msra.mxu2 %v4131_v14  ;;  %v3658_v53 = vld [vmem:[%s4270_s7 + $0x220] sm:$0xf]  ;;  %v4068_v54 = vld [vmem:[%s4270_s7 + $0x224] sm:$0xf0]  ;;  %v3403_v56 = vor.u32 %v4004_v52, %v3402_v51  ;;  %v3420_v59 = vld [vmem:[%s4270_s7 + $0x48] sm:$0xf0] }
  0x1a   : > { %3932 = vmatmul.msk.bf16.vlgmr.msra.gmra.mxu1 %vm1350_vm2, %v3391_v13  ;;  %3965 = vmatmul.msk.bf16.vlgmr.msra.gmra.mxu3 %vm1350_vm2, %v3655_v17  ;;  %v3659_v57 = vor.u32 %v4068_v54, %v3658_v53  ;;  %v4073_v60 = vld [vmem:[%s4270_s7 + $0x254] sm:$0xf]  ;;  %v3684_v61 = vld [vmem:[%s4270_s7 + $0x258] sm:$0xf0]  ;;  %v3423_v62 = vor.u32 %v4007_v58, %v3420_v59  ;;  %v3410_v63 = vld [vmem:[%s4270_s7 + $0x30] sm:$0xf] }
  0x1b   : > { %v4006_v0 = vld [vmem:[%s4270_s7 + $0x34] sm:$0xf0]  ;;  %v3666_v1 = vld [vmem:[%s4270_s7 + $0x230] sm:$0xf]  ;;  %v3687_v3 = vor.u32 %v4073_v60, %v3684_v61  ;;  %v4009_v6 = vld [vmem:[%s4270_s7 + $0x54] sm:$0xf] }
  0x1c   : > { %v4070_v2 = vld [vmem:[%s4270_s7 + $0x234] sm:$0xf0]  ;;  %v3411_v4 = vor.u32 %v4006_v0, %v3410_v63  ;;  %v3428_v7 = vld [vmem:[%s4270_s7 + $0x58] sm:$0xf0]  ;;  %v4075_v8 = vld [vmem:[%s4270_s7 + $0x264] sm:$0xf] }
  0x1d   : > { %1554 = vmatpush.bf16.msra.mxu0 %v4130_v18  ;;  %4140 = vmatpush.bf16.msra.mxu2 %v4130_v18  ;;  %v3667_v5 = vor.u32 %v4070_v2, %v3666_v1  ;;  %v3692_v9 = vld [vmem:[%s4270_s7 + $0x268] sm:$0xf0]  ;;  %v3431_v10 = vor.u32 %v4009_v6, %v3428_v7  ;;  %v3418_v11 = vld [vmem:[%s4270_s7 + $0x40] sm:$0xf]  ;;  %v4008_v12 = vld [vmem:[%s4270_s7 + $0x44] sm:$0xf0] }
  0x1e   : > { %v3674_v13 = vld [vmem:[%s4270_s7 + $0x240] sm:$0xf]  ;;  %v4072_v14 = vld [vmem:[%s4270_s7 + $0x244] sm:$0xf0]  ;;  %v3695_v15 = vor.u32 %v4075_v8, %v3692_v9  ;;  %v3419_v16 = vor.u32 %v4008_v12, %v3418_v11  ;;  %v4011_v18 = vld [vmem:[%s4270_s7 + $0x64] sm:$0xf] }
  0x1f   : > { %v3675_v17 = vor.u32 %v4072_v14, %v3674_v13  ;;  %v3700_v21 = vld [vmem:[%s4270_s7 + $0x278] sm:$0xf0]  ;;  %v3426_v23 = vld [vmem:[%s4270_s7 + $0x50] sm:$0xf]  ;;  %v4010_v24 = vld [vmem:[%s4270_s7 + $0x54] sm:$0xf0] }
  0x20   : > { %v3427_v28 = vor.u32 %v4010_v24, %v3426_v23  ;;  %v4013_v30 = vld [vmem:[%s4270_s7 + $0x74] sm:$0xf]  ;;  %v3434_v35 = vld [vmem:[%s4270_s7 + $0x60] sm:$0xf]  ;;  %v4012_v36 = vld [vmem:[%s4270_s7 + $0x64] sm:$0xf0] }
  0x21   : > { %1555 = vmatpush.bf16.msra.mxu0 %v4129_v19  ;;  %4141 = vmatpush.bf16.msra.mxu2 %v4129_v19  ;;  %v3436_v19 = vld [vmem:[%s4270_s7 + $0x68] sm:$0xf0]  ;;  %v4205_v37 = vmov 0.0   ;;  %v4076_v39 = vld [vmem:[%s4270_s7 + $0x264] sm:$0xf0]  ;;  %v3435_v41 = vor.u32 %v4012_v36, %v3434_v35 }
  0x22   : > { %v3439_v22 = vor.u32 %v4011_v18, %v3436_v19  ;;  %314 = vst.msk [vmem:[#allocation2] sm:$0xff] %vm313_vm3, %v4205_v37  ;;  %v3442_v46 = vld [vmem:[%s4270_s7 + $0x70] sm:$0xf]  ;;  %v4014_v47 = vld [vmem:[%s4270_s7 + $0x74] sm:$0xf0] }
  0x23   : > { %315 = vst.msk [vmem:[#allocation2 + $0x8] sm:$0xff] %vm313_vm3, %v4205_v37  ;;  %v3698_v48 = vld [vmem:[%s4270_s7 + $0x270] sm:$0xf]  ;;  %v4078_v49 = vld [vmem:[%s4270_s7 + $0x274] sm:$0xf0] }
  0x24   : > { %316 = vst.msk [vmem:[#allocation2 + $0x10] sm:$0xff] %vm313_vm3, %v4205_v37  ;;  %v3699_v51 = vor.u32 %v4078_v49, %v3698_v48  ;;  %v4017_v52 = vld [vmem:[%s4270_s7 + $0x94] sm:$0xf]  ;;  %v3460_v53 = vld [vmem:[%s4270_s7 + $0x98] sm:$0xf0] }
  0x25   : > { %1556 = vmatpush.bf16.msra.mxu0 %v4128_v20  ;;  %4142 = vmatpush.bf16.msra.mxu2 %v4128_v20  ;;  %v4077_v20 = vld [vmem:[%s4270_s7 + $0x274] sm:$0xf]  ;;  %317 = vst.msk [vmem:[#allocation2 + $0x18] sm:$0xff] %vm313_vm3, %v4205_v37  ;;  %v3463_v54 = vor.u32 %v4017_v52, %v3460_v53  ;;  %v4080_v58 = vld [vmem:[%s4270_s7 + $0x284] sm:$0xf0] }
  0x26   : > { %v3703_v27 = vor.u32 %v4077_v20, %v3700_v21  ;;  %318 = vst.msk [vmem:[#allocation2 + $0x20] sm:$0xff] %vm313_vm3, %v4205_v37  ;;  %v4469_v2 = vld [vmem:[%s5713_s2] ss:$0 sm:$0xff]  ;;  %v4081_v14 = vld [vmem:[%s4270_s7 + $0x294] sm:$0xf] }
  0x27   : > { %319 = vst.msk [vmem:[#allocation2 + $0x28] sm:$0xff] %vm313_vm3, %v4205_v37  ;;  %v4019_v18 = vld [vmem:[%s4270_s7 + $0xa4] sm:$0xf]  ;;  %v3468_v19 = vld [vmem:[%s4270_s7 + $0xa8] sm:$0xf0] }
  0x28   : > { %320 = vst.msk [vmem:[#allocation2 + $0x30] sm:$0xff] %vm313_vm3, %v4205_v37  ;;  %v3458_v24 = vld [vmem:[%s4270_s7 + $0x90] sm:$0xf]  ;;  %v3724_v35 = vld [vmem:[%s4270_s7 + $0x2a8] sm:$0xf0] }
  0x29   : > { %1557 = vmatpush.bf16.msra.mxu0 %v4127_v26  ;;  %4143 = vmatpush.bf16.msra.mxu2 %v4127_v26  ;;  %v4074_v26 = vld [vmem:[%s4270_s7 + $0x254] sm:$0xf0]  ;;  %321 = vst.msk [vmem:[#allocation2 + $0x38] sm:$0xff] %vm313_vm3, %v4205_v37  ;;  %v442_v61 = vld [vmem:[#allocation2] sm:$0xff]  ;;  %v4084_v49 = vld [vmem:[%s4270_s7 + $0x2a4] sm:$0xf0] }
  0x2a   : > { %3933 = vmatmul.msk.bf16.gmra.mxu1 %vm1350_vm2, %v3399_v25  ;;  %3966 = vmatmul.msk.bf16.gmra.mxu3 %vm1350_vm2, %v3663_v31  ;;  %v3682_v25 = vld [vmem:[%s4270_s7 + $0x250] sm:$0xf]  ;;  %v3444_v31 = vld [vmem:[%s4270_s7 + $0x78] sm:$0xf0]  ;;  %322 = vst.msk [vmem:[#allocation2 + $0x40] sm:$0xff] %vm313_vm3, %v4205_v37 }
  0x2b   : > { %v3683_v29 = vor.u32 %v4074_v26, %v3682_v25  ;;  %v3447_v34 = vor.u32 %v4013_v30, %v3444_v31  ;;  %323 = vst.msk [vmem:[#allocation2 + $0x48] sm:$0xff] %vm313_vm3, %v4205_v37  ;;  %v4018_v25 = vld [vmem:[%s4270_s7 + $0x94] sm:$0xf0]  ;;  %v3722_v48 = vld [vmem:[%s4270_s7 + $0x2a0] sm:$0xf] }
  0x2c   : > { %1558 = vmatmul.bf16.vlgmr.msra.gmra.mxu0 %v3387_v32  ;;  %1718 = vmatmul.bf16.vlgmr.msra.gmra.mxu2 %v3643_v33  ;;  %v4079_v32 = vld [vmem:[%s4270_s7 + $0x284] sm:$0xf]  ;;  %v3708_v33 = vld [vmem:[%s4270_s7 + $0x288] sm:$0xf0]  ;;  %324 = vst.msk [vmem:[#allocation2 + $0x50] sm:$0xff] %vm313_vm3, %v4205_v37  ;;  %v3459_v26 = vor.u32 %v4018_v25, %v3458_v24 }
  0x2d   : > { %v3711_v40 = vor.u32 %v4079_v32, %v3708_v33  ;;  %325 = vst.msk [vmem:[#allocation2 + $0x58] sm:$0xff] %vm313_vm3, %v4205_v37  ;;  %v3732_v52 = vld [vmem:[%s4270_s7 + $0x2b8] sm:$0xf0]  ;;  %v3730_v25 = vld [vmem:[%s4270_s7 + $0x2b0] sm:$0xf] }
  0x2e   : > { %326 = vst.msk [vmem:[#allocation2 + $0x60] sm:$0xff] %vm313_vm3, %v4205_v37 }
  0x2f   : > { %327 = vst.msk [vmem:[#allocation2 + $0x68] sm:$0xff] %vm313_vm3, %v4205_v37 }
  0x30   : > { %328 = vst.msk [vmem:[#allocation2 + $0x70] sm:$0xff] %vm313_vm3, %v4205_v37 }
  0x31   : > { %329 = vst.msk [vmem:[#allocation2 + $0x78] sm:$0xff] %vm313_vm3, %v4205_v37 }
  0x32   : > { %330 = vst.msk [vmem:[#allocation2 + $0x80] sm:$0xff] %vm313_vm3, %v4205_v37 }
  0x33   : > { %331 = vst.msk [vmem:[#allocation2 + $0x88] sm:$0xff] %vm313_vm3, %v4205_v37 }
  0x34   : > { %332 = vst.msk [vmem:[#allocation2 + $0x90] sm:$0xff] %vm313_vm3, %v4205_v37 }
  0x35   : > { %333 = vst.msk [vmem:[#allocation2 + $0x98] sm:$0xff] %vm313_vm3, %v4205_v37 }
  0x36   : > { %334 = vst.msk [vmem:[#allocation2 + $0xa0] sm:$0xff] %vm313_vm3, %v4205_v37 }
  0x37   : > { %335 = vst.msk [vmem:[#allocation2 + $0xa8] sm:$0xff] %vm313_vm3, %v4205_v37 }
  0x38   : > { %336 = vst.msk [vmem:[#allocation2 + $0xb0] sm:$0xff] %vm313_vm3, %v4205_v37 }
  0x39   : > { %337 = vst.msk [vmem:[#allocation2 + $0xb8] sm:$0xff] %vm313_vm3, %v4205_v37 }
  0x3a   : > { %3934 = vmatmul.msk.bf16.gmra.mxu1 %vm1350_vm2, %v3407_v38  ;;  %3967 = vmatmul.msk.bf16.gmra.mxu3 %vm1350_vm2, %v3671_v43  ;;  %v3690_v38 = vld [vmem:[%s4270_s7 + $0x260] sm:$0xf]  ;;  %v4015_v43 = vld [vmem:[%s4270_s7 + $0x84] sm:$0xf]  ;;  %338 = vst.msk [vmem:[#allocation2 + $0xc0] sm:$0xff] %vm313_vm3, %v4205_v37 }
  0x3b   : > { %v3691_v42 = vor.u32 %v4076_v39, %v3690_v38  ;;  %339 = vst.msk [vmem:[#allocation2 + $0xc8] sm:$0xff] %vm313_vm3, %v4205_v37  ;;  %v4021_v39 = vld [vmem:[%s4270_s7 + $0xb4] sm:$0xf] }
  0x3c   : > { %1563 = vmatmul.bf16.gmra.mxu0 %v3395_v44  ;;  %1723 = vmatmul.bf16.gmra.mxu2 %v3651_v45  ;;  %v3452_v44 = vld [vmem:[%s4270_s7 + $0x88] sm:$0xf0]  ;;  %340 = vst.msk [vmem:[#allocation2 + $0xd0] sm:$0xff] %vm313_vm3, %v4205_v37 }
  0x3d   : > { %v3455_v45 = vor.u32 %v4015_v43, %v3452_v44  ;;  %341 = vst.msk [vmem:[#allocation2 + $0xd8] sm:$0xff] %vm313_vm3, %v4205_v37 }
  0x3e   : > { %342 = vst.msk [vmem:[#allocation2 + $0xe0] sm:$0xff] %vm313_vm3, %v4205_v37 }
  0x3f   : > { %343 = vst.msk [vmem:[#allocation2 + $0xe8] sm:$0xff] %vm313_vm3, %v4205_v37 }
  0x40   : > { %344 = vst.msk [vmem:[#allocation2 + $0xf0] sm:$0xff] %vm313_vm3, %v4205_v37 }
  0x41   : > { %345 = vst.msk [vmem:[#allocation2 + $0xf8] sm:$0xff] %vm313_vm3, %v4205_v37 }
  0x42   : > { %346 = vst.msk [vmem:[#allocation2 + $0x100] sm:$0xff] %vm313_vm3, %v4205_v37 }
  0x43   : > { %347 = vst.msk [vmem:[#allocation2 + $0x108] sm:$0xff] %vm313_vm3, %v4205_v37 }
  0x44   : > { %348 = vst.msk [vmem:[#allocation2 + $0x110] sm:$0xff] %vm313_vm3, %v4205_v37 }
  0x45   : > { %349 = vst.msk [vmem:[#allocation2 + $0x118] sm:$0xff] %vm313_vm3, %v4205_v37 }
  0x46   : > { %350 = vst.msk [vmem:[#allocation2 + $0x120] sm:$0xff] %vm313_vm3, %v4205_v37 }
  0x47   : > { %351 = vst.msk [vmem:[#allocation2 + $0x128] sm:$0xff] %vm313_vm3, %v4205_v37 }
  0x48   : > { %352 = vst.msk [vmem:[#allocation2 + $0x130] sm:$0xff] %vm313_vm3, %v4205_v37 }
  0x49   : > { %353 = vst.msk [vmem:[#allocation2 + $0x138] sm:$0xff] %vm313_vm3, %v4205_v37 }
  0x4a   : > { %3935 = vmatmul.msk.bf16.gmra.mxu1 %vm1350_vm2, %v3415_v50  ;;  %3968 = vmatmul.msk.bf16.gmra.mxu3 %vm1350_vm2, %v3679_v55  ;;  %v3443_v50 = vor.u32 %v4014_v47, %v3442_v46  ;;  %v3450_v55 = vld [vmem:[%s4270_s7 + $0x80] sm:$0xf]  ;;  %354 = vst.msk [vmem:[#allocation2 + $0x140] sm:$0xff] %vm313_vm3, %v4205_v37  ;;  %v4020_v46 = vld [vmem:[%s4270_s7 + $0xa4] sm:$0xf0] }
  0x4b   : > { %355 = vst.msk [vmem:[#allocation2 + $0x148] sm:$0xff] %vm313_vm3, %v4205_v37 }
  0x4c   : > { %1568 = vmatmul.bf16.gmra.mxu0 %v3403_v56  ;;  %1728 = vmatmul.bf16.gmra.mxu2 %v3659_v57  ;;  %v4016_v56 = vld [vmem:[%s4270_s7 + $0x84] sm:$0xf0]  ;;  %v3706_v57 = vld [vmem:[%s4270_s7 + $0x280] sm:$0xf]  ;;  %356 = vst.msk [vmem:[#allocation2 + $0x150] sm:$0xff] %vm313_vm3, %v4205_v37 }
  0x4d   : > { %v3451_v59 = vor.u32 %v4016_v56, %v3450_v55  ;;  %v3707_v63 = vor.u32 %v4080_v58, %v3706_v57  ;;  %357 = vst.msk [vmem:[#allocation2 + $0x158] sm:$0xff] %vm313_vm3, %v4205_v37  ;;  %v443_v55 = vld [vmem:[#allocation2 + $0x8] sm:$0xff] }
  0x4e   : > { %358 = vst.msk [vmem:[#allocation2 + $0x160] sm:$0xff] %vm313_vm3, %v4205_v37 }
  0x4f   : > { %359 = vst.msk [vmem:[#allocation2 + $0x168] sm:$0xff] %vm313_vm3, %v4205_v37 }
  0x50   : > { %360 = vst.msk [vmem:[#allocation2 + $0x170] sm:$0xff] %vm313_vm3, %v4205_v37 }
  0x51   : > { %361 = vst.msk [vmem:[#allocation2 + $0x178] sm:$0xff] %vm313_vm3, %v4205_v37 }
  0x52   : > { %362 = vst.msk [vmem:[#allocation2 + $0x180] sm:$0xff] %vm313_vm3, %v4205_v37 }
  0x53   : > { %363 = vst.msk [vmem:[#allocation2 + $0x188] sm:$0xff] %vm313_vm3, %v4205_v37 }
  0x54   : > { %364 = vst.msk [vmem:[#allocation2 + $0x190] sm:$0xff] %vm313_vm3, %v4205_v37 }
  0x55   : > { %365 = vst.msk [vmem:[#allocation2 + $0x198] sm:$0xff] %vm313_vm3, %v4205_v37 }
  0x56   : > { %366 = vst.msk [vmem:[#allocation2 + $0x1a0] sm:$0xff] %vm313_vm3, %v4205_v37 }
  0x57   : > { %367 = vst.msk [vmem:[#allocation2 + $0x1a8] sm:$0xff] %vm313_vm3, %v4205_v37 }
  0x58   : > { %368 = vst.msk [vmem:[#allocation2 + $0x1b0] sm:$0xff] %vm313_vm3, %v4205_v37 }
  0x59   : > { %369 = vst.msk [vmem:[#allocation2 + $0x1b8] sm:$0xff] %vm313_vm3, %v4205_v37 }
  0x5a   : > { %3936 = vmatmul.msk.bf16.gmra.mxu1 %vm1350_vm2, %v3423_v62  ;;  %3969 = vmatmul.msk.bf16.gmra.mxu3 %vm1350_vm2, %v3687_v3  ;;  %v4478_v3 = vld [vmem:[%s5714_s3] ss:$0 sm:$0xff]  ;;  %370 = vst.msk [vmem:[#allocation2 + $0x1c0] sm:$0xff] %vm313_vm3, %v4205_v37 }
  0x5b   : > { %371 = vst.msk [vmem:[#allocation2 + $0x1c8] sm:$0xff] %vm313_vm3, %v4205_v37 }
  0x5c   : > { %1573 = vmatmul.bf16.gmra.mxu0 %v3411_v4  ;;  %1733 = vmatmul.bf16.gmra.mxu2 %v3667_v5  ;;  %372 = vst.msk [vmem:[#allocation2 + $0x1d0] sm:$0xff] %vm313_vm3, %v4205_v37 }
  0x5d   : > { %373 = vst.msk [vmem:[#allocation2 + $0x1d8] sm:$0xff] %vm313_vm3, %v4205_v37 }
  0x5e   : > { %374 = vst.msk [vmem:[#allocation2 + $0x1e0] sm:$0xff] %vm313_vm3, %v4205_v37 }
  0x5f   : > { %375 = vst.msk [vmem:[#allocation2 + $0x1e8] sm:$0xff] %vm313_vm3, %v4205_v37 }
  0x60   : > { %376 = vst.msk [vmem:[#allocation2 + $0x1f0] sm:$0xff] %vm313_vm3, %v4205_v37 }
  0x61   : > { %377 = vst.msk [vmem:[#allocation2 + $0x1f8] sm:$0xff] %vm313_vm3, %v4205_v37 }
  0x62   : > { %378 = vst.msk [vmem:[#allocation2 + $0x200] sm:$0xff] %vm313_vm3, %v4205_v37 }
  0x63   : > { %379 = vst.msk [vmem:[#allocation2 + $0x208] sm:$0xff] %vm313_vm3, %v4205_v37 }
  0x64   : > { %380 = vst.msk [vmem:[#allocation2 + $0x210] sm:$0xff] %vm313_vm3, %v4205_v37 }
  0x65   : > { %381 = vst.msk [vmem:[#allocation2 + $0x218] sm:$0xff] %vm313_vm3, %v4205_v37 }
  0x66   : > { %382 = vst.msk [vmem:[#allocation2 + $0x220] sm:$0xff] %vm313_vm3, %v4205_v37 }
  0x67   : > { %383 = vst.msk [vmem:[#allocation2 + $0x228] sm:$0xff] %vm313_vm3, %v4205_v37 }
  0x68   : > { %384 = vst.msk [vmem:[#allocation2 + $0x230] sm:$0xff] %vm313_vm3, %v4205_v37 }
  0x69   : > { %385 = vst.msk [vmem:[#allocation2 + $0x238] sm:$0xff] %vm313_vm3, %v4205_v37 }
  0x6a   : > { %3937 = vmatmul.msk.bf16.gmra.mxu1 %vm1350_vm2, %v3431_v10  ;;  %3970 = vmatmul.msk.bf16.gmra.mxu3 %vm1350_vm2, %v3695_v15  ;;  %386 = vst.msk [vmem:[#allocation2 + $0x240] sm:$0xff] %vm313_vm3, %v4205_v37  ;;  %v3716_v15 = vld [vmem:[%s4270_s7 + $0x298] sm:$0xf0] }
  0x6b   : > { %387 = vst.msk [vmem:[#allocation2 + $0x248] sm:$0xff] %vm313_vm3, %v4205_v37 }
  0x6c   : > { %1578 = vmatmul.bf16.gmra.mxu0 %v3419_v16  ;;  %1738 = vmatmul.bf16.gmra.mxu2 %v3675_v17  ;;  %388 = vst.msk [vmem:[#allocation2 + $0x250] sm:$0xff] %vm313_vm3, %v4205_v37  ;;  %v3719_v16 = vor.u32 %v4081_v14, %v3716_v15 }
  0x6d   : > { %389 = vst.msk [vmem:[#allocation2 + $0x258] sm:$0xff] %vm313_vm3, %v4205_v37 }
  0x6e   : > { %390 = vst.msk [vmem:[#allocation2 + $0x260] sm:$0xff] %vm313_vm3, %v4205_v37 }
  0x6f   : > { %391 = vst.msk [vmem:[#allocation2 + $0x268] sm:$0xff] %vm313_vm3, %v4205_v37 }
  0x70   : > { %392 = vst.msk [vmem:[#allocation2 + $0x270] sm:$0xff] %vm313_vm3, %v4205_v37 }
  0x71   : > { %393 = vst.msk [vmem:[#allocation2 + $0x278] sm:$0xff] %vm313_vm3, %v4205_v37 }
  0x72   : > { %394 = vst.msk [vmem:[#allocation2 + $0x280] sm:$0xff] %vm313_vm3, %v4205_v37 }
  0x73   : > { %395 = vst.msk [vmem:[#allocation2 + $0x288] sm:$0xff] %vm313_vm3, %v4205_v37 }
  0x74   : > { %396 = vst.msk [vmem:[#allocation2 + $0x290] sm:$0xff] %vm313_vm3, %v4205_v37 }
  0x75   : > { %397 = vst.msk [vmem:[#allocation2 + $0x298] sm:$0xff] %vm313_vm3, %v4205_v37 }
  0x76   : > { %398 = vst.msk [vmem:[#allocation2 + $0x2a0] sm:$0xff] %vm313_vm3, %v4205_v37 }
  0x77   : > { %399 = vst.msk [vmem:[#allocation2 + $0x2a8] sm:$0xff] %vm313_vm3, %v4205_v37 }
  0x78   : > { %400 = vst.msk [vmem:[#allocation2 + $0x2b0] sm:$0xff] %vm313_vm3, %v4205_v37 }
  0x79   : > { %401 = vst.msk [vmem:[#allocation2 + $0x2b8] sm:$0xff] %vm313_vm3, %v4205_v37 }
  0x7a   : > { %3938 = vmatmul.msk.bf16.gmra.mxu1 %vm1350_vm2, %v3439_v22  ;;  %3971 = vmatmul.msk.bf16.gmra.mxu3 %vm1350_vm2, %v3703_v27  ;;  %402 = vst.msk [vmem:[#allocation2 + $0x2c0] sm:$0xff] %vm313_vm3, %v4205_v37  ;;  %v3471_v22 = vor.u32 %v4019_v18, %v3468_v19  ;;  %v3714_v27 = vld [vmem:[%s4270_s7 + $0x290] sm:$0xf] }
  0x7b   : > { %403 = vst.msk [vmem:[#allocation2 + $0x2c8] sm:$0xff] %vm313_vm3, %v4205_v37 }
  0x7c   : > { %1583 = vmatmul.bf16.gmra.mxu0 %v3427_v28  ;;  %1743 = vmatmul.bf16.gmra.mxu2 %v3683_v29  ;;  %404 = vst.msk [vmem:[#allocation2 + $0x2d0] sm:$0xff] %vm313_vm3, %v4205_v37  ;;  %v4082_v28 = vld [vmem:[%s4270_s7 + $0x294] sm:$0xf0] }
  0x7d   : > { %405 = vst.msk [vmem:[#allocation2 + $0x2d8] sm:$0xff] %vm313_vm3, %v4205_v37  ;;  %v3715_v29 = vor.u32 %v4082_v28, %v3714_v27  ;;  %v511_v28 = vld [vmem:[#allocation2 + $0x228] sm:$0xff] }
  0x7e   : > { %406 = vst.msk [vmem:[#allocation2 + $0x2e0] sm:$0xff] %vm313_vm3, %v4205_v37 }
  0x7f   : > { %407 = vst.msk [vmem:[#allocation2 + $0x2e8] sm:$0xff] %vm313_vm3, %v4205_v37 }
  0x80   : > { %408 = vst.msk [vmem:[#allocation2 + $0x2f0] sm:$0xff] %vm313_vm3, %v4205_v37 }
  0x81   : > { %409 = vst.msk [vmem:[#allocation2 + $0x2f8] sm:$0xff] %vm313_vm3, %v4205_v37 }
  0x82   : > { %410 = vst.msk [vmem:[#allocation2 + $0x300] sm:$0xff] %vm313_vm3, %v4205_v37 }
  0x83   : > { %411 = vst.msk [vmem:[#allocation2 + $0x308] sm:$0xff] %vm313_vm3, %v4205_v37 }
  0x84   : > { %412 = vst.msk [vmem:[#allocation2 + $0x310] sm:$0xff] %vm313_vm3, %v4205_v37 }
  0x85   : > { %413 = vst.msk [vmem:[#allocation2 + $0x318] sm:$0xff] %vm313_vm3, %v4205_v37 }
  0x86   : > { %414 = vst.msk [vmem:[#allocation2 + $0x320] sm:$0xff] %vm313_vm3, %v4205_v37 }
  0x87   : > { %415 = vst.msk [vmem:[#allocation2 + $0x328] sm:$0xff] %vm313_vm3, %v4205_v37 }
  0x88   : > { %416 = vst.msk [vmem:[#allocation2 + $0x330] sm:$0xff] %vm313_vm3, %v4205_v37 }
  0x89   : > { %417 = vst.msk [vmem:[#allocation2 + $0x338] sm:$0xff] %vm313_vm3, %v4205_v37 }
  0x8a   : > { %3939 = vmatmul.msk.bf16.gmra.mxu1 %vm1350_vm2, %v3447_v34  ;;  %3972 = vmatmul.msk.bf16.gmra.mxu3 %vm1350_vm2, %v3711_v40  ;;  %418 = vst.msk [vmem:[#allocation2 + $0x340] sm:$0xff] %vm313_vm3, %v4205_v37  ;;  %v4083_v34 = vld [vmem:[%s4270_s7 + $0x2a4] sm:$0xf]  ;;  %v3476_v40 = vld [vmem:[%s4270_s7 + $0xb8] sm:$0xf0] }
  0x8b   : > { %419 = vst.msk [vmem:[#allocation2 + $0x348] sm:$0xff] %vm313_vm3, %v4205_v37  ;;  %v3727_v36 = vor.u32 %v4083_v34, %v3724_v35  ;;  %v3479_v43 = vor.u32 %v4021_v39, %v3476_v40  ;;  %v448_v34 = vld [vmem:[#allocation2 + $0x30] sm:$0xff] }
  0x8c   : > { %1588 = vmatmul.bf16.gmra.mxu0 %v3435_v41  ;;  %1748 = vmatmul.bf16.gmra.mxu2 %v3691_v42  ;;  %420 = vst.msk [vmem:[#allocation2 + $0x350] sm:$0xff] %vm313_vm3, %v4205_v37 }
  0x8d   : > { %421 = vst.msk [vmem:[#allocation2 + $0x358] sm:$0xff] %vm313_vm3, %v4205_v37 }
  0x8e   : > { %422 = vst.msk [vmem:[#allocation2 + $0x360] sm:$0xff] %vm313_vm3, %v4205_v37 }
  0x8f   : > { %423 = vst.msk [vmem:[#allocation2 + $0x368] sm:$0xff] %vm313_vm3, %v4205_v37 }
  0x90   : > { %424 = vst.msk [vmem:[#allocation2 + $0x370] sm:$0xff] %vm313_vm3, %v4205_v37 }
  0x91   : > { %425 = vst.msk [vmem:[#allocation2 + $0x378] sm:$0xff] %vm313_vm3, %v4205_v37 }
  0x92   : > { %426 = vst.msk [vmem:[#allocation2 + $0x380] sm:$0xff] %vm313_vm3, %v4205_v37 }
  0x93   : > { %427 = vst.msk [vmem:[#allocation2 + $0x388] sm:$0xff] %vm313_vm3, %v4205_v37 }
  0x94   : > { %428 = vst.msk [vmem:[#allocation2 + $0x390] sm:$0xff] %vm313_vm3, %v4205_v37 }
  0x95   : > { %429 = vst.msk [vmem:[#allocation2 + $0x398] sm:$0xff] %vm313_vm3, %v4205_v37 }
  0x96   : > { %430 = vst.msk [vmem:[#allocation2 + $0x3a0] sm:$0xff] %vm313_vm3, %v4205_v37 }
  0x97   : > { %v1888_v60 = vpop.f32.mrf.mxu1  ;;  %431 = vst.msk [vmem:[#allocation2 + $0x3a8] sm:$0xff] %vm313_vm3, %v4205_v37 }
  0x98   : > { %432 = vst.msk [vmem:[#allocation2 + $0x3b0] sm:$0xff] %vm313_vm3, %v4205_v37 }
  0x99   : > { %433 = vst.msk [vmem:[#allocation2 + $0x3b8] sm:$0xff] %vm313_vm3, %v4205_v37 }
  0x9a   : > { %3940 = vmatmul.msk.bf16.gmra.mxu1 %vm1350_vm2, %v3455_v45  ;;  %3973 = vmatmul.msk.bf16.gmra.mxu3 %vm1350_vm2, %v3719_v16  ;;  %v3466_v45 = vld [vmem:[%s4270_s7 + $0xa0] sm:$0xf]  ;;  %434 = vst.msk [vmem:[#allocation2 + $0x3c0] sm:$0xff] %vm313_vm3, %v4205_v37 }
  0x9b   : > { %v3467_v47 = vor.u32 %v4020_v46, %v3466_v45  ;;  %435 = vst.msk [vmem:[#allocation2 + $0x3c8] sm:$0xff] %vm313_vm3, %v4205_v37  ;;  %v510_v16 = vld [vmem:[#allocation2 + $0x220] sm:$0xff] }
  0x9c   : > { %1593 = vmatmul.bf16.gmra.mxu0 %v3443_v50  ;;  %1753 = vmatmul.bf16.gmra.mxu2 %v3699_v51  ;;  %v3723_v50 = vor.u32 %v4084_v49, %v3722_v48  ;;  %v4085_v51 = vld [vmem:[%s4270_s7 + $0x2b4] sm:$0xf]  ;;  %436 = vst.msk [vmem:[#allocation2 + $0x3d0] sm:$0xff] %vm313_vm3, %v4205_v37 }
  0x9d   : > { %v4613_v21 = vpop.f32.mrf.mxu3  ;;  %437 = vst.msk [vmem:[#allocation2 + $0x3d8] sm:$0xff] %vm313_vm3, %v4205_v37 }
  0x9e   : > { %438 = vst.msk [vmem:[#allocation2 + $0x3e0] sm:$0xff] %vm313_vm3, %v4205_v37 }
  0x9f   : > { %v4530_v9 = vpop.f32.mrf.mxu1  ;;  %439 = vst.msk [vmem:[#allocation2 + $0x3e8] sm:$0xff] %vm313_vm3, %v4205_v37 }
  0xa0   : > { %440 = vst.msk [vmem:[#allocation2 + $0x3f0] sm:$0xff] %vm313_vm3, %v4205_v37 }
  0xa1   : > { %441 = vst.msk [vmem:[#allocation2 + $0x3f8] sm:$0xff] %vm313_vm3, %v4205_v37 }
  0xa5   : > { %v2055_v32 = vpop.f32.mrf.mxu3 }
  0xa7   : > { %v4552_v10 = vpop.f32.mrf.mxu1 }
  0xa9   : > { %v1559_v62 = vpop.f32.mrf.mxu0 }
  0xaa   : > { %3941 = vmatmul.msk.bf16.gmra.mxu1 %vm1350_vm2, %v3463_v54  ;;  %v1889_v0 = vadd.f32 %v1888_v60, %v1559_v62  ;;  %3974 = vmatmul.msk.bf16.gmra.mxu3 %vm1350_vm2, %v3727_v36  ;;  %v508_v62 = vld [vmem:[#allocation2 + $0x210] sm:$0xff] }
  0xac   : > { %v2208_v1 = vadd.f32 %v1889_v0, %v442_v61  ;;  %1598 = vmatmul.bf16.gmra.mxu0 %v3451_v59  ;;  %1758 = vmatmul.bf16.gmra.mxu2 %v3707_v63  ;;  %v444_v59 = vld [vmem:[#allocation2 + $0x10] sm:$0xff]  ;;  %v3735_v61 = vor.u32 %v4085_v51, %v3732_v52 }
  0xad   : > { %v2058_v42 = vpop.f32.mrf.mxu3 }
  0xae   : > { %2337 = vst.msk [vmem:[#allocation2] sm:$0xff] %vm313_vm3, %v2208_v1 }
  0xaf   : > { %v4576_v11 = vpop.f32.mrf.mxu1  ;;  %v4580_v12 = vpop.f32.mrf.mxu2 }
  0xb1   : > { %v4586_v13 = vpop.f32.mrf.mxu0 }
  0xb2   : > { %v1891_v53 = vadd.f32 %v4530_v9, %v4586_v13  ;;  %v509_v9 = vld [vmem:[#allocation2 + $0x218] sm:$0xff]  ;;  %v446_v13 = vld [vmem:[#allocation2 + $0x20] sm:$0xff] }
  0xb4   : > { %v2209_v1 = vadd.f32 %v1891_v53, %v443_v55  ;;  %v4087_v55 = vld [vmem:[%s4270_s7 + $0x2c4] sm:$0xf] }
  0xb5   : > { %v2468_v4 = vld [vmem:[#allocation2] sm:$0xff]  ;;  %v2060_v58 = vpop.f32.mrf.mxu3 }
  0xb6   : > { %v2600_v5 = vmul.f32 %v4469_v2, %v2468_v4  ;;  %v445_v4 = vld [vmem:[#allocation2 + $0x18] sm:$0xff]  ;;  %2338 = vst.msk [vmem:[#allocation2 + $0x8] sm:$0xff] %vm313_vm3, %v2209_v1 }
  0xb7   : > { %v4605_v17 = vpop.f32.mrf.mxu1  ;;  %v4611_v20 = vpop.f32.mrf.mxu2 }
  0xb8   : > { %v2732_v6 = vadd.f32 %v4478_v3, %v2600_v5 }
  0xb9   : > { %v1564_v23 = vpop.f32.mrf.mxu0 }
  0xba   : > { %v2860_v7 = vmax.f32 %v2732_v6, 0.0  ;;  %3942 = vmatmul.msk.bf16.gmra.mxu1 %vm1350_vm2, %v3471_v22  ;;  %v1894_v56 = vadd.f32 %v4552_v10, %v1564_v23  ;;  %v4023_v6 = vld [vmem:[%s4270_s7 + $0xc4] sm:$0xf]  ;;  %3975 = vmatmul.msk.bf16.gmra.mxu3 %vm1350_vm2, %v3735_v61  ;;  %v447_v23 = vld [vmem:[#allocation2 + $0x28] sm:$0xff] }
  0xbc   : > { %v2988_v8 = vpack.c.bf16 %v2860_v7, %v2860_v7  ;;  %1603 = vmatmul.bf16.gmra.mxu0 %v3459_v26  ;;  %1763 = vmatmul.bf16.gmra.mxu2 %v3715_v29  ;;  %v3484_v7 = vld [vmem:[%s4270_s7 + $0xc8] sm:$0xf0]  ;;  %v4086_v26 = vld [vmem:[%s4270_s7 + $0x2b4] sm:$0xf0] }
  0xbd   : > { %v3487_v19 = vor.u32 %v4023_v6, %v3484_v7  ;;  %v2063_v29 = vpop.f32.mrf.mxu3  ;;  %v3731_v36 = vor.u32 %v4086_v26, %v3730_v25 }
  0xbe   : > { %3117 = vst.msk [vmem:[%s4500_s29] sm:$0xf] %vm3116_vm4, %v2988_v8  ;;  %v2210_v8 = vadd.f32 %v1894_v56, %v444_v59  ;;  %v3740_v56 = vld [vmem:[%s4270_s7 + $0x2c8] sm:$0xf0] }
  0xbf   : > { %v4634_v30 = vpop.f32.mrf.mxu1  ;;  %v1724_v31 = vpop.f32.mrf.mxu2  ;;  %v3743_v61 = vor.u32 %v4087_v55, %v3740_v56  ;;  %v4088_v56 = vld [vmem:[%s4270_s7 + $0x2c4] sm:$0xf0] }
  0xc0   : > { %v2054_v60 = vadd.f32 %v4613_v21, %v1724_v31  ;;  %v3474_v21 = vld [vmem:[%s4270_s7 + $0xb0] sm:$0xf]  ;;  %2339 = vst.msk [vmem:[#allocation2 + $0x10] sm:$0xff] %vm313_vm3, %v2210_v8 }
  0xc1   : > { %v1566_v33 = vpop.f32.mrf.mxu0 }
  0xc2   : > { %v1896_v63 = vadd.f32 %v4576_v11, %v1566_v33  ;;  %v2274_v11 = vadd.f32 %v2054_v60, %v508_v62 }
  0xc4   : > { %v2211_v15 = vadd.f32 %v1896_v63, %v445_v4  ;;  %2403 = vst.msk [vmem:[#allocation2 + $0x210] sm:$0xff] %vm313_vm3, %v2274_v11 }
  0xc5   : > { %v2065_v49 = vpop.f32.mrf.mxu3 }
  0xc6   : > { %2340 = vst.msk [vmem:[#allocation2 + $0x18] sm:$0xff] %vm313_vm3, %v2211_v15 }
  0xc7   : > { %v4655_v38 = vpop.f32.mrf.mxu1  ;;  %v1726_v41 = vpop.f32.mrf.mxu2 }
  0xc8   : > { %v2056_v5 = vadd.f32 %v2055_v32, %v1726_v41 }
  0xc9   : > { %v1569_v44 = vpop.f32.mrf.mxu0 }
  0xca   : > { %3943 = vmatmul.msk.bf16.gmra.mxu1 %vm1350_vm2, %v3479_v43  ;;  %v1899_v10 = vadd.f32 %v4605_v17, %v1569_v44  ;;  %v4022_v17 = vld [vmem:[%s4270_s7 + $0xb4] sm:$0xf0]  ;;  %v2275_v22 = vadd.f32 %v2056_v5, %v509_v9  ;;  %v2470_v44 = vld [vmem:[#allocation2 + $0x10] sm:$0xff]  ;;  %3976 = vmatmul.msk.bf16.gmra.mxu3 %vm1350_vm2, %v3743_v61 }
  0xcb   : > { %v3475_v32 = vor.u32 %v4022_v17, %v3474_v21  ;;  %v2534_v46 = vld [vmem:[#allocation2 + $0x210] sm:$0xff] }
  0xcc   : > { %1608 = vmatmul.bf16.gmra.mxu0 %v3467_v47  ;;  %1768 = vmatmul.bf16.gmra.mxu2 %v3723_v50  ;;  %v2212_v27 = vadd.f32 %v1899_v10, %v446_v13  ;;  %2404 = vst.msk [vmem:[#allocation2 + $0x218] sm:$0xff] %vm313_vm3, %v2275_v22  ;;  %v512_v47 = vld [vmem:[#allocation2 + $0x230] sm:$0xff]  ;;  %v2666_v51 = vmul.f32 %v4469_v2, %v2534_v46  ;;  %v449_v46 = vld [vmem:[#allocation2 + $0x38] sm:$0xff] }
  0xcd   : > { %v2471_v52 = vld [vmem:[#allocation2 + $0x18] sm:$0xff]  ;;  %v4025_v17 = vld [vmem:[%s4270_s7 + $0xd4] sm:$0xf] }
  0xce   : > { %2341 = vst.msk [vmem:[#allocation2 + $0x20] sm:$0xff] %vm313_vm3, %v2212_v27  ;;  %v2798_v63 = vadd.f32 %v4478_v3, %v2666_v51 }
  0xcf   : > { %v4684_v54 = vpop.f32.mrf.mxu1  ;;  %v1729_v57 = vpop.f32.mrf.mxu2 }
  0xd0   : > { %v2059_v14 = vadd.f32 %v2058_v42, %v1729_v57  ;;  %v2469_v42 = vld [vmem:[#allocation2 + $0x8] sm:$0xff]  ;;  %v2926_v10 = vmax.f32 %v2798_v63, 0.0 }
  0xd1   : > { %v1571_v0 = vpop.f32.mrf.mxu0  ;;  %v2601_v43 = vmul.f32 %v4469_v2, %v2469_v42  ;;  %v4024_v42 = vld [vmem:[%s4270_s7 + $0xc4] sm:$0xf0] }
  0xd2   : > { %v1901_v18 = vadd.f32 %v4634_v30, %v1571_v0  ;;  %v2276_v30 = vadd.f32 %v2059_v14, %v510_v16  ;;  %v3054_v22 = vpack.c.bf16 %v2926_v10, %v2926_v10 }
  0xd3   : > { %v2733_v50 = vadd.f32 %v4478_v3, %v2601_v43  ;;  %v2535_v59 = vld [vmem:[#allocation2 + $0x218] sm:$0xff] }
  0xd4   : > { %v2213_v33 = vadd.f32 %v1901_v18, %v447_v23  ;;  %2405 = vst.msk [vmem:[#allocation2 + $0x220] sm:$0xff] %vm313_vm3, %v2276_v30  ;;  %v2667_v0 = vmul.f32 %v4469_v2, %v2535_v59  ;;  %v450_v59 = vld [vmem:[#allocation2 + $0x40] sm:$0xff] }
  0xd5   : > { %v2861_v62 = vmax.f32 %v2733_v50, 0.0  ;;  %v2472_v1 = vld [vmem:[#allocation2 + $0x20] sm:$0xff]  ;;  %3183 = vst.msk [vmem:[%s4500_s29 + $0x108] sm:$0xf] %vm3116_vm4, %v3054_v22 }
  0xd6   : > { %2342 = vst.msk [vmem:[#allocation2 + $0x28] sm:$0xff] %vm313_vm3, %v2213_v33  ;;  %v2604_v7 = vmul.f32 %v4469_v2, %v2472_v1  ;;  %v2799_v11 = vadd.f32 %v4478_v3, %v2667_v0  ;;  %v3738_v50 = vld [vmem:[%s4270_s7 + $0x2c0] sm:$0xf] }
  0xd7   : > { %v4711_v24 = vpop.f32.mrf.mxu1  ;;  %v1731_v37 = vpop.f32.mrf.mxu2  ;;  %v2989_v9 = vpack.c.bf16 %v2861_v62, %v2861_v62  ;;  %v3739_v1 = vor.u32 %v4088_v56, %v3738_v50 }
  0xd8   : > { %v2061_v31 = vadd.f32 %v2060_v58, %v1731_v37  ;;  %v2603_v58 = vmul.f32 %v4469_v2, %v2471_v52  ;;  %v2736_v18 = vadd.f32 %v4478_v3, %v2604_v7  ;;  %v2927_v23 = vmax.f32 %v2799_v11, 0.0  ;;  %v3492_v37 = vld [vmem:[%s4270_s7 + $0xd8] sm:$0xf0] }
  0xd9   : > { %v1574_v35 = vpop.f32.mrf.mxu0  ;;  %3118 = vst.msk [vmem:[%s4500_s29 + $0x4] sm:$0xf] %vm3116_vm4, %v2989_v9  ;;  %v514_v9 = vld [vmem:[#allocation2 + $0x240] sm:$0xff] }
  0xda   : > { %3944 = vmatmul.msk.bf16.gmra.mxu1 %vm1350_vm2, %v3487_v19  ;;  %v2277_v39 = vadd.f32 %v2061_v31, %v511_v28  ;;  %v1904_v40 = vadd.f32 %v4655_v38, %v1574_v35  ;;  %v2602_v38 = vmul.f32 %v4469_v2, %v2470_v44  ;;  %v2735_v6 = vadd.f32 %v4478_v3, %v2603_v58  ;;  %v3482_v35 = vld [vmem:[%s4270_s7 + $0xc0] sm:$0xf] }
  0xdb   : > { %v2536_v8 = vld [vmem:[#allocation2 + $0x220] sm:$0xff]  ;;  %v2864_v30 = vmax.f32 %v2736_v18, 0.0 }
  0xdc   : > { %v2214_v41 = vadd.f32 %v1904_v40, %v448_v34  ;;  %1613 = vmatmul.bf16.gmra.mxu0 %v3475_v32  ;;  %1773 = vmatmul.bf16.gmra.mxu2 %v3731_v36  ;;  %2406 = vst.msk [vmem:[#allocation2 + $0x228] sm:$0xff] %vm313_vm3, %v2277_v39  ;;  %v2734_v57 = vadd.f32 %v4478_v3, %v2602_v38  ;;  %v2863_v16 = vmax.f32 %v2735_v6, 0.0  ;;  %v2068_v34 = vpop.f32.mrf.mxu3 }
  0xdd   : > { %v2668_v13 = vmul.f32 %v4469_v2, %v2536_v8  ;;  %v2473_v14 = vld [vmem:[#allocation2 + $0x28] sm:$0xff]  ;;  %v3055_v36 = vpack.c.bf16 %v2927_v23, %v2927_v23  ;;  %v2992_v43 = vpack.c.bf16 %v2864_v30, %v2864_v30  ;;  %v4027_v23 = vld [vmem:[%s4270_s7 + $0xe4] sm:$0xf] }
  0xde   : > { %2343 = vst.msk [vmem:[#allocation2 + $0x30] sm:$0xff] %vm313_vm3, %v2214_v41  ;;  %v2862_v5 = vmax.f32 %v2734_v57, 0.0  ;;  %v2605_v19 = vmul.f32 %v4469_v2, %v2473_v14  ;;  %v515_v30 = vld [vmem:[#allocation2 + $0x248] sm:$0xff] }
  0xdf   : > { %v4726_v45 = vpop.f32.mrf.mxu1  ;;  %v1734_v48 = vpop.f32.mrf.mxu2  ;;  %v2800_v25 = vadd.f32 %v4478_v3, %v2668_v13  ;;  %3184 = vst.msk [vmem:[%s4500_s29 + $0x10c] sm:$0xf] %vm3116_vm4, %v3055_v36  ;;  %v3746_v36 = vld [vmem:[%s4270_s7 + $0x2d0] sm:$0xf] }
  0xe0   : > { %v2064_v53 = vadd.f32 %v2063_v29, %v1734_v48  ;;  %v2990_v15 = vpack.c.bf16 %v2862_v5, %v2862_v5  ;;  %v2991_v29 = vpack.c.bf16 %v2863_v16, %v2863_v16  ;;  %v2737_v31 = vadd.f32 %v4478_v3, %v2605_v19  ;;  %3121 = vst.msk [vmem:[%s4500_s29 + $0x10] sm:$0xf] %vm3116_vm4, %v2992_v43  ;;  %v3748_v5 = vld [vmem:[%s4270_s7 + $0x2d8] sm:$0xf0]  ;;  %v451_v16 = vld [vmem:[#allocation2 + $0x48] sm:$0xff] }
  0xe1   : > { %v1576_v60 = vpop.f32.mrf.mxu0  ;;  %v2928_v39 = vmax.f32 %v2800_v25, 0.0  ;;  %v3500_v25 = vld [vmem:[%s4270_s7 + $0xe8] sm:$0xf0] }
  0xe2   : > { %v2278_v4 = vadd.f32 %v2064_v53, %v512_v47  ;;  %3119 = vst.msk [vmem:[%s4500_s29 + $0x8] sm:$0xf] %vm3116_vm4, %v2990_v15  ;;  %v1906_v41 = vadd.f32 %v4684_v54, %v1576_v60  ;;  %v2865_v44 = vmax.f32 %v2737_v31, 0.0  ;;  %v513_v54 = vld [vmem:[#allocation2 + $0x238] sm:$0xff]  ;;  %v3495_v53 = vor.u32 %v4025_v17, %v3492_v37 }
  0xe3   : > { %v2537_v21 = vld [vmem:[#allocation2 + $0x228] sm:$0xff]  ;;  %3120 = vst.msk [vmem:[%s4500_s29 + $0xc] sm:$0xf] %vm3116_vm4, %v2991_v29  ;;  %v3056_v51 = vpack.c.bf16 %v2928_v39, %v2928_v39  ;;  %v3483_v60 = vor.u32 %v4024_v42, %v3482_v35  ;;  %v4026_v37 = vld [vmem:[%s4270_s7 + $0xd4] sm:$0xf0]  ;;  %v3503_v35 = vor.u32 %v4027_v23, %v3500_v25  ;;  %v452_v42 = vld [vmem:[#allocation2 + $0x50] sm:$0xff] }
  0xe4   : > { %2407 = vst.msk [vmem:[#allocation2 + $0x230] sm:$0xff] %vm313_vm3, %v2278_v4  ;;  %v2669_v26 = vmul.f32 %v4469_v2, %v2537_v21  ;;  %v2993_v57 = vpack.c.bf16 %v2865_v44, %v2865_v44  ;;  %v2215_v63 = vadd.f32 %v1906_v41, %v449_v46  ;;  %v4089_v4 = vld [vmem:[%s4270_s7 + $0x2d4] sm:$0xf]  ;;  %v2070_v11 = vpop.f32.mrf.mxu3  ;;  %v4090_v39 = vld [vmem:[%s4270_s7 + $0x2d4] sm:$0xf0] }
  0xe5   : > { %v2474_v27 = vld [vmem:[#allocation2 + $0x30] sm:$0xff]  ;;  %3185 = vst.msk [vmem:[%s4500_s29 + $0x110] sm:$0xf] %vm3116_vm4, %v3056_v51  ;;  %v3751_v15 = vor.u32 %v4089_v4, %v3748_v5  ;;  %v3747_v51 = vor.u32 %v4090_v39, %v3746_v36 }
  0xe6   : > { %v2606_v32 = vmul.f32 %v4469_v2, %v2474_v27  ;;  %v2801_v40 = vadd.f32 %v4478_v3, %v2669_v26  ;;  %3122 = vst.msk [vmem:[%s4500_s29 + $0x14] sm:$0xf] %vm3116_vm4, %v2993_v57  ;;  %v3490_v27 = vld [vmem:[%s4270_s7 + $0xd0] sm:$0xf]  ;;  %v4029_v23 = vld [vmem:[%s4270_s7 + $0xf4] sm:$0xf] }
  0xe7   : > { %v4751_v28 = vpop.f32.mrf.mxu1  ;;  %v1736_v33 = vpop.f32.mrf.mxu2  ;;  %2344 = vst.msk [vmem:[#allocation2 + $0x38] sm:$0xff] %vm313_vm3, %v2215_v63  ;;  %3977 = vmatmul.msk.bf16.gmra.mxu3 %vm1350_vm2, %v3751_v15  ;;  %v3491_v44 = vor.u32 %v4026_v37, %v3490_v27  ;;  %v3508_v27 = vld [vmem:[%s4270_s7 + $0xf8] sm:$0xf0] }
  0xe8   : > { %v2738_v38 = vadd.f32 %v4478_v3, %v2606_v32  ;;  %v2066_v47 = vadd.f32 %v2065_v49, %v1736_v33  ;;  %v2929_v52 = vmax.f32 %v2801_v40, 0.0  ;;  %v3511_v39 = vor.u32 %v4029_v23, %v3508_v27  ;;  %v519_v23 = vld [vmem:[#allocation2 + $0x268] sm:$0xff] }
  0xe9   : > { %v1579_v48 = vpop.f32.mrf.mxu0 }
  0xea   : > { %v1909_v55 = vadd.f32 %v4711_v24, %v1579_v48  ;;  %v2866_v58 = vmax.f32 %v2738_v38, 0.0  ;;  %v3057_v61 = vpack.c.bf16 %v2929_v52, %v2929_v52  ;;  %3945 = vmatmul.msk.bf16.gmra.mxu1 %vm1350_vm2, %v3495_v53  ;;  %v2279_v0 = vadd.f32 %v2066_v47, %v513_v54 }
  0xeb   : > { %v2538_v49 = vld [vmem:[#allocation2 + $0x230] sm:$0xff] }
  0xec   : > { %v2670_v62 = vmul.f32 %v4469_v2, %v2538_v49  ;;  %v2994_v24 = vpack.c.bf16 %v2866_v58, %v2866_v58  ;;  %1618 = vmatmul.bf16.gmra.mxu0 %v3483_v60  ;;  %3186 = vst.msk [vmem:[%s4500_s29 + $0x114] sm:$0xf] %vm3116_vm4, %v3057_v61  ;;  %v2216_v7 = vadd.f32 %v1909_v55, %v450_v59  ;;  %v2073_v31 = vpop.f32.mrf.mxu3  ;;  %v4091_v49 = vld [vmem:[%s4270_s7 + $0x2e4] sm:$0xf] }
  0xed   : > { %1778 = vmatmul.bf16.gmra.mxu2 %v3739_v1  ;;  %2408 = vst.msk [vmem:[#allocation2 + $0x238] sm:$0xff] %vm313_vm3, %v2279_v0  ;;  %v516_v0 = vld [vmem:[#allocation2 + $0x250] sm:$0xff] }
  0xee   : > { %v2802_v6 = vadd.f32 %v4478_v3, %v2670_v62  ;;  %3123 = vst.msk [vmem:[%s4500_s29 + $0x18] sm:$0xf] %vm3116_vm4, %v2994_v24  ;;  %v2475_v29 = vld [vmem:[#allocation2 + $0x38] sm:$0xff] }
  0xef   : > { %v4785_v8 = vpop.f32.mrf.mxu1  ;;  %v1739_v10 = vpop.f32.mrf.mxu2  ;;  %2345 = vst.msk [vmem:[#allocation2 + $0x40] sm:$0xff] %vm313_vm3, %v2216_v7  ;;  %v2607_v32 = vmul.f32 %v4469_v2, %v2475_v29 }
  0xf0   : > { %v2930_v13 = vmax.f32 %v2802_v6, 0.0  ;;  %v2069_v14 = vadd.f32 %v2068_v34, %v1739_v10 }
  0xf1   : > { %v1581_v18 = vpop.f32.mrf.mxu0  ;;  %v2739_v38 = vadd.f32 %v4478_v3, %v2607_v32 }
  0xf2   : > { %v3058_v19 = vpack.c.bf16 %v2930_v13, %v2930_v13  ;;  %v2280_v21 = vadd.f32 %v2069_v14, %v514_v9  ;;  %v1911_v17 = vadd.f32 %v4726_v45, %v1581_v18 }
  0xf3   : > { %v2867_v52 = vmax.f32 %v2739_v38, 0.0 }
  0xf4   : > { %3187 = vst.msk [vmem:[%s4500_s29 + $0x118] sm:$0xf] %vm3116_vm4, %v3058_v19  ;;  %v2217_v22 = vadd.f32 %v1911_v17, %v451_v16  ;;  %v2539_v33 = vld [vmem:[#allocation2 + $0x238] sm:$0xff]  ;;  %v2075_v4 = vpop.f32.mrf.mxu3 }
  0xf5   : > { %2409 = vst.msk [vmem:[#allocation2 + $0x240] sm:$0xff] %vm313_vm3, %v2280_v21  ;;  %v2671_v40 = vmul.f32 %v4469_v2, %v2539_v33  ;;  %v2995_v59 = vpack.c.bf16 %v2867_v52, %v2867_v52 }
  0xf6   : > { %2346 = vst.msk [vmem:[#allocation2 + $0x48] sm:$0xff] %vm313_vm3, %v2217_v22  ;;  %v2476_v41 = vld [vmem:[#allocation2 + $0x40] sm:$0xff] }
  0xf7   : > { %v4800_v26 = vpop.f32.mrf.mxu1  ;;  %v1741_v45 = vpop.f32.mrf.mxu2  ;;  %v2608_v46 = vmul.f32 %v4469_v2, %v2476_v41  ;;  %v2803_v50 = vadd.f32 %v4478_v3, %v2671_v40  ;;  %3124 = vst.msk [vmem:[%s4500_s29 + $0x1c] sm:$0xf] %vm3116_vm4, %v2995_v59  ;;  %v3754_v40 = vld [vmem:[%s4270_s7 + $0x2e0] sm:$0xf]  ;;  %v4092_v41 = vld [vmem:[%s4270_s7 + $0x2e4] sm:$0xf0] }
  0xf8   : > { %v2071_v34 = vadd.f32 %v2070_v11, %v1741_v45  ;;  %v453_v11 = vld [vmem:[#allocation2 + $0x58] sm:$0xff]  ;;  %v4028_v45 = vld [vmem:[%s4270_s7 + $0xe4] sm:$0xf0] }
  0xf9   : > { %v1584_v43 = vpop.f32.mrf.mxu0  ;;  %v2740_v54 = vadd.f32 %v4478_v3, %v2608_v46  ;;  %v2931_v56 = vmax.f32 %v2803_v50, 0.0 }
  0xfa   : > { %v2281_v47 = vadd.f32 %v2071_v34, %v515_v30  ;;  %v1914_v48 = vadd.f32 %v4751_v28, %v1584_v43  ;;  %3946 = vmatmul.msk.bf16.gmra.mxu1 %vm1350_vm2, %v3503_v35  ;;  %v3756_v28 = vld [vmem:[%s4270_s7 + $0x2e8] sm:$0xf0]  ;;  %v3498_v30 = vld [vmem:[%s4270_s7 + $0xe0] sm:$0xf] }
  0xfb   : > { %v2868_v60 = vmax.f32 %v2740_v54, 0.0  ;;  %v3059_v63 = vpack.c.bf16 %v2931_v56, %v2931_v56  ;;  %v3759_v9 = vor.u32 %v4091_v49, %v3756_v28  ;;  %v3764_v56 = vld [vmem:[%s4270_s7 + $0x2f8] sm:$0xf0]  ;;  %v518_v28 = vld [vmem:[#allocation2 + $0x260] sm:$0xff] }
  0xfc   : > { %v2540_v53 = vld [vmem:[#allocation2 + $0x240] sm:$0xff]  ;;  %2410 = vst.msk [vmem:[#allocation2 + $0x248] sm:$0xff] %vm313_vm3, %v2281_v47  ;;  %v2218_v55 = vadd.f32 %v1914_v48, %v452_v42  ;;  %1623 = vmatmul.bf16.gmra.mxu0 %v3491_v44  ;;  %v2078_v33 = vpop.f32.mrf.mxu3  ;;  %v3499_v44 = vor.u32 %v4028_v45, %v3498_v30  ;;  %v3762_v30 = vld [vmem:[%s4270_s7 + $0x2f0] sm:$0xf]  ;;  %v4094_v45 = vld [vmem:[%s4270_s7 + $0x2f4] sm:$0xf0] }
  0xfd   : > { %v2672_v57 = vmul.f32 %v4469_v2, %v2540_v53  ;;  %v2477_v58 = vld [vmem:[#allocation2 + $0x48] sm:$0xff]  ;;  %1783 = vmatmul.bf16.gmra.mxu2 %v3747_v51  ;;  %v2996_v5 = vpack.c.bf16 %v2868_v60, %v2868_v60  ;;  %3188 = vst.msk [vmem:[%s4500_s29 + $0x11c] sm:$0xf] %vm3116_vm4, %v3059_v63  ;;  %3978 = vmatmul.msk.bf16.gmra.mxu3 %vm1350_vm2, %v3759_v9  ;;  %v454_v42 = vld [vmem:[#allocation2 + $0x60] sm:$0xff] }
  0xfe   : > { %v2609_v61 = vmul.f32 %v4469_v2, %v2477_v58  ;;  %2347 = vst.msk [vmem:[#allocation2 + $0x50] sm:$0xff] %vm313_vm3, %v2218_v55  ;;  %v3755_v51 = vor.u32 %v4092_v41, %v3754_v40  ;;  %v4093_v55 = vld [vmem:[%s4270_s7 + $0x2f4] sm:$0xf] }
  0xff   : > { %v4820_v62 = vpop.f32.mrf.mxu1  ;;  %v2804_v24 = vadd.f32 %v4478_v3, %v2672_v57  ;;  %v1744_v1 = vpop.f32.mrf.mxu2  ;;  %3125 = vst.msk [vmem:[%s4500_s29 + $0x20] sm:$0xf] %vm3116_vm4, %v2996_v5 }
 0x100   : > { %v2741_v6 = vadd.f32 %v4478_v3, %v2609_v61  ;;  %v2074_v7 = vadd.f32 %v2073_v31, %v1744_v1  ;;  %v517_v31 = vld [vmem:[#allocation2 + $0x258] sm:$0xff]  ;;  %v455_v1 = vld [vmem:[#allocation2 + $0x68] sm:$0xff] }
 0x101   : > { %v2932_v10 = vmax.f32 %v2804_v24, 0.0  ;;  %v1586_v13 = vpop.f32.mrf.mxu0  ;;  %v3767_v24 = vor.u32 %v4093_v55, %v3764_v56 }
 0x102   : > { %v2869_v14 = vmax.f32 %v2741_v6, 0.0  ;;  %v2282_v15 = vadd.f32 %v2074_v7, %v516_v0  ;;  %v1916_v16 = vadd.f32 %v4785_v8, %v1586_v13 }
 0x103   : > { %v3060_v18 = vpack.c.bf16 %v2932_v10, %v2932_v10  ;;  %v2541_v19 = vld [vmem:[#allocation2 + $0x248] sm:$0xff] }
 0x104   : > { %v2997_v21 = vpack.c.bf16 %v2869_v14, %v2869_v14  ;;  %v2673_v17 = vmul.f32 %v4469_v2, %v2541_v19  ;;  %2411 = vst.msk [vmem:[#allocation2 + $0x250] sm:$0xff] %vm313_vm3, %v2282_v15  ;;  %v2219_v22 = vadd.f32 %v1916_v16, %v453_v11  ;;  %v2080_v60 = vpop.f32.mrf.mxu3  ;;  %v4031_v15 = vld [vmem:[%s4270_s7 + $0x104] sm:$0xf]  ;;  %v3516_v16 = vld [vmem:[%s4270_s7 + $0x108] sm:$0xf0] }
 0x105   : > { %3189 = vst.msk [vmem:[%s4500_s29 + $0x120] sm:$0xf] %vm3116_vm4, %v3060_v18  ;;  %v2478_v25 = vld [vmem:[#allocation2 + $0x50] sm:$0xff] }
 0x106   : > { %3126 = vst.msk [vmem:[%s4500_s29 + $0x24] sm:$0xf] %vm3116_vm4, %v2997_v21  ;;  %v2805_v8 = vadd.f32 %v4478_v3, %v2673_v17  ;;  %v2610_v37 = vmul.f32 %v4469_v2, %v2478_v25  ;;  %v3506_v19 = vld [vmem:[%s4270_s7 + $0xf0] sm:$0xf]  ;;  %v4030_v21 = vld [vmem:[%s4270_s7 + $0xf4] sm:$0xf0] }
 0x107   : > { %v4842_v29 = vpop.f32.mrf.mxu1  ;;  %2348 = vst.msk [vmem:[#allocation2 + $0x58] sm:$0xff] %vm313_vm3, %v2219_v22  ;;  %v1746_v32 = vpop.f32.mrf.mxu2 }
 0x108   : > { %v2933_v34 = vmax.f32 %v2805_v8, 0.0  ;;  %v2742_v35 = vadd.f32 %v4478_v3, %v2610_v37  ;;  %v2076_v36 = vadd.f32 %v2075_v4, %v1746_v32  ;;  %v3519_v37 = vor.u32 %v4031_v15, %v3516_v16  ;;  %v521_v15 = vld [vmem:[#allocation2 + $0x278] sm:$0xff] }
 0x109   : > { %v1589_v43 = vpop.f32.mrf.mxu0 }
 0x10a   : > { %v3061_v38 = vpack.c.bf16 %v2933_v34, %v2933_v34  ;;  %v2870_v46 = vmax.f32 %v2742_v35, 0.0  ;;  %v2283_v47 = vadd.f32 %v2076_v36, %v517_v31  ;;  %v1919_v48 = vadd.f32 %v4800_v26, %v1589_v43  ;;  %3947 = vmatmul.msk.bf16.gmra.mxu1 %vm1350_vm2, %v3511_v39 }
 0x10b   : > { %v2542_v50 = vld [vmem:[#allocation2 + $0x250] sm:$0xff]  ;;  %v3507_v35 = vor.u32 %v4030_v21, %v3506_v19 }
 0x10c   : > { %3190 = vst.msk [vmem:[%s4500_s29 + $0x124] sm:$0xf] %vm3116_vm4, %v3061_v38  ;;  %v2998_v52 = vpack.c.bf16 %v2870_v46, %v2870_v46  ;;  %v2674_v54 = vmul.f32 %v4469_v2, %v2542_v50  ;;  %v2220_v53 = vadd.f32 %v1919_v48, %v454_v42  ;;  %1628 = vmatmul.bf16.gmra.mxu0 %v3499_v44  ;;  %v2083_v27 = vpop.f32.mrf.mxu3  ;;  %v4095_v38 = vld [vmem:[%s4270_s7 + $0x304] sm:$0xf]  ;;  %v3772_v50 = vld [vmem:[%s4270_s7 + $0x308] sm:$0xf0] }
 0x10d   : > { %2412 = vst.msk [vmem:[#allocation2 + $0x258] sm:$0xff] %vm313_vm3, %v2283_v47  ;;  %1788 = vmatmul.bf16.gmra.mxu2 %v3755_v51  ;;  %3979 = vmatmul.msk.bf16.gmra.mxu3 %vm1350_vm2, %v3767_v24  ;;  %v3763_v42 = vor.u32 %v4094_v45, %v3762_v30 }
 0x10e   : > { %3127 = vst.msk [vmem:[%s4500_s29 + $0x28] sm:$0xf] %vm3116_vm4, %v2998_v52  ;;  %v2806_v57 = vadd.f32 %v4478_v3, %v2674_v54  ;;  %v2479_v26 = vld [vmem:[#allocation2 + $0x58] sm:$0xff]  ;;  %v520_v54 = vld [vmem:[#allocation2 + $0x270] sm:$0xff] }
 0x10f   : > { %v4861_v58 = vpop.f32.mrf.mxu1  ;;  %v2611_v49 = vmul.f32 %v4469_v2, %v2479_v26  ;;  %2349 = vst.msk [vmem:[#allocation2 + $0x60] sm:$0xff] %vm313_vm3, %v2220_v53  ;;  %v1749_v59 = vpop.f32.mrf.mxu2  ;;  %v3775_v26 = vor.u32 %v4095_v38, %v3772_v50  ;;  %v522_v38 = vld [vmem:[#allocation2 + $0x280] sm:$0xff] }
 0x110   : > { %v2934_v61 = vmax.f32 %v2806_v57, 0.0  ;;  %v2079_v63 = vadd.f32 %v2078_v33, %v1749_v59  ;;  %v456_v33 = vld [vmem:[#allocation2 + $0x70] sm:$0xff] }
 0x111   : > { %v2743_v0 = vadd.f32 %v4478_v3, %v2611_v49  ;;  %v1591_v4 = vpop.f32.mrf.mxu0 }
 0x112   : > { %v3062_v5 = vpack.c.bf16 %v2934_v61, %v2934_v61  ;;  %v2284_v6 = vadd.f32 %v2079_v63, %v518_v28  ;;  %v1921_v7 = vadd.f32 %v4820_v62, %v1591_v4 }
 0x113   : > { %v2871_v9 = vmax.f32 %v2743_v0, 0.0 }
 0x114   : > { %3191 = vst.msk [vmem:[%s4500_s29 + $0x128] sm:$0xf] %vm3116_vm4, %v3062_v5  ;;  %v2543_v10 = vld [vmem:[#allocation2 + $0x258] sm:$0xff]  ;;  %v2221_v11 = vadd.f32 %v1921_v7, %v455_v1  ;;  %v2085_v55 = vpop.f32.mrf.mxu3  ;;  %v4033_v5 = vld [vmem:[%s4270_s7 + $0x114] sm:$0xf] }
 0x115   : > { %v2999_v13 = vpack.c.bf16 %v2871_v9, %v2871_v9  ;;  %v2675_v14 = vmul.f32 %v4469_v2, %v2543_v10  ;;  %2413 = vst.msk [vmem:[#allocation2 + $0x260] sm:$0xff] %vm313_vm3, %v2284_v6  ;;  %v3524_v6 = vld [vmem:[%s4270_s7 + $0x118] sm:$0xf0]  ;;  %v4920_v7 = vld [vmem:[%s5714_s3] ss:$0 sm:$0xff] }
 0x116   : > { %v2480_v18 = vld [vmem:[#allocation2 + $0x60] sm:$0xff]  ;;  %2350 = vst.msk [vmem:[#allocation2 + $0x68] sm:$0xff] %vm313_vm3, %v2221_v11 }
 0x117   : > { %v4875_v62 = vpop.f32.mrf.mxu1  ;;  %3128 = vst.msk [vmem:[%s4500_s29 + $0x2c] sm:$0xf] %vm3116_vm4, %v2999_v13  ;;  %v2807_v17 = vadd.f32 %v4478_v3, %v2675_v14  ;;  %v2612_v22 = vmul.f32 %v4469_v2, %v2480_v18  ;;  %v1751_v25 = vpop.f32.mrf.mxu2  ;;  %v3514_v13 = vld [vmem:[%s4270_s7 + $0x100] sm:$0xf]  ;;  %v4032_v14 = vld [vmem:[%s4270_s7 + $0x104] sm:$0xf0] }
 0x118   : > { %v2081_v8 = vadd.f32 %v2080_v60, %v1751_v25  ;;  %v4096_v25 = vld [vmem:[%s4270_s7 + $0x304] sm:$0xf0] }
 0x119   : > { %v2935_v31 = vmax.f32 %v2807_v17, 0.0  ;;  %v2744_v32 = vadd.f32 %v4478_v3, %v2612_v22  ;;  %v1594_v34 = vpop.f32.mrf.mxu0  ;;  %v3527_v22 = vor.u32 %v4033_v5, %v3524_v6  ;;  %v523_v5 = vld [vmem:[#allocation2 + $0x288] sm:$0xff] }
 0x11a   : > { %v2285_v36 = vadd.f32 %v2081_v8, %v519_v23  ;;  %v1924_v39 = vadd.f32 %v4842_v29, %v1594_v34  ;;  %3948 = vmatmul.msk.bf16.gmra.mxu1 %vm1350_vm2, %v3519_v37  ;;  %v3770_v23 = vld [vmem:[%s4270_s7 + $0x300] sm:$0xf]  ;;  %v3515_v37 = vor.u32 %v4032_v14, %v3514_v13  ;;  %v3778_v13 = vld [vmem:[%s4270_s7 + $0x310] sm:$0xf]  ;;  %v4098_v14 = vld [vmem:[%s4270_s7 + $0x314] sm:$0xf0] }
 0x11b   : > { %v3063_v40 = vpack.c.bf16 %v2935_v31, %v2935_v31  ;;  %v2872_v41 = vmax.f32 %v2744_v32, 0.0  ;;  %v3771_v34 = vor.u32 %v4096_v25, %v3770_v23 }
 0x11c   : > { %v2544_v43 = vld [vmem:[#allocation2 + $0x260] sm:$0xff]  ;;  %2414 = vst.msk [vmem:[#allocation2 + $0x268] sm:$0xff] %vm313_vm3, %v2285_v36  ;;  %v2222_v44 = vadd.f32 %v1924_v39, %v456_v33  ;;  %1633 = vmatmul.bf16.gmra.mxu0 %v3507_v35  ;;  %v2088_v18 = vpop.f32.mrf.mxu3 }
 0x11d   : > { %3192 = vst.msk [vmem:[%s4500_s29 + $0x12c] sm:$0xf] %vm3116_vm4, %v3063_v40  ;;  %v3000_v46 = vpack.c.bf16 %v2872_v41, %v2872_v41  ;;  %v2676_v47 = vmul.f32 %v4469_v2, %v2544_v43  ;;  %v2481_v48 = vld [vmem:[#allocation2 + $0x68] sm:$0xff]  ;;  %1793 = vmatmul.bf16.gmra.mxu2 %v3763_v42  ;;  %3980 = vmatmul.msk.bf16.gmra.mxu3 %vm1350_vm2, %v3775_v26  ;;  %v4097_v40 = vld [vmem:[%s4270_s7 + $0x314] sm:$0xf] }
 0x11e   : > { %v2613_v29 = vmul.f32 %v4469_v2, %v2481_v48  ;;  %2351 = vst.msk [vmem:[#allocation2 + $0x70] sm:$0xff] %vm313_vm3, %v2222_v44  ;;  %v457_v2 = vld [vmem:[#allocation2 + $0x78] sm:$0xff] }
 0x11f   : > { %v4896_v51 = vpop.f32.mrf.mxu1  ;;  %3129 = vst.msk [vmem:[%s4500_s29 + $0x30] sm:$0xf] %vm3116_vm4, %v3000_v46  ;;  %v2808_v52 = vadd.f32 %v4478_v3, %v2676_v47  ;;  %v1754_v53 = vpop.f32.mrf.mxu2  ;;  %v3780_v41 = vld [vmem:[%s4270_s7 + $0x318] sm:$0xf0] }
 0x120   : > { %v2745_v56 = vadd.f32 %v4478_v3, %v2613_v29  ;;  %v2084_v57 = vadd.f32 %v2083_v27, %v1754_v53  ;;  %v4906_v3 = vld [vmem:[%s5713_s2] ss:$0 sm:$0xff]  ;;  %v3783_v29 = vor.u32 %v4097_v40, %v3780_v41  ;;  %v524_v40 = vld [vmem:[#allocation2 + $0x290] sm:$0xff] }
 0x121   : > { %v2936_v49 = vmax.f32 %v2808_v52, 0.0  ;;  %v1596_v28 = vpop.f32.mrf.mxu0  ;;  %v458_v27 = vld [vmem:[#allocation2 + $0x80] sm:$0xff] }
 0x122   : > { %v2873_v59 = vmax.f32 %v2745_v56, 0.0  ;;  %v2286_v60 = vadd.f32 %v2084_v57, %v520_v54  ;;  %v1926_v61 = vadd.f32 %v4861_v58, %v1596_v28  ;;  %v459_v54 = vld [vmem:[#allocation2 + $0x88] sm:$0xff] }
 0x123   : > { %v3064_v63 = vpack.c.bf16 %v2936_v49, %v2936_v49  ;;  %v2545_v24 = vld [vmem:[#allocation2 + $0x268] sm:$0xff] }
 0x124   : > { %v3001_v0 = vpack.c.bf16 %v2873_v59, %v2873_v59  ;;  %v2677_v1 = vmul.f32 %v4906_v3, %v2545_v24  ;;  %2415 = vst.msk [vmem:[#allocation2 + $0x270] sm:$0xff] %vm313_vm3, %v2286_v60  ;;  %v2223_v4 = vadd.f32 %v1926_v61, %v457_v2  ;;  %v2090_v47 = vpop.f32.mrf.mxu3  ;;  %v4035_v60 = vld [vmem:[%s4270_s7 + $0x124] sm:$0xf]  ;;  %v3532_v61 = vld [vmem:[%s4270_s7 + $0x128] sm:$0xf0] }
 0x125   : > { %3193 = vst.msk [vmem:[%s4500_s29 + $0x130] sm:$0xf] %vm3116_vm4, %v3064_v63  ;;  %v2482_v58 = vld [vmem:[#allocation2 + $0x70] sm:$0xff] }
 0x126   : > { %3130 = vst.msk [vmem:[%s4500_s29 + $0x34] sm:$0xf] %vm3116_vm4, %v3001_v0  ;;  %v2809_v9 = vadd.f32 %v4920_v7, %v2677_v1  ;;  %v2614_v10 = vmul.f32 %v4906_v3, %v2482_v58  ;;  %v3522_v24 = vld [vmem:[%s4270_s7 + $0x110] sm:$0xf]  ;;  %v4034_v0 = vld [vmem:[%s4270_s7 + $0x114] sm:$0xf0] }
 0x127   : > { %v4924_v11 = vpop.f32.mrf.mxu1  ;;  %2352 = vst.msk [vmem:[#allocation2 + $0x78] sm:$0xff] %vm313_vm3, %v2223_v4  ;;  %v1756_v16 = vpop.f32.mrf.mxu2 }
 0x128   : > { %v2937_v19 = vmax.f32 %v2809_v9, 0.0  ;;  %v2746_v21 = vadd.f32 %v4920_v7, %v2614_v10  ;;  %v2086_v17 = vadd.f32 %v2085_v55, %v1756_v16  ;;  %v3535_v10 = vor.u32 %v4035_v60, %v3532_v61  ;;  %v525_v60 = vld [vmem:[#allocation2 + $0x298] sm:$0xff] }
 0x129   : > { %v1599_v8 = vpop.f32.mrf.mxu0 }
 0x12a   : > { %v3065_v30 = vpack.c.bf16 %v2937_v19, %v2937_v19  ;;  %v2874_v45 = vmax.f32 %v2746_v21, 0.0  ;;  %v2287_v31 = vadd.f32 %v2086_v17, %v521_v15  ;;  %v1929_v32 = vadd.f32 %v4875_v62, %v1599_v8  ;;  %3949 = vmatmul.msk.bf16.gmra.mxu1 %vm1350_vm2, %v3527_v22 }
 0x12b   : > { %v2546_v33 = vld [vmem:[#allocation2 + $0x270] sm:$0xff]  ;;  %v3523_v21 = vor.u32 %v4034_v0, %v3522_v24 }
 0x12c   : > { %3194 = vst.msk [vmem:[%s4500_s29 + $0x134] sm:$0xf] %vm3116_vm4, %v3065_v30  ;;  %v3002_v35 = vpack.c.bf16 %v2874_v45, %v2874_v45  ;;  %v2678_v36 = vmul.f32 %v4906_v3, %v2546_v33  ;;  %v2224_v39 = vadd.f32 %v1929_v32, %v458_v27  ;;  %1638 = vmatmul.bf16.gmra.mxu0 %v3515_v37  ;;  %v2093_v6 = vpop.f32.mrf.mxu3  ;;  %v4099_v30 = vld [vmem:[%s4270_s7 + $0x324] sm:$0xf]  ;;  %v3788_v33 = vld [vmem:[%s4270_s7 + $0x328] sm:$0xf0] }
 0x12d   : > { %2416 = vst.msk [vmem:[#allocation2 + $0x278] sm:$0xff] %vm313_vm3, %v2287_v31  ;;  %1798 = vmatmul.bf16.gmra.mxu2 %v3771_v34  ;;  %3981 = vmatmul.msk.bf16.gmra.mxu3 %vm1350_vm2, %v3783_v29  ;;  %v3779_v27 = vor.u32 %v4098_v14, %v3778_v13 }
 0x12e   : > { %3131 = vst.msk [vmem:[%s4500_s29 + $0x38] sm:$0xf] %vm3116_vm4, %v3002_v35  ;;  %v2810_v42 = vadd.f32 %v4920_v7, %v2678_v36  ;;  %v2483_v62 = vld [vmem:[#allocation2 + $0x78] sm:$0xff] }
 0x12f   : > { %v4943_v43 = vpop.f32.mrf.mxu1  ;;  %v2615_v44 = vmul.f32 %v4906_v3, %v2483_v62  ;;  %2353 = vst.msk [vmem:[#allocation2 + $0x80] sm:$0xff] %vm313_vm3, %v2224_v39  ;;  %v1759_v46 = vpop.f32.mrf.mxu2 }
 0x130   : > { %v2938_v48 = vmax.f32 %v2810_v42, 0.0  ;;  %v2089_v50 = vadd.f32 %v2088_v18, %v1759_v46  ;;  %v460_v18 = vld [vmem:[#allocation2 + $0x90] sm:$0xff]  ;;  %v3791_v42 = vor.u32 %v4099_v30, %v3788_v33  ;;  %v526_v30 = vld [vmem:[#allocation2 + $0x2a0] sm:$0xff] }
 0x131   : > { %v2747_v52 = vadd.f32 %v4920_v7, %v2615_v44  ;;  %v1601_v53 = vpop.f32.mrf.mxu0 }
 0x132   : > { %v3066_v55 = vpack.c.bf16 %v2938_v48, %v2938_v48  ;;  %v2288_v56 = vadd.f32 %v2089_v50, %v522_v38  ;;  %v1931_v57 = vadd.f32 %v4896_v51, %v1601_v53  ;;  %v461_v38 = vld [vmem:[#allocation2 + $0x98] sm:$0xff] }
 0x133   : > { %v2875_v26 = vmax.f32 %v2747_v52, 0.0 }
 0x134   : > { %3195 = vst.msk [vmem:[%s4500_s29 + $0x138] sm:$0xf] %vm3116_vm4, %v3066_v55  ;;  %v2547_v49 = vld [vmem:[#allocation2 + $0x278] sm:$0xff]  ;;  %v2225_v2 = vadd.f32 %v1931_v57, %v459_v54  ;;  %v2095_v36 = vpop.f32.mrf.mxu3 }
 0x135   : > { %v3003_v28 = vpack.c.bf16 %v2875_v26, %v2875_v26  ;;  %v2679_v59 = vmul.f32 %v4906_v3, %v2547_v49  ;;  %2417 = vst.msk [vmem:[#allocation2 + $0x280] sm:$0xff] %vm313_vm3, %v2288_v56  ;;  %v4037_v56 = vld [vmem:[%s4270_s7 + $0x134] sm:$0xf]  ;;  %v3540_v26 = vld [vmem:[%s4270_s7 + $0x138] sm:$0xf0] }
 0x136   : > { %v2484_v63 = vld [vmem:[#allocation2 + $0x80] sm:$0xff]  ;;  %2354 = vst.msk [vmem:[#allocation2 + $0x88] sm:$0xff] %vm313_vm3, %v2225_v2 }
 0x137   : > { %v4957_v51 = vpop.f32.mrf.mxu1  ;;  %3132 = vst.msk [vmem:[%s4500_s29 + $0x3c] sm:$0xf] %vm3116_vm4, %v3003_v28  ;;  %v2811_v1 = vadd.f32 %v4920_v7, %v2679_v59  ;;  %v2616_v4 = vmul.f32 %v4906_v3, %v2484_v63  ;;  %v1761_v58 = vpop.f32.mrf.mxu2  ;;  %v3530_v28 = vld [vmem:[%s4270_s7 + $0x120] sm:$0xf]  ;;  %v4036_v59 = vld [vmem:[%s4270_s7 + $0x124] sm:$0xf0] }
 0x138   : > { %v2091_v9 = vadd.f32 %v2090_v47, %v1761_v58 }
 0x139   : > { %v2939_v15 = vmax.f32 %v2811_v1, 0.0  ;;  %v2748_v16 = vadd.f32 %v4920_v7, %v2616_v4  ;;  %v1604_v19 = vpop.f32.mrf.mxu0  ;;  %v3543_v1 = vor.u32 %v4037_v56, %v3540_v26  ;;  %v3786_v4 = vld [vmem:[%s4270_s7 + $0x320] sm:$0xf]  ;;  %v527_v56 = vld [vmem:[#allocation2 + $0x2a8] sm:$0xff] }
 0x13a   : > { %v2289_v17 = vadd.f32 %v2091_v9, %v523_v5  ;;  %v1934_v22 = vadd.f32 %v4924_v11, %v1604_v19  ;;  %3950 = vmatmul.msk.bf16.gmra.mxu1 %vm1350_vm2, %v3535_v10  ;;  %v4100_v5 = vld [vmem:[%s4270_s7 + $0x324] sm:$0xf0]  ;;  %v3531_v10 = vor.u32 %v4036_v59, %v3530_v28  ;;  %v4102_v28 = vld [vmem:[%s4270_s7 + $0x334] sm:$0xf0] }
 0x13b   : > { %v3067_v23 = vpack.c.bf16 %v2939_v15, %v2939_v15  ;;  %v2876_v25 = vmax.f32 %v2748_v16, 0.0 }
 0x13c   : > { %v2548_v8 = vld [vmem:[#allocation2 + $0x280] sm:$0xff]  ;;  %2418 = vst.msk [vmem:[#allocation2 + $0x288] sm:$0xff] %vm313_vm3, %v2289_v17  ;;  %v2226_v37 = vadd.f32 %v1934_v22, %v460_v18  ;;  %1643 = vmatmul.bf16.gmra.mxu0 %v3523_v21  ;;  %v2098_v61 = vpop.f32.mrf.mxu3  ;;  %v3787_v18 = vor.u32 %v4100_v5, %v3786_v4  ;;  %v4101_v17 = vld [vmem:[%s4270_s7 + $0x334] sm:$0xf]  ;;  %v3796_v22 = vld [vmem:[%s4270_s7 + $0x338] sm:$0xf0] }
 0x13d   : > { %3196 = vst.msk [vmem:[%s4500_s29 + $0x13c] sm:$0xf] %vm3116_vm4, %v3067_v23  ;;  %v3004_v45 = vpack.c.bf16 %v2876_v25, %v2876_v25  ;;  %v2680_v31 = vmul.f32 %v4906_v3, %v2548_v8  ;;  %v2485_v32 = vld [vmem:[#allocation2 + $0x88] sm:$0xff]  ;;  %1803 = vmatmul.bf16.gmra.mxu2 %v3779_v27  ;;  %3982 = vmatmul.msk.bf16.gmra.mxu3 %vm1350_vm2, %v3791_v42 }
 0x13e   : > { %v2617_v11 = vmul.f32 %v4906_v3, %v2485_v32  ;;  %2355 = vst.msk [vmem:[#allocation2 + $0x90] sm:$0xff] %vm313_vm3, %v2226_v37 }
 0x13f   : > { %v4978_v34 = vpop.f32.mrf.mxu1  ;;  %3133 = vst.msk [vmem:[%s4500_s29 + $0x40] sm:$0xf] %vm3116_vm4, %v3004_v45  ;;  %v2812_v35 = vadd.f32 %v4920_v7, %v2680_v31  ;;  %v1764_v41 = vpop.f32.mrf.mxu2  ;;  %v3799_v31 = vor.u32 %v4101_v17, %v3796_v22 }
 0x140   : > { %v2749_v39 = vadd.f32 %v4920_v7, %v2617_v11  ;;  %v2094_v44 = vadd.f32 %v2093_v6, %v1764_v41  ;;  %v462_v6 = vld [vmem:[#allocation2 + $0xa0] sm:$0xff]  ;;  %v463_v11 = vld [vmem:[#allocation2 + $0xa8] sm:$0xff] }
 0x141   : > { %v2940_v62 = vmax.f32 %v2812_v35, 0.0  ;;  %v1606_v46 = vpop.f32.mrf.mxu0 }
 0x142   : > { %v2877_v47 = vmax.f32 %v2749_v39, 0.0  ;;  %v1936_v48 = vadd.f32 %v4943_v43, %v1606_v46  ;;  %v2290_v52 = vadd.f32 %v2094_v44, %v524_v40 }
 0x143   : > { %v3068_v50 = vpack.c.bf16 %v2940_v62, %v2940_v62  ;;  %v2549_v29 = vld [vmem:[#allocation2 + $0x288] sm:$0xff] }
 0x144   : > { %v3005_v54 = vpack.c.bf16 %v2877_v47, %v2877_v47  ;;  %v2681_v53 = vmul.f32 %v4906_v3, %v2549_v29  ;;  %v2227_v55 = vadd.f32 %v1936_v48, %v461_v38  ;;  %2419 = vst.msk [vmem:[#allocation2 + $0x290] sm:$0xff] %vm313_vm3, %v2290_v52  ;;  %v2100_v8 = vpop.f32.mrf.mxu3  ;;  %v4039_v47 = vld [vmem:[%s4270_s7 + $0x144] sm:$0xf]  ;;  %v3548_v48 = vld [vmem:[%s4270_s7 + $0x148] sm:$0xf0] }
 0x145   : > { %3197 = vst.msk [vmem:[%s4500_s29 + $0x140] sm:$0xf] %vm3116_vm4, %v3068_v50  ;;  %v2486_v57 = vld [vmem:[#allocation2 + $0x90] sm:$0xff] }
 0x146   : > { %3134 = vst.msk [vmem:[%s4500_s29 + $0x44] sm:$0xf] %vm3116_vm4, %v3005_v54  ;;  %v2813_v43 = vadd.f32 %v4920_v7, %v2681_v53  ;;  %v2618_v49 = vmul.f32 %v4906_v3, %v2486_v57  ;;  %v3538_v52 = vld [vmem:[%s4270_s7 + $0x130] sm:$0xf]  ;;  %v4038_v54 = vld [vmem:[%s4270_s7 + $0x134] sm:$0xf0] }
 0x147   : > { %v4995_v2 = vpop.f32.mrf.mxu1  ;;  %2356 = vst.msk [vmem:[#allocation2 + $0x98] sm:$0xff] %vm313_vm3, %v2227_v55  ;;  %v1766_v0 = vpop.f32.mrf.mxu2 }
 0x148   : > { %v2941_v63 = vmax.f32 %v2813_v43, 0.0  ;;  %v2750_v24 = vadd.f32 %v4920_v7, %v2618_v49  ;;  %v2096_v58 = vadd.f32 %v2095_v36, %v1766_v0  ;;  %v3551_v43 = vor.u32 %v4039_v47, %v3548_v48  ;;  %v3794_v49 = vld [vmem:[%s4270_s7 + $0x330] sm:$0xf]  ;;  %v529_v48 = vld [vmem:[#allocation2 + $0x2b8] sm:$0xff] }
 0x149   : > { %v1609_v9 = vpop.f32.mrf.mxu0  ;;  %v3539_v0 = vor.u32 %v4038_v54, %v3538_v52  ;;  %v3802_v52 = vld [vmem:[%s4270_s7 + $0x340] sm:$0xf]  ;;  %v4104_v54 = vld [vmem:[%s4270_s7 + $0x344] sm:$0xf0] }
 0x14a   : > { %v3069_v13 = vpack.c.bf16 %v2941_v63, %v2941_v63  ;;  %v2878_v14 = vmax.f32 %v2750_v24, 0.0  ;;  %v1939_v15 = vadd.f32 %v4957_v51, %v1609_v9  ;;  %v2291_v16 = vadd.f32 %v2096_v58, %v525_v60  ;;  %3951 = vmatmul.msk.bf16.gmra.mxu1 %vm1350_vm2, %v3543_v1  ;;  %v464_v63 = vld [vmem:[#allocation2 + $0xb0] sm:$0xff] }
 0x14b   : > { %v2550_v23 = vld [vmem:[#allocation2 + $0x290] sm:$0xff] }
 0x14c   : > { %3198 = vst.msk [vmem:[%s4500_s29 + $0x144] sm:$0xf] %vm3116_vm4, %v3069_v13  ;;  %v3006_v19 = vpack.c.bf16 %v2878_v14, %v2878_v14  ;;  %v2228_v21 = vadd.f32 %v1939_v15, %v462_v6  ;;  %1648 = vmatmul.bf16.gmra.mxu0 %v3531_v10  ;;  %v2682_v51 = vmul.f32 %v4906_v3, %v2550_v23  ;;  %v2103_v57 = vpop.f32.mrf.mxu3  ;;  %v4103_v13 = vld [vmem:[%s4270_s7 + $0x344] sm:$0xf]  ;;  %v528_v23 = vld [vmem:[#allocation2 + $0x2b0] sm:$0xff] }
 0x14d   : > { %2420 = vst.msk [vmem:[#allocation2 + $0x298] sm:$0xff] %vm313_vm3, %v2291_v16  ;;  %1808 = vmatmul.bf16.gmra.mxu2 %v3787_v18  ;;  %3983 = vmatmul.msk.bf16.gmra.mxu3 %vm1350_vm2, %v3799_v31  ;;  %v3795_v6 = vor.u32 %v4102_v28, %v3794_v49  ;;  %v3804_v18 = vld [vmem:[%s4270_s7 + $0x348] sm:$0xf0] }
 0x14e   : > { %3135 = vst.msk [vmem:[%s4500_s29 + $0x48] sm:$0xf] %vm3116_vm4, %v3006_v19  ;;  %v2487_v27 = vld [vmem:[#allocation2 + $0x98] sm:$0xff]  ;;  %v2814_v32 = vadd.f32 %v4920_v7, %v2682_v51 }
 0x14f   : > { %v5013_v25 = vpop.f32.mrf.mxu1  ;;  %2357 = vst.msk [vmem:[#allocation2 + $0xa0] sm:$0xff] %vm313_vm3, %v2228_v21  ;;  %v2619_v37 = vmul.f32 %v4906_v3, %v2487_v27  ;;  %v1769_v45 = vpop.f32.mrf.mxu2  ;;  %v3807_v27 = vor.u32 %v4103_v13, %v3804_v18 }
 0x150   : > { %v2099_v33 = vadd.f32 %v2098_v61, %v1769_v45  ;;  %v2942_v40 = vmax.f32 %v2814_v32, 0.0 }
 0x151   : > { %v1611_v35 = vpop.f32.mrf.mxu0  ;;  %v2751_v36 = vadd.f32 %v4920_v7, %v2619_v37 }
 0x152   : > { %v1941_v39 = vadd.f32 %v4978_v34, %v1611_v35  ;;  %v2292_v41 = vadd.f32 %v2099_v33, %v526_v30  ;;  %v3070_v38 = vpack.c.bf16 %v2942_v40, %v2942_v40  ;;  %v465_v30 = vld [vmem:[#allocation2 + $0xb8] sm:$0xff] }
 0x153   : > { %v2879_v42 = vmax.f32 %v2751_v36, 0.0 }
 0x154   : > { %v2551_v62 = vld [vmem:[#allocation2 + $0x298] sm:$0xff]  ;;  %v2229_v44 = vadd.f32 %v1941_v39, %v463_v11  ;;  %2421 = vst.msk [vmem:[#allocation2 + $0x2a0] sm:$0xff] %vm313_vm3, %v2292_v41  ;;  %v2105_v17 = vpop.f32.mrf.mxu3  ;;  %v4041_v39 = vld [vmem:[%s4270_s7 + $0x154] sm:$0xf] }
 0x155   : > { %v2683_v46 = vmul.f32 %v4906_v3, %v2551_v62  ;;  %v3007_v34 = vpack.c.bf16 %v2879_v42, %v2879_v42  ;;  %3199 = vst.msk [vmem:[%s4500_s29 + $0x148] sm:$0xf] %vm3116_vm4, %v3070_v38  ;;  %v3556_v41 = vld [vmem:[%s4270_s7 + $0x158] sm:$0xf0]  ;;  %v3546_v62 = vld [vmem:[%s4270_s7 + $0x140] sm:$0xf] }
 0x156   : > { %v2488_v50 = vld [vmem:[#allocation2 + $0xa0] sm:$0xff]  ;;  %2358 = vst.msk [vmem:[#allocation2 + $0xa8] sm:$0xff] %vm313_vm3, %v2229_v44  ;;  %v4040_v44 = vld [vmem:[%s4270_s7 + $0x144] sm:$0xf0] }
 0x157   : > { %v5027_v29 = vpop.f32.mrf.mxu1  ;;  %v2815_v53 = vadd.f32 %v4920_v7, %v2683_v46  ;;  %v2620_v55 = vmul.f32 %v4906_v3, %v2488_v50  ;;  %3136 = vst.msk [vmem:[%s4500_s29 + $0x4c] sm:$0xf] %vm3116_vm4, %v3007_v34  ;;  %v1771_v26 = vpop.f32.mrf.mxu2  ;;  %v3559_v50 = vor.u32 %v4041_v39, %v3556_v41  ;;  %v3810_v41 = vld [vmem:[%s4270_s7 + $0x350] sm:$0xf] }
 0x158   : > { %v2101_v61 = vadd.f32 %v2100_v8, %v1771_v26 }
 0x159   : > { %v2943_v59 = vmax.f32 %v2815_v53, 0.0  ;;  %v2752_v60 = vadd.f32 %v4920_v7, %v2620_v55  ;;  %v1614_v24 = vpop.f32.mrf.mxu0 }
 0x15a   : > { %v1944_v1 = vadd.f32 %v4995_v2, %v1614_v24  ;;  %v2293_v58 = vadd.f32 %v2101_v61, %v527_v56  ;;  %3952 = vmatmul.msk.bf16.gmra.mxu1 %vm1350_vm2, %v3551_v43  ;;  %v3547_v56 = vor.u32 %v4040_v44, %v3546_v62  ;;  %v466_v43 = vld [vmem:[#allocation2 + $0xc0] sm:$0xff] }
 0x15b   : > { %v3071_v4 = vpack.c.bf16 %v2943_v59, %v2943_v59  ;;  %v2880_v5 = vmax.f32 %v2752_v60, 0.0  ;;  %v2552_v9 = vld [vmem:[#allocation2 + $0x2a0] sm:$0xff]  ;;  %v3803_v60 = vor.u32 %v4104_v54, %v3802_v52 }
 0x15c   : > { %v2230_v10 = vadd.f32 %v1944_v1, %v464_v63  ;;  %v2684_v15 = vmul.f32 %v4906_v3, %v2552_v9  ;;  %1653 = vmatmul.bf16.gmra.mxu0 %v3539_v0  ;;  %2422 = vst.msk [vmem:[#allocation2 + $0x2a8] sm:$0xff] %vm313_vm3, %v2293_v58  ;;  %v2108_v38 = vpop.f32.mrf.mxu3  ;;  %v4105_v0 = vld [vmem:[%s4270_s7 + $0x354] sm:$0xf]  ;;  %v3812_v1 = vld [vmem:[%s4270_s7 + $0x358] sm:$0xf0] }
 0x15d   : > { %3200 = vst.msk [vmem:[%s4500_s29 + $0x14c] sm:$0xf] %vm3116_vm4, %v3071_v4  ;;  %v3008_v14 = vpack.c.bf16 %v2880_v5, %v2880_v5  ;;  %v2489_v16 = vld [vmem:[#allocation2 + $0xa8] sm:$0xff]  ;;  %1813 = vmatmul.bf16.gmra.mxu2 %v3795_v6  ;;  %3984 = vmatmul.msk.bf16.gmra.mxu3 %vm1350_vm2, %v3807_v27 }
 0x15e   : > { %v2621_v2 = vmul.f32 %v4906_v3, %v2489_v16  ;;  %v2816_v19 = vadd.f32 %v4920_v7, %v2684_v15  ;;  %2359 = vst.msk [vmem:[#allocation2 + $0xb0] sm:$0xff] %vm313_vm3, %v2230_v10  ;;  %v3815_v10 = vor.u32 %v4105_v0, %v3812_v1  ;;  %v530_v16 = vld [vmem:[#allocation2 + $0x2c0] sm:$0xff] }
 0x15f   : > { %3137 = vst.msk [vmem:[%s4500_s29 + $0x50] sm:$0xf] %vm3116_vm4, %v3008_v14  ;;  %v5052_v21 = vpop.f32.mrf.mxu1  ;;  %v1774_v51 = vpop.f32.mrf.mxu2 }
 0x160   : > { %v2753_v22 = vadd.f32 %v4920_v7, %v2621_v2  ;;  %v2944_v8 = vmax.f32 %v2816_v19, 0.0  ;;  %v2104_v37 = vadd.f32 %v2103_v57, %v1774_v51 }
 0x161   : > { %v1616_v45 = vpop.f32.mrf.mxu0 }
 0x162   : > { %v2881_v31 = vmax.f32 %v2753_v22, 0.0  ;;  %v1946_v32 = vadd.f32 %v5013_v25, %v1616_v45  ;;  %v3072_v33 = vpack.c.bf16 %v2944_v8, %v2944_v8  ;;  %v2294_v11 = vadd.f32 %v2104_v37, %v528_v23  ;;  %v467_v22 = vld [vmem:[#allocation2 + $0xc8] sm:$0xff]  ;;  %v4043_v45 = vld [vmem:[%s4270_s7 + $0x164] sm:$0xf] }
 0x163   : > { %v2553_v40 = vld [vmem:[#allocation2 + $0x2a8] sm:$0xff] }
 0x164   : > { %v3009_v35 = vpack.c.bf16 %v2881_v31, %v2881_v31  ;;  %v2231_v36 = vadd.f32 %v1946_v32, %v465_v30  ;;  %3201 = vst.msk [vmem:[%s4500_s29 + $0x150] sm:$0xf] %vm3116_vm4, %v3072_v33  ;;  %v2685_v42 = vmul.f32 %v4906_v3, %v2553_v40  ;;  %v3564_v31 = vld [vmem:[%s4270_s7 + $0x168] sm:$0xf0] }
 0x165   : > { %v2490_v25 = vld [vmem:[#allocation2 + $0xb0] sm:$0xff]  ;;  %2423 = vst.msk [vmem:[#allocation2 + $0x2b0] sm:$0xff] %vm313_vm3, %v2294_v11  ;;  %v3567_v62 = vor.u32 %v4043_v45, %v3564_v31  ;;  %v3818_v31 = vld [vmem:[%s4270_s7 + $0x360] sm:$0xf] }
 0x166   : > { %3138 = vst.msk [vmem:[%s4500_s29 + $0x54] sm:$0xf] %vm3116_vm4, %v3009_v35  ;;  %v2817_v46 = vadd.f32 %v4920_v7, %v2685_v42  ;;  %v2622_v47 = vmul.f32 %v4906_v3, %v2490_v25  ;;  %v3554_v35 = vld [vmem:[%s4270_s7 + $0x150] sm:$0xf]  ;;  %v4106_v42 = vld [vmem:[%s4270_s7 + $0x354] sm:$0xf0] }
 0x167   : > { %2360 = vst.msk [vmem:[#allocation2 + $0xb8] sm:$0xff] %vm313_vm3, %v2231_v36  ;;  %v1776_v34 = vpop.f32.mrf.mxu2  ;;  %v5073_v53 = vpop.f32.mrf.mxu1  ;;  %v4042_v36 = vld [vmem:[%s4270_s7 + $0x154] sm:$0xf0]  ;;  %v3811_v52 = vor.u32 %v4106_v42, %v3810_v41 }
 0x168   : > { %v2106_v55 = vadd.f32 %v2105_v17, %v1776_v34  ;;  %v2945_v57 = vmax.f32 %v2817_v46, 0.0  ;;  %v2754_v26 = vadd.f32 %v4920_v7, %v2622_v47  ;;  %v3555_v46 = vor.u32 %v4042_v36, %v3554_v35  ;;  %v531_v47 = vld [vmem:[#allocation2 + $0x2c8] sm:$0xff]  ;;  %v468_v34 = vld [vmem:[#allocation2 + $0xd0] sm:$0xff] }
 0x169   : > { %v1619_v49 = vpop.f32.mrf.mxu0 }
 0x16a   : > { %v2295_v28 = vadd.f32 %v2106_v55, %v529_v48  ;;  %v1949_v59 = vadd.f32 %v5027_v29, %v1619_v49  ;;  %v3073_v61 = vpack.c.bf16 %v2945_v57, %v2945_v57  ;;  %v2882_v63 = vmax.f32 %v2754_v26, 0.0  ;;  %3953 = vmatmul.msk.bf16.gmra.mxu1 %vm1350_vm2, %v3559_v50  ;;  %v2110_v29 = vpop.f32.mrf.mxu3 }
 0x16c   : > { %2424 = vst.msk [vmem:[#allocation2 + $0x2b8] sm:$0xff] %vm313_vm3, %v2295_v28  ;;  %v2232_v24 = vadd.f32 %v1949_v59, %v466_v43  ;;  %1658 = vmatmul.bf16.gmra.mxu0 %v3547_v56  ;;  %v3010_v4 = vpack.c.bf16 %v2882_v63, %v2882_v63  ;;  %v2554_v5 = vld [vmem:[#allocation2 + $0x2b0] sm:$0xff]  ;;  %v4107_v28 = vld [vmem:[%s4270_s7 + $0x364] sm:$0xf]  ;;  %v3820_v59 = vld [vmem:[%s4270_s7 + $0x368] sm:$0xf0] }
 0x16d   : > { %3202 = vst.msk [vmem:[%s4500_s29 + $0x154] sm:$0xf] %vm3116_vm4, %v3073_v61  ;;  %v2686_v58 = vmul.f32 %v4906_v3, %v2554_v5  ;;  %1818 = vmatmul.bf16.gmra.mxu2 %v3803_v60  ;;  %3985 = vmatmul.msk.bf16.gmra.mxu3 %vm1350_vm2, %v3815_v10  ;;  %v3823_v63 = vor.u32 %v4107_v28, %v3820_v59 }
 0x16e   : > { %v2491_v6 = vld [vmem:[#allocation2 + $0xb8] sm:$0xff]  ;;  %2361 = vst.msk [vmem:[#allocation2 + $0xc0] sm:$0xff] %vm313_vm3, %v2232_v24 }
 0x16f   : > { %3139 = vst.msk [vmem:[%s4500_s29 + $0x58] sm:$0xf] %vm3116_vm4, %v3010_v4  ;;  %v2623_v9 = vmul.f32 %v4906_v3, %v2491_v6  ;;  %v2818_v13 = vadd.f32 %v4920_v7, %v2686_v58  ;;  %v5089_v14 = vpop.f32.mrf.mxu1  ;;  %v532_v4 = vld [vmem:[#allocation2 + $0x2d0] sm:$0xff]  ;;  %v469_v58 = vld [vmem:[#allocation2 + $0xd8] sm:$0xff] }
 0x170   : > { %v1779_v18 = vpop.f32.mrf.mxu2 }
 0x171   : > { %v2755_v15 = vadd.f32 %v4920_v7, %v2623_v9  ;;  %v1621_v2 = vpop.f32.mrf.mxu0  ;;  %v2946_v19 = vmax.f32 %v2818_v13, 0.0  ;;  %v2109_v17 = vadd.f32 %v2108_v38, %v1779_v18 }
 0x172   : > { %v1951_v23 = vadd.f32 %v5052_v21, %v1621_v2  ;;  %v2113_v40 = vpop.f32.mrf.mxu3  ;;  %v4045_v2 = vld [vmem:[%s4270_s7 + $0x174] sm:$0xf] }
 0x173   : > { %v2883_v51 = vmax.f32 %v2755_v15, 0.0  ;;  %v2555_v27 = vld [vmem:[#allocation2 + $0x2b8] sm:$0xff]  ;;  %v3074_v8 = vpack.c.bf16 %v2946_v19, %v2946_v19  ;;  %v2296_v30 = vadd.f32 %v2109_v17, %v530_v16 }
 0x174   : > { %v2687_v37 = vmul.f32 %v4906_v3, %v2555_v27  ;;  %v2233_v11 = vadd.f32 %v1951_v23, %v467_v22  ;;  %v3572_v19 = vld [vmem:[%s4270_s7 + $0x178] sm:$0xf0]  ;;  %v3562_v22 = vld [vmem:[%s4270_s7 + $0x160] sm:$0xf]  ;;  %v4044_v23 = vld [vmem:[%s4270_s7 + $0x164] sm:$0xf0] }
 0x175   : > { %v3011_v32 = vpack.c.bf16 %v2883_v51, %v2883_v51  ;;  %v2492_v33 = vld [vmem:[#allocation2 + $0xc0] sm:$0xff]  ;;  %3203 = vst.msk [vmem:[%s4500_s29 + $0x158] sm:$0xf] %vm3116_vm4, %v3074_v8  ;;  %v3575_v45 = vor.u32 %v4045_v2, %v3572_v19  ;;  %v3563_v35 = vor.u32 %v4044_v23, %v3562_v22  ;;  %v4046_v2 = vld [vmem:[%s4270_s7 + $0x174] sm:$0xf0] }
 0x176   : > { %v2819_v21 = vadd.f32 %v4920_v7, %v2687_v37  ;;  %v2624_v39 = vmul.f32 %v4906_v3, %v2492_v33  ;;  %2425 = vst.msk [vmem:[#allocation2 + $0x2c0] sm:$0xff] %vm313_vm3, %v2296_v30  ;;  %v3826_v22 = vld [vmem:[%s4270_s7 + $0x370] sm:$0xf]  ;;  %v4110_v23 = vld [vmem:[%s4270_s7 + $0x374] sm:$0xf0] }
 0x177   : > { %3140 = vst.msk [vmem:[%s4500_s29 + $0x5c] sm:$0xf] %vm3116_vm4, %v3011_v32  ;;  %v5109_v38 = vpop.f32.mrf.mxu1  ;;  %v4108_v32 = vld [vmem:[%s4270_s7 + $0x364] sm:$0xf0] }
 0x178   : > { %v2947_v44 = vmax.f32 %v2819_v21, 0.0  ;;  %v2756_v25 = vadd.f32 %v4920_v7, %v2624_v39  ;;  %2362 = vst.msk [vmem:[#allocation2 + $0xc8] sm:$0xff] %vm313_vm3, %v2233_v11  ;;  %v1781_v48 = vpop.f32.mrf.mxu2  ;;  %v533_v21 = vld [vmem:[#allocation2 + $0x2d8] sm:$0xff] }
 0x179   : > { %v1624_v50 = vpop.f32.mrf.mxu0  ;;  %v2111_v56 = vadd.f32 %v2110_v29, %v1781_v48 }
 0x17a   : > { %v3075_v54 = vpack.c.bf16 %v2947_v44, %v2947_v44  ;;  %v2884_v55 = vmax.f32 %v2756_v25, 0.0  ;;  %v1954_v57 = vadd.f32 %v5073_v53, %v1624_v50  ;;  %3954 = vmatmul.msk.bf16.gmra.mxu1 %vm1350_vm2, %v3567_v62  ;;  %v2115_v60 = vpop.f32.mrf.mxu3  ;;  %v470_v62 = vld [vmem:[#allocation2 + $0xe0] sm:$0xff]  ;;  %v3819_v25 = vor.u32 %v4108_v32, %v3818_v31  ;;  %v3828_v50 = vld [vmem:[%s4270_s7 + $0x378] sm:$0xf0]  ;;  %v472_v31 = vld [vmem:[#allocation2 + $0xf0] sm:$0xff] }
 0x17b   : > { %v2297_v43 = vadd.f32 %v2111_v56, %v531_v47 }
 0x17c   : > { %3204 = vst.msk [vmem:[%s4500_s29 + $0x15c] sm:$0xf] %vm3116_vm4, %v3075_v54  ;;  %v3012_v26 = vpack.c.bf16 %v2884_v55, %v2884_v55  ;;  %v2234_v49 = vadd.f32 %v1954_v57, %v468_v34  ;;  %1663 = vmatmul.bf16.gmra.mxu0 %v3555_v46  ;;  %v4109_v34 = vld [vmem:[%s4270_s7 + $0x374] sm:$0xf] }
 0x17d   : > { %1823 = vmatmul.bf16.gmra.mxu2 %v3811_v52  ;;  %v2556_v61 = vld [vmem:[#allocation2 + $0x2c0] sm:$0xff]  ;;  %2426 = vst.msk [vmem:[#allocation2 + $0x2c8] sm:$0xff] %vm313_vm3, %v2297_v43  ;;  %3986 = vmatmul.msk.bf16.gmra.mxu3 %vm1350_vm2, %v3823_v63 }
 0x17e   : > { %3141 = vst.msk [vmem:[%s4500_s29 + $0x60] sm:$0xf] %vm3116_vm4, %v3012_v26  ;;  %v2688_v53 = vmul.f32 %v4906_v3, %v2556_v61  ;;  %v534_v61 = vld [vmem:[#allocation2 + $0x2e0] sm:$0xff] }
 0x17f   : > { %v2493_v24 = vld [vmem:[#allocation2 + $0xc8] sm:$0xff]  ;;  %2363 = vst.msk [vmem:[#allocation2 + $0xd0] sm:$0xff] %vm313_vm3, %v2234_v49  ;;  %v5123_v0 = vpop.f32.mrf.mxu1  ;;  %v3831_v49 = vor.u32 %v4109_v34, %v3828_v50 }
 0x180   : > { %v2625_v1 = vmul.f32 %v4906_v3, %v2493_v24  ;;  %v1784_v5 = vpop.f32.mrf.mxu2  ;;  %v2820_v29 = vadd.f32 %v4920_v7, %v2688_v53 }
 0x181   : > { %v1626_v6 = vpop.f32.mrf.mxu0  ;;  %v2114_v9 = vadd.f32 %v2113_v40, %v1784_v5 }
 0x182   : > { %v1956_v10 = vadd.f32 %v5089_v14, %v1626_v6  ;;  %v2757_v13 = vadd.f32 %v4920_v7, %v2625_v1  ;;  %v2948_v15 = vmax.f32 %v2820_v29, 0.0  ;;  %v2118_v14 = vpop.f32.mrf.mxu3 }
 0x183   : > { %v2298_v16 = vadd.f32 %v2114_v9, %v532_v4  ;;  %v471_v4 = vld [vmem:[#allocation2 + $0xe8] sm:$0xff]  ;;  %v4047_v9 = vld [vmem:[%s4270_s7 + $0x184] sm:$0xf] }
 0x184   : > { %v2235_v18 = vadd.f32 %v1956_v10, %v469_v58  ;;  %v2885_v17 = vmax.f32 %v2757_v13, 0.0  ;;  %v3076_v51 = vpack.c.bf16 %v2948_v15, %v2948_v15  ;;  %v2557_v27 = vld [vmem:[#allocation2 + $0x2c8] sm:$0xff] }
 0x185   : > { %2427 = vst.msk [vmem:[#allocation2 + $0x2d0] sm:$0xff] %vm313_vm3, %v2298_v16  ;;  %v2689_v37 = vmul.f32 %v4906_v3, %v2557_v27  ;;  %v3580_v10 = vld [vmem:[%s4270_s7 + $0x188] sm:$0xf0] }
 0x186   : > { %v3013_v8 = vpack.c.bf16 %v2885_v17, %v2885_v17  ;;  %v2494_v30 = vld [vmem:[#allocation2 + $0xd0] sm:$0xff]  ;;  %2364 = vst.msk [vmem:[#allocation2 + $0xd8] sm:$0xff] %vm313_vm3, %v2235_v18 }
 0x187   : > { %3205 = vst.msk [vmem:[%s4500_s29 + $0x160] sm:$0xf] %vm3116_vm4, %v3076_v51  ;;  %v2626_v33 = vmul.f32 %v4906_v3, %v2494_v30  ;;  %v5142_v11 = vpop.f32.mrf.mxu1  ;;  %v2821_v36 = vadd.f32 %v4920_v7, %v2689_v37  ;;  %v3570_v18 = vld [vmem:[%s4270_s7 + $0x170] sm:$0xf]  ;;  %v535_v30 = vld [vmem:[#allocation2 + $0x2e8] sm:$0xff] }
 0x188   : > { %3142 = vst.msk [vmem:[%s4500_s29 + $0x64] sm:$0xf] %vm3116_vm4, %v3013_v8  ;;  %v1786_v39 = vpop.f32.mrf.mxu2  ;;  %v3571_v8 = vor.u32 %v4046_v2, %v3570_v18 }
 0x189   : > { %v1629_v40 = vpop.f32.mrf.mxu0  ;;  %v2758_v41 = vadd.f32 %v4920_v7, %v2626_v33  ;;  %v2116_v42 = vadd.f32 %v2115_v60, %v1786_v39  ;;  %v2949_v46 = vmax.f32 %v2821_v36, 0.0 }
 0x18a   : > { %v1959_v44 = vadd.f32 %v5109_v38, %v1629_v40  ;;  %3955 = vmatmul.msk.bf16.gmra.mxu1 %vm1350_vm2, %v3575_v45  ;;  %v2120_v38 = vpop.f32.mrf.mxu3 }
 0x18b   : > { %v2886_v47 = vmax.f32 %v2758_v41, 0.0  ;;  %v2299_v48 = vadd.f32 %v2116_v42, %v533_v21  ;;  %v3077_v52 = vpack.c.bf16 %v2949_v46, %v2949_v46  ;;  %v3827_v21 = vor.u32 %v4110_v23, %v3826_v22 }
 0x18c   : > { %1668 = vmatmul.bf16.gmra.mxu0 %v3563_v35  ;;  %v2558_v54 = vld [vmem:[#allocation2 + $0x2d0] sm:$0xff]  ;;  %v2236_v55 = vadd.f32 %v1959_v44, %v470_v62  ;;  %v4111_v62 = vld [vmem:[%s4270_s7 + $0x384] sm:$0xf]  ;;  %v3836_v44 = vld [vmem:[%s4270_s7 + $0x388] sm:$0xf0] }
 0x18d   : > { %v3014_v56 = vpack.c.bf16 %v2886_v47, %v2886_v47  ;;  %v2690_v57 = vmul.f32 %v4906_v3, %v2558_v54  ;;  %v2495_v26 = vld [vmem:[#allocation2 + $0xd8] sm:$0xff]  ;;  %2428 = vst.msk [vmem:[#allocation2 + $0x2d8] sm:$0xff] %vm313_vm3, %v2299_v48  ;;  %1828 = vmatmul.bf16.gmra.mxu2 %v3819_v25  ;;  %3987 = vmatmul.msk.bf16.gmra.mxu3 %vm1350_vm2, %v3831_v49 }
 0x18e   : > { %3206 = vst.msk [vmem:[%s4500_s29 + $0x164] sm:$0xf] %vm3116_vm4, %v3077_v52  ;;  %v2627_v43 = vmul.f32 %v4906_v3, %v2495_v26 }
 0x18f   : > { %3143 = vst.msk [vmem:[%s4500_s29 + $0x68] sm:$0xf] %vm3116_vm4, %v3014_v56  ;;  %v2822_v28 = vadd.f32 %v4920_v7, %v2690_v57  ;;  %v5160_v59 = vpop.f32.mrf.mxu1  ;;  %v473_v57 = vld [vmem:[#allocation2 + $0xf8] sm:$0xff] }
 0x190   : > { %v2759_v60 = vadd.f32 %v4920_v7, %v2627_v43  ;;  %2365 = vst.msk [vmem:[#allocation2 + $0xe0] sm:$0xff] %vm313_vm3, %v2236_v55  ;;  %v1789_v63 = vpop.f32.mrf.mxu2  ;;  %v536_v55 = vld [vmem:[#allocation2 + $0x2f0] sm:$0xff] }
 0x191   : > { %v1631_v53 = vpop.f32.mrf.mxu0  ;;  %v2950_v24 = vmax.f32 %v2822_v28, 0.0  ;;  %v2119_v1 = vadd.f32 %v2118_v14, %v1789_v63 }
 0x192   : > { %v1961_v5 = vadd.f32 %v5123_v0, %v1631_v53  ;;  %v2887_v58 = vmax.f32 %v2759_v60, 0.0  ;;  %v2123_v17 = vpop.f32.mrf.mxu3  ;;  %v3583_v0 = vor.u32 %v4047_v9, %v3580_v10  ;;  %v3588_v53 = vld [vmem:[%s4270_s7 + $0x198] sm:$0xf0] }
 0x193   : > { %v3078_v6 = vpack.c.bf16 %v2950_v24, %v2950_v24  ;;  %v2300_v29 = vadd.f32 %v2119_v1, %v534_v61  ;;  %v3578_v1 = vld [vmem:[%s4270_s7 + $0x180] sm:$0xf] }
 0x194   : > { %v3015_v13 = vpack.c.bf16 %v2887_v58, %v2887_v58  ;;  %v2559_v15 = vld [vmem:[#allocation2 + $0x2d8] sm:$0xff]  ;;  %v2237_v16 = vadd.f32 %v1961_v5, %v471_v4  ;;  %v4048_v4 = vld [vmem:[%s4270_s7 + $0x184] sm:$0xf0] }
 0x195   : > { %3207 = vst.msk [vmem:[%s4500_s29 + $0x168] sm:$0xf] %vm3116_vm4, %v3078_v6  ;;  %v2691_v19 = vmul.f32 %v4906_v3, %v2559_v15  ;;  %v5210_v6 = vld [vmem:[%s5713_s2] ss:$0 sm:$0xff]  ;;  %v4112_v15 = vld [vmem:[%s4270_s7 + $0x384] sm:$0xf0]  ;;  %v3579_v2 = vor.u32 %v4048_v4, %v3578_v1 }
 0x196   : > { %3144 = vst.msk [vmem:[%s4500_s29 + $0x6c] sm:$0xf] %vm3116_vm4, %v3015_v13  ;;  %v3834_v13 = vld [vmem:[%s4270_s7 + $0x380] sm:$0xf]  ;;  %v3842_v1 = vld [vmem:[%s4270_s7 + $0x390] sm:$0xf] }
 0x197   : > { %v2823_v51 = vadd.f32 %v4920_v7, %v2691_v19  ;;  %v2496_v27 = vld [vmem:[#allocation2 + $0xe0] sm:$0xff]  ;;  %2429 = vst.msk [vmem:[#allocation2 + $0x2e0] sm:$0xff] %vm313_vm3, %v2300_v29  ;;  %v5179_v14 = vpop.f32.mrf.mxu1  ;;  %v4114_v4 = vld [vmem:[%s4270_s7 + $0x394] sm:$0xf0] }
 0x198   : > { %v2628_v37 = vmul.f32 %v4906_v3, %v2496_v27  ;;  %2366 = vst.msk [vmem:[#allocation2 + $0xe8] sm:$0xff] %vm313_vm3, %v2237_v16  ;;  %v1791_v45 = vpop.f32.mrf.mxu2  ;;  %v5226_v19 = vld [vmem:[%s5714_s3] ss:$0 sm:$0xff] }
 0x199   : > { %v1634_v32 = vpop.f32.mrf.mxu0  ;;  %v2951_v33 = vmax.f32 %v2823_v51, 0.0  ;;  %v2121_v35 = vadd.f32 %v2120_v38, %v1791_v45 }
 0x19a   : > { %v1964_v36 = vadd.f32 %v5142_v11, %v1634_v32  ;;  %v2760_v39 = vadd.f32 %v4920_v7, %v2628_v37  ;;  %3956 = vmatmul.msk.bf16.gmra.mxu1 %vm1350_vm2, %v3583_v0  ;;  %v2125_v46 = vpop.f32.mrf.mxu3  ;;  %v3839_v11 = vor.u32 %v4111_v62, %v3836_v44  ;;  %v537_v0 = vld [vmem:[#allocation2 + $0x2f8] sm:$0xff] }
 0x19b   : > { %v3079_v40 = vpack.c.bf16 %v2951_v33, %v2951_v33  ;;  %v2301_v41 = vadd.f32 %v2121_v35, %v535_v30  ;;  %v3835_v30 = vor.u32 %v4112_v15, %v3834_v13  ;;  %v4113_v33 = vld [vmem:[%s4270_s7 + $0x394] sm:$0xf]  ;;  %v3844_v35 = vld [vmem:[%s4270_s7 + $0x398] sm:$0xf0] }
 0x19c   : > { %v2238_v42 = vadd.f32 %v1964_v36, %v472_v31  ;;  %1673 = vmatmul.bf16.gmra.mxu0 %v3571_v8  ;;  %v2888_v25 = vmax.f32 %v2760_v39, 0.0  ;;  %v474_v8 = vld [vmem:[#allocation2 + $0x100] sm:$0xff]  ;;  %v3847_v44 = vor.u32 %v4113_v33, %v3844_v35  ;;  %v476_v13 = vld [vmem:[#allocation2 + $0x110] sm:$0xff] }
 0x19d   : > { %3208 = vst.msk [vmem:[%s4500_s29 + $0x16c] sm:$0xf] %vm3116_vm4, %v3079_v40  ;;  %1833 = vmatmul.bf16.gmra.mxu2 %v3827_v21  ;;  %3988 = vmatmul.msk.bf16.gmra.mxu3 %vm1350_vm2, %v3839_v11 }
 0x19e   : > { %v3016_v47 = vpack.c.bf16 %v2888_v25, %v2888_v25  ;;  %v2560_v48 = vld [vmem:[#allocation2 + $0x2e0] sm:$0xff]  ;;  %2430 = vst.msk [vmem:[#allocation2 + $0x2e8] sm:$0xff] %vm313_vm3, %v2301_v41 }
 0x19f   : > { %v2692_v34 = vmul.f32 %v4906_v3, %v2560_v48  ;;  %v2497_v50 = vld [vmem:[#allocation2 + $0xe8] sm:$0xff]  ;;  %2367 = vst.msk [vmem:[#allocation2 + $0xf0] sm:$0xff] %vm313_vm3, %v2238_v42  ;;  %v5193_v52 = vpop.f32.mrf.mxu1  ;;  %v538_v48 = vld [vmem:[#allocation2 + $0x300] sm:$0xff] }
 0x1a0   : > { %3145 = vst.msk [vmem:[%s4500_s29 + $0x70] sm:$0xf] %vm3116_vm4, %v3016_v47  ;;  %v2629_v54 = vmul.f32 %v4906_v3, %v2497_v50  ;;  %v1794_v56 = vpop.f32.mrf.mxu2  ;;  %v4049_v3 = vld [vmem:[%s4270_s7 + $0x194] sm:$0xf] }
 0x1a1   : > { %v1636_v26 = vpop.f32.mrf.mxu0  ;;  %v2824_v38 = vadd.f32 %v4920_v7, %v2692_v34  ;;  %v2124_v43 = vadd.f32 %v2123_v17, %v1794_v56  ;;  %v3591_v10 = vor.u32 %v4049_v3, %v3588_v53  ;;  %v4050_v3 = vld [vmem:[%s4270_s7 + $0x194] sm:$0xf0] }
 0x1a2   : > { %v1966_v49 = vadd.f32 %v5160_v59, %v1636_v26  ;;  %v2761_v28 = vadd.f32 %v4920_v7, %v2629_v54  ;;  %v2128_v59 = vpop.f32.mrf.mxu3 }
 0x1a3   : > { %v2952_v60 = vmax.f32 %v2824_v38, 0.0  ;;  %v2302_v61 = vadd.f32 %v2124_v43, %v536_v55  ;;  %v475_v55 = vld [vmem:[#allocation2 + $0x108] sm:$0xff]  ;;  %v4051_v43 = vld [vmem:[%s4270_s7 + $0x1a4] sm:$0xf] }
 0x1a4   : > { %v2239_v63 = vadd.f32 %v1966_v49, %v473_v57  ;;  %v2889_v24 = vmax.f32 %v2761_v28, 0.0  ;;  %v3596_v49 = vld [vmem:[%s4270_s7 + $0x1a8] sm:$0xf0] }
 0x1a5   : > { %v3080_v5 = vpack.c.bf16 %v2952_v60, %v2952_v60  ;;  %v2561_v58 = vld [vmem:[#allocation2 + $0x2e8] sm:$0xff]  ;;  %2431 = vst.msk [vmem:[#allocation2 + $0x2f0] sm:$0xff] %vm313_vm3, %v2302_v61 }
 0x1a6   : > { %v3017_v7 = vpack.c.bf16 %v2889_v24, %v2889_v24  ;;  %v2693_v29 = vmul.f32 %v5210_v6, %v2561_v58  ;;  %v2498_v9 = vld [vmem:[#allocation2 + $0xf0] sm:$0xff]  ;;  %2368 = vst.msk [vmem:[#allocation2 + $0xf8] sm:$0xff] %vm313_vm3, %v2239_v63 }
 0x1a7   : > { %3209 = vst.msk [vmem:[%s4500_s29 + $0x170] sm:$0xf] %vm3116_vm4, %v3080_v5  ;;  %v2630_v16 = vmul.f32 %v5210_v6, %v2498_v9  ;;  %v5219_v18 = vpop.f32.mrf.mxu1  ;;  %v3586_v63 = vld [vmem:[%s4270_s7 + $0x190] sm:$0xf]  ;;  %v539_v9 = vld [vmem:[#allocation2 + $0x308] sm:$0xff] }
 0x1a8   : > { %3146 = vst.msk [vmem:[%s4500_s29 + $0x74] sm:$0xf] %vm3116_vm4, %v3017_v7  ;;  %v2825_v17 = vadd.f32 %v5226_v19, %v2693_v29  ;;  %v1796_v22 = vpop.f32.mrf.mxu2  ;;  %v3587_v7 = vor.u32 %v4050_v3, %v3586_v63 }
 0x1a9   : > { %v1639_v23 = vpop.f32.mrf.mxu0  ;;  %v2762_v51 = vadd.f32 %v5226_v19, %v2630_v16  ;;  %v2126_v27 = vadd.f32 %v2125_v46, %v1796_v22 }
 0x1aa   : > { %v1969_v37 = vadd.f32 %v5179_v14, %v1639_v23  ;;  %v2953_v45 = vmax.f32 %v2825_v17, 0.0  ;;  %3957 = vmatmul.msk.bf16.gmra.mxu1 %vm1350_vm2, %v3591_v10  ;;  %v2130_v14 = vpop.f32.mrf.mxu3 }
 0x1ab   : > { %v2890_v31 = vmax.f32 %v2762_v51, 0.0  ;;  %v2303_v32 = vadd.f32 %v2126_v27, %v537_v0  ;;  %v3843_v0 = vor.u32 %v4114_v4, %v3842_v1 }
 0x1ac   : > { %1678 = vmatmul.bf16.gmra.mxu0 %v3579_v2  ;;  %v3081_v36 = vpack.c.bf16 %v2953_v45, %v2953_v45  ;;  %v2562_v21 = vld [vmem:[#allocation2 + $0x2f0] sm:$0xff]  ;;  %v2240_v39 = vadd.f32 %v1969_v37, %v474_v8  ;;  %v4115_v8 = vld [vmem:[%s4270_s7 + $0x3a4] sm:$0xf]  ;;  %v3852_v37 = vld [vmem:[%s4270_s7 + $0x3a8] sm:$0xf0] }
 0x1ad   : > { %v3018_v40 = vpack.c.bf16 %v2890_v31, %v2890_v31  ;;  %v2694_v41 = vmul.f32 %v5210_v6, %v2562_v21  ;;  %v2499_v42 = vld [vmem:[#allocation2 + $0xf8] sm:$0xff]  ;;  %2432 = vst.msk [vmem:[#allocation2 + $0x2f8] sm:$0xff] %vm313_vm3, %v2303_v32  ;;  %1838 = vmatmul.bf16.gmra.mxu2 %v3835_v30  ;;  %3989 = vmatmul.msk.bf16.gmra.mxu3 %vm1350_vm2, %v3847_v44 }
 0x1ae   : > { %3210 = vst.msk [vmem:[%s4500_s29 + $0x174] sm:$0xf] %vm3116_vm4, %v3081_v36  ;;  %v2631_v62 = vmul.f32 %v5210_v6, %v2499_v42 }
 0x1af   : > { %3147 = vst.msk [vmem:[%s4500_s29 + $0x78] sm:$0xf] %vm3116_vm4, %v3018_v40  ;;  %v2826_v25 = vadd.f32 %v5226_v19, %v2694_v41  ;;  %v5242_v46 = vpop.f32.mrf.mxu1  ;;  %v477_v41 = vld [vmem:[#allocation2 + $0x118] sm:$0xff] }
 0x1b0   : > { %v2763_v47 = vadd.f32 %v5226_v19, %v2631_v62  ;;  %2369 = vst.msk [vmem:[#allocation2 + $0x100] sm:$0xff] %vm313_vm3, %v2240_v39  ;;  %v1799_v11 = vpop.f32.mrf.mxu2  ;;  %v540_v39 = vld [vmem:[#allocation2 + $0x310] sm:$0xff] }
 0x1b1   : > { %v1641_v34 = vpop.f32.mrf.mxu0  ;;  %v2954_v50 = vmax.f32 %v2826_v25, 0.0  ;;  %v2129_v54 = vadd.f32 %v2128_v59, %v1799_v11 }
 0x1b2   : > { %v1971_v56 = vadd.f32 %v5193_v52, %v1641_v34  ;;  %v2891_v57 = vmax.f32 %v2763_v47, 0.0  ;;  %v2133_v24 = vpop.f32.mrf.mxu3  ;;  %v3599_v52 = vor.u32 %v4051_v43, %v3596_v49  ;;  %v4053_v34 = vld [vmem:[%s4270_s7 + $0x1b4] sm:$0xf] }
 0x1b3   : > { %v3082_v26 = vpack.c.bf16 %v2954_v50, %v2954_v50  ;;  %v2304_v38 = vadd.f32 %v2129_v54, %v538_v48  ;;  %v3604_v50 = vld [vmem:[%s4270_s7 + $0x1b8] sm:$0xf0] }
 0x1b4   : > { %v3019_v28 = vpack.c.bf16 %v2891_v57, %v2891_v57  ;;  %v2563_v60 = vld [vmem:[#allocation2 + $0x2f8] sm:$0xff]  ;;  %v2241_v61 = vadd.f32 %v1971_v56, %v475_v55  ;;  %v3594_v55 = vld [vmem:[%s4270_s7 + $0x1a0] sm:$0xf]  ;;  %v4052_v56 = vld [vmem:[%s4270_s7 + $0x1a4] sm:$0xf0] }
 0x1b5   : > { %3211 = vst.msk [vmem:[%s4500_s29 + $0x178] sm:$0xf] %vm3116_vm4, %v3082_v26  ;;  %v2695_v53 = vmul.f32 %v5210_v6, %v2563_v60  ;;  %v3850_v60 = vld [vmem:[%s4270_s7 + $0x3a0] sm:$0xf] }
 0x1b6   : > { %3148 = vst.msk [vmem:[%s4500_s29 + $0x7c] sm:$0xf] %vm3116_vm4, %v3019_v28  ;;  %v3607_v28 = vor.u32 %v4053_v34, %v3604_v50  ;;  %v4054_v34 = vld [vmem:[%s4270_s7 + $0x1b4] sm:$0xf0] }
 0x1b7   : > { %v2827_v5 = vadd.f32 %v5226_v19, %v2695_v53  ;;  %v2500_v58 = vld [vmem:[#allocation2 + $0x100] sm:$0xff]  ;;  %2433 = vst.msk [vmem:[#allocation2 + $0x300] sm:$0xff] %vm313_vm3, %v2304_v38  ;;  %v5261_v59 = vpop.f32.mrf.mxu1  ;;  %v3595_v53 = vor.u32 %v4052_v56, %v3594_v55  ;;  %v3858_v55 = vld [vmem:[%s4270_s7 + $0x3b0] sm:$0xf]  ;;  %v4118_v56 = vld [vmem:[%s4270_s7 + $0x3b4] sm:$0xf0] }
 0x1b8   : > { %v2632_v29 = vmul.f32 %v5210_v6, %v2500_v58  ;;  %2370 = vst.msk [vmem:[#allocation2 + $0x108] sm:$0xff] %vm313_vm3, %v2241_v61  ;;  %v1801_v10 = vpop.f32.mrf.mxu2  ;;  %v4116_v61 = vld [vmem:[%s4270_s7 + $0x3a4] sm:$0xf0] }
 0x1b9   : > { %v1644_v15 = vpop.f32.mrf.mxu0  ;;  %v2955_v16 = vmax.f32 %v2827_v5, 0.0  ;;  %v2131_v2 = vadd.f32 %v2130_v14, %v1801_v10 }
 0x1ba   : > { %v1974_v17 = vadd.f32 %v5219_v18, %v1644_v15  ;;  %v2764_v22 = vadd.f32 %v5226_v19, %v2632_v29  ;;  %3958 = vmatmul.msk.bf16.gmra.mxu1 %vm1350_vm2, %v3599_v52  ;;  %v2135_v45 = vpop.f32.mrf.mxu3  ;;  %v3855_v18 = vor.u32 %v4115_v8, %v3852_v37  ;;  %v541_v52 = vld [vmem:[#allocation2 + $0x318] sm:$0xff] }
 0x1bb   : > { %v3083_v23 = vpack.c.bf16 %v2955_v16, %v2955_v16  ;;  %v2305_v51 = vadd.f32 %v2131_v2, %v539_v9  ;;  %v3851_v9 = vor.u32 %v4116_v61, %v3850_v60  ;;  %v4117_v16 = vld [vmem:[%s4270_s7 + $0x3b4] sm:$0xf]  ;;  %v3860_v2 = vld [vmem:[%s4270_s7 + $0x3b8] sm:$0xf0] }
 0x1bc   : > { %v2242_v27 = vadd.f32 %v1974_v17, %v476_v13  ;;  %1683 = vmatmul.bf16.gmra.mxu0 %v3587_v7  ;;  %v2892_v30 = vmax.f32 %v2764_v22, 0.0  ;;  %v478_v7 = vld [vmem:[#allocation2 + $0x120] sm:$0xff]  ;;  %v3863_v37 = vor.u32 %v4117_v16, %v3860_v2  ;;  %v480_v60 = vld [vmem:[#allocation2 + $0x130] sm:$0xff] }
 0x1bd   : > { %3212 = vst.msk [vmem:[%s4500_s29 + $0x17c] sm:$0xf] %vm3116_vm4, %v3083_v23  ;;  %1843 = vmatmul.bf16.gmra.mxu2 %v3843_v0  ;;  %3990 = vmatmul.msk.bf16.gmra.mxu3 %vm1350_vm2, %v3855_v18 }
 0x1be   : > { %v3020_v31 = vpack.c.bf16 %v2892_v30, %v2892_v30  ;;  %v2564_v32 = vld [vmem:[#allocation2 + $0x300] sm:$0xff]  ;;  %2434 = vst.msk [vmem:[#allocation2 + $0x308] sm:$0xff] %vm313_vm3, %v2305_v51 }
 0x1bf   : > { %v2696_v33 = vmul.f32 %v5210_v6, %v2564_v32  ;;  %v2501_v35 = vld [vmem:[#allocation2 + $0x108] sm:$0xff]  ;;  %2371 = vst.msk [vmem:[#allocation2 + $0x110] sm:$0xff] %vm313_vm3, %v2242_v27  ;;  %v5275_v36 = vpop.f32.mrf.mxu1  ;;  %v542_v32 = vld [vmem:[#allocation2 + $0x320] sm:$0xff] }
 0x1c0   : > { %3149 = vst.msk [vmem:[%s4500_s29 + $0x80] sm:$0xf] %vm3116_vm4, %v3020_v31  ;;  %v2633_v21 = vmul.f32 %v5210_v6, %v2501_v35  ;;  %v1804_v40 = vpop.f32.mrf.mxu2 }
 0x1c1   : > { %v1646_v42 = vpop.f32.mrf.mxu0  ;;  %v2828_v14 = vadd.f32 %v5226_v19, %v2696_v33  ;;  %v2134_v62 = vadd.f32 %v2133_v24, %v1804_v40 }
 0x1c2   : > { %v1976_v44 = vadd.f32 %v5242_v46, %v1646_v42  ;;  %v2765_v25 = vadd.f32 %v5226_v19, %v2633_v21  ;;  %v2138_v46 = vpop.f32.mrf.mxu3 }
 0x1c3   : > { %v2956_v47 = vmax.f32 %v2828_v14, 0.0  ;;  %v2306_v48 = vadd.f32 %v2134_v62, %v540_v39  ;;  %v479_v39 = vld [vmem:[#allocation2 + $0x128] sm:$0xff]  ;;  %v4055_v62 = vld [vmem:[%s4270_s7 + $0x1c4] sm:$0xf] }
 0x1c4   : > { %v2243_v11 = vadd.f32 %v1976_v44, %v477_v41  ;;  %v2893_v54 = vmax.f32 %v2765_v25, 0.0  ;;  %v3612_v44 = vld [vmem:[%s4270_s7 + $0x1c8] sm:$0xf0] }
 0x1c5   : > { %v3084_v57 = vpack.c.bf16 %v2956_v47, %v2956_v47  ;;  %v2565_v26 = vld [vmem:[#allocation2 + $0x308] sm:$0xff]  ;;  %2435 = vst.msk [vmem:[#allocation2 + $0x310] sm:$0xff] %vm313_vm3, %v2306_v48 }
 0x1c6   : > { %v3021_v38 = vpack.c.bf16 %v2893_v54, %v2893_v54  ;;  %v2697_v43 = vmul.f32 %v5210_v6, %v2565_v26  ;;  %v2502_v49 = vld [vmem:[#allocation2 + $0x110] sm:$0xff]  ;;  %2372 = vst.msk [vmem:[#allocation2 + $0x118] sm:$0xff] %vm313_vm3, %v2243_v11 }
 0x1c7   : > { %3213 = vst.msk [vmem:[%s4500_s29 + $0x180] sm:$0xf] %vm3116_vm4, %v3084_v57  ;;  %v2634_v63 = vmul.f32 %v5210_v6, %v2502_v49  ;;  %v5296_v3 = vpop.f32.mrf.mxu1  ;;  %v3602_v11 = vld [vmem:[%s4270_s7 + $0x1b0] sm:$0xf]  ;;  %v543_v49 = vld [vmem:[#allocation2 + $0x328] sm:$0xff] }
 0x1c8   : > { %3150 = vst.msk [vmem:[%s4500_s29 + $0x84] sm:$0xf] %vm3116_vm4, %v3021_v38  ;;  %v2829_v24 = vadd.f32 %v5226_v19, %v2697_v43  ;;  %v1806_v1 = vpop.f32.mrf.mxu2  ;;  %v3603_v38 = vor.u32 %v4054_v34, %v3602_v11 }
 0x1c9   : > { %v1649_v4 = vpop.f32.mrf.mxu0  ;;  %v2766_v5 = vadd.f32 %v5226_v19, %v2634_v63  ;;  %v2136_v58 = vadd.f32 %v2135_v45, %v1806_v1 }
 0x1ca   : > { %v1979_v29 = vadd.f32 %v5261_v59, %v1649_v4  ;;  %v2957_v10 = vmax.f32 %v2829_v24, 0.0  ;;  %3959 = vmatmul.msk.bf16.gmra.mxu1 %vm1350_vm2, %v3607_v28  ;;  %v2140_v59 = vpop.f32.mrf.mxu3 }
 0x1cb   : > { %v2894_v13 = vmax.f32 %v2766_v5, 0.0  ;;  %v2307_v15 = vadd.f32 %v2136_v58, %v541_v52  ;;  %v3859_v52 = vor.u32 %v4118_v56, %v3858_v55 }
 0x1cc   : > { %1688 = vmatmul.bf16.gmra.mxu0 %v3595_v53  ;;  %v3085_v17 = vpack.c.bf16 %v2957_v10, %v2957_v10  ;;  %v2566_v0 = vld [vmem:[#allocation2 + $0x310] sm:$0xff]  ;;  %v2244_v22 = vadd.f32 %v1979_v29, %v478_v7  ;;  %v4119_v7 = vld [vmem:[%s4270_s7 + $0x3c4] sm:$0xf]  ;;  %v3868_v29 = vld [vmem:[%s4270_s7 + $0x3c8] sm:$0xf0] }
 0x1cd   : > { %v3022_v23 = vpack.c.bf16 %v2894_v13, %v2894_v13  ;;  %v2698_v51 = vmul.f32 %v5210_v6, %v2566_v0  ;;  %v2503_v27 = vld [vmem:[#allocation2 + $0x118] sm:$0xff]  ;;  %2436 = vst.msk [vmem:[#allocation2 + $0x318] sm:$0xff] %vm313_vm3, %v2307_v15  ;;  %1848 = vmatmul.bf16.gmra.mxu2 %v3851_v9  ;;  %3991 = vmatmul.msk.bf16.gmra.mxu3 %vm1350_vm2, %v3863_v37 }
 0x1ce   : > { %3214 = vst.msk [vmem:[%s4500_s29 + $0x184] sm:$0xf] %vm3116_vm4, %v3085_v17  ;;  %v2635_v8 = vmul.f32 %v5210_v6, %v2503_v27 }
 0x1cf   : > { %3151 = vst.msk [vmem:[%s4500_s29 + $0x88] sm:$0xf] %vm3116_vm4, %v3022_v23  ;;  %v2830_v30 = vadd.f32 %v5226_v19, %v2698_v51  ;;  %v5314_v45 = vpop.f32.mrf.mxu1  ;;  %v481_v51 = vld [vmem:[#allocation2 + $0x138] sm:$0xff] }
 0x1d0   : > { %v2767_v31 = vadd.f32 %v5226_v19, %v2635_v8  ;;  %2373 = vst.msk [vmem:[#allocation2 + $0x120] sm:$0xff] %vm313_vm3, %v2244_v22  ;;  %v1809_v18 = vpop.f32.mrf.mxu2  ;;  %v544_v22 = vld [vmem:[#allocation2 + $0x330] sm:$0xff] }
 0x1d1   : > { %v1651_v33 = vpop.f32.mrf.mxu0  ;;  %v2958_v35 = vmax.f32 %v2830_v30, 0.0  ;;  %v2139_v21 = vadd.f32 %v2138_v46, %v1809_v18 }
 0x1d2   : > { %v1981_v40 = vadd.f32 %v5275_v36, %v1651_v33  ;;  %v2895_v41 = vmax.f32 %v2767_v31, 0.0  ;;  %v2143_v54 = vpop.f32.mrf.mxu3  ;;  %v3615_v36 = vor.u32 %v4055_v62, %v3612_v44  ;;  %v4057_v33 = vld [vmem:[%s4270_s7 + $0x1d4] sm:$0xf] }
 0x1d3   : > { %v3086_v42 = vpack.c.bf16 %v2958_v35, %v2958_v35  ;;  %v2308_v14 = vadd.f32 %v2139_v21, %v542_v32  ;;  %v3620_v35 = vld [vmem:[%s4270_s7 + $0x1d8] sm:$0xf0] }
 0x1d4   : > { %v3023_v25 = vpack.c.bf16 %v2895_v41, %v2895_v41  ;;  %v2567_v47 = vld [vmem:[#allocation2 + $0x318] sm:$0xff]  ;;  %v2245_v48 = vadd.f32 %v1981_v40, %v479_v39  ;;  %v3610_v39 = vld [vmem:[%s4270_s7 + $0x1c0] sm:$0xf]  ;;  %v4056_v40 = vld [vmem:[%s4270_s7 + $0x1c4] sm:$0xf0] }
 0x1d5   : > { %3215 = vst.msk [vmem:[%s4500_s29 + $0x188] sm:$0xf] %vm3116_vm4, %v3086_v42  ;;  %v2699_v50 = vmul.f32 %v5210_v6, %v2567_v47  ;;  %v3866_v47 = vld [vmem:[%s4270_s7 + $0x3c0] sm:$0xf] }
 0x1d6   : > { %3152 = vst.msk [vmem:[%s4500_s29 + $0x8c] sm:$0xf] %vm3116_vm4, %v3023_v25  ;;  %v3623_v25 = vor.u32 %v4057_v33, %v3620_v35  ;;  %v4058_v33 = vld [vmem:[%s4270_s7 + $0x1d4] sm:$0xf0] }
 0x1d7   : > { %v2831_v57 = vadd.f32 %v5226_v19, %v2699_v50  ;;  %v2504_v26 = vld [vmem:[#allocation2 + $0x120] sm:$0xff]  ;;  %2437 = vst.msk [vmem:[#allocation2 + $0x320] sm:$0xff] %vm313_vm3, %v2308_v14  ;;  %v5333_v46 = vpop.f32.mrf.mxu1  ;;  %v3611_v50 = vor.u32 %v4056_v40, %v3610_v39  ;;  %v3874_v39 = vld [vmem:[%s4270_s7 + $0x3d0] sm:$0xf]  ;;  %v4122_v40 = vld [vmem:[%s4270_s7 + $0x3d4] sm:$0xf0] }
 0x1d8   : > { %v2636_v43 = vmul.f32 %v5210_v6, %v2504_v26  ;;  %2374 = vst.msk [vmem:[#allocation2 + $0x128] sm:$0xff] %vm313_vm3, %v2245_v48  ;;  %v1811_v28 = vpop.f32.mrf.mxu2  ;;  %v4120_v48 = vld [vmem:[%s4270_s7 + $0x3c4] sm:$0xf0] }
 0x1d9   : > { %v1654_v61 = vpop.f32.mrf.mxu0  ;;  %v2959_v63 = vmax.f32 %v2831_v57, 0.0  ;;  %v2141_v53 = vadd.f32 %v2140_v59, %v1811_v28 }
 0x1da   : > { %v1984_v24 = vadd.f32 %v5296_v3, %v1654_v61  ;;  %v2768_v1 = vadd.f32 %v5226_v19, %v2636_v43  ;;  %3960 = vmatmul.msk.bf16.gmra.mxu1 %vm1350_vm2, %v3615_v36  ;;  %v2145_v10 = vpop.f32.mrf.mxu3  ;;  %v3871_v3 = vor.u32 %v4119_v7, %v3868_v29  ;;  %v545_v36 = vld [vmem:[#allocation2 + $0x338] sm:$0xff] }
 0x1db   : > { %v3087_v4 = vpack.c.bf16 %v2959_v63, %v2959_v63  ;;  %v2309_v5 = vadd.f32 %v2141_v53, %v543_v49  ;;  %v3867_v49 = vor.u32 %v4120_v48, %v3866_v47  ;;  %v4121_v63 = vld [vmem:[%s4270_s7 + $0x3d4] sm:$0xf]  ;;  %v3876_v53 = vld [vmem:[%s4270_s7 + $0x3d8] sm:$0xf0] }
 0x1dc   : > { %v2246_v58 = vadd.f32 %v1984_v24, %v480_v60  ;;  %1693 = vmatmul.bf16.gmra.mxu0 %v3603_v38  ;;  %v2896_v9 = vmax.f32 %v2768_v1, 0.0  ;;  %v482_v38 = vld [vmem:[#allocation2 + $0x140] sm:$0xff]  ;;  %v3879_v29 = vor.u32 %v4121_v63, %v3876_v53  ;;  %v484_v47 = vld [vmem:[#allocation2 + $0x150] sm:$0xff] }
 0x1dd   : > { %3216 = vst.msk [vmem:[%s4500_s29 + $0x18c] sm:$0xf] %vm3116_vm4, %v3087_v4  ;;  %1853 = vmatmul.bf16.gmra.mxu2 %v3859_v52  ;;  %3992 = vmatmul.msk.bf16.gmra.mxu3 %vm1350_vm2, %v3871_v3 }
 0x1de   : > { %v3024_v13 = vpack.c.bf16 %v2896_v9, %v2896_v9  ;;  %v2568_v15 = vld [vmem:[#allocation2 + $0x320] sm:$0xff]  ;;  %2438 = vst.msk [vmem:[#allocation2 + $0x328] sm:$0xff] %vm313_vm3, %v2309_v5 }
 0x1df   : > { %v2700_v16 = vmul.f32 %v5210_v6, %v2568_v15  ;;  %v2505_v2 = vld [vmem:[#allocation2 + $0x128] sm:$0xff]  ;;  %2375 = vst.msk [vmem:[#allocation2 + $0x130] sm:$0xff] %vm313_vm3, %v2246_v58  ;;  %v5347_v17 = vpop.f32.mrf.mxu1  ;;  %v546_v15 = vld [vmem:[#allocation2 + $0x340] sm:$0xff] }
 0x1e0   : > { %3153 = vst.msk [vmem:[%s4500_s29 + $0x90] sm:$0xf] %vm3116_vm4, %v3024_v13  ;;  %v2637_v0 = vmul.f32 %v5210_v6, %v2505_v2  ;;  %v1814_v23 = vpop.f32.mrf.mxu2 }
 0x1e1   : > { %v1656_v27 = vpop.f32.mrf.mxu0  ;;  %v2832_v59 = vadd.f32 %v5226_v19, %v2700_v16  ;;  %v2144_v8 = vadd.f32 %v2143_v54, %v1814_v23 }
 0x1e2   : > { %v1986_v37 = vadd.f32 %v5314_v45, %v1656_v27  ;;  %v2769_v30 = vadd.f32 %v5226_v19, %v2637_v0  ;;  %v2148_v45 = vpop.f32.mrf.mxu3 }
 0x1e3   : > { %v2960_v31 = vmax.f32 %v2832_v59, 0.0  ;;  %v2310_v32 = vadd.f32 %v2144_v8, %v544_v22  ;;  %v483_v22 = vld [vmem:[#allocation2 + $0x148] sm:$0xff]  ;;  %v4059_v8 = vld [vmem:[%s4270_s7 + $0x1e4] sm:$0xf] }
 0x1e4   : > { %v2247_v18 = vadd.f32 %v1986_v37, %v481_v51  ;;  %v2897_v21 = vmax.f32 %v2769_v30, 0.0  ;;  %v3628_v37 = vld [vmem:[%s4270_s7 + $0x1e8] sm:$0xf0] }
 0x1e5   : > { %v3088_v41 = vpack.c.bf16 %v2960_v31, %v2960_v31  ;;  %v2569_v42 = vld [vmem:[#allocation2 + $0x328] sm:$0xff]  ;;  %2439 = vst.msk [vmem:[#allocation2 + $0x330] sm:$0xff] %vm313_vm3, %v2310_v32 }
 0x1e6   : > { %v3025_v14 = vpack.c.bf16 %v2897_v21, %v2897_v21  ;;  %v2701_v62 = vmul.f32 %v5210_v6, %v2569_v42  ;;  %v2506_v44 = vld [vmem:[#allocation2 + $0x130] sm:$0xff]  ;;  %2376 = vst.msk [vmem:[#allocation2 + $0x138] sm:$0xff] %vm313_vm3, %v2247_v18 }
 0x1e7   : > { %3217 = vst.msk [vmem:[%s4500_s29 + $0x190] sm:$0xf] %vm3116_vm4, %v3088_v41  ;;  %v2638_v11 = vmul.f32 %v5210_v6, %v2506_v44  ;;  %v5368_v34 = vpop.f32.mrf.mxu1  ;;  %v3618_v18 = vld [vmem:[%s4270_s7 + $0x1d0] sm:$0xf]  ;;  %v547_v44 = vld [vmem:[#allocation2 + $0x348] sm:$0xff] }
 0x1e8   : > { %3154 = vst.msk [vmem:[%s4500_s29 + $0x94] sm:$0xf] %vm3116_vm4, %v3025_v14  ;;  %v2833_v54 = vadd.f32 %v5226_v19, %v2701_v62  ;;  %v1816_v55 = vpop.f32.mrf.mxu2  ;;  %v3619_v14 = vor.u32 %v4058_v33, %v3618_v18 }
 0x1e9   : > { %v1659_v56 = vpop.f32.mrf.mxu0  ;;  %v2770_v57 = vadd.f32 %v5226_v19, %v2638_v11  ;;  %v2146_v26 = vadd.f32 %v2145_v10, %v1816_v55 }
 0x1ea   : > { %v1989_v43 = vadd.f32 %v5333_v46, %v1659_v56  ;;  %v2961_v28 = vmax.f32 %v2833_v54, 0.0  ;;  %3961 = vmatmul.msk.bf16.gmra.mxu1 %vm1350_vm2, %v3623_v25  ;;  %v2150_v46 = vpop.f32.mrf.mxu3 }
 0x1eb   : > { %v2898_v60 = vmax.f32 %v2770_v57, 0.0  ;;  %v2311_v61 = vadd.f32 %v2146_v26, %v545_v36  ;;  %v3875_v36 = vor.u32 %v4122_v40, %v3874_v39 }
 0x1ec   : > { %1698 = vmatmul.bf16.gmra.mxu0 %v3611_v50  ;;  %v3089_v24 = vpack.c.bf16 %v2961_v28, %v2961_v28  ;;  %v2570_v52 = vld [vmem:[#allocation2 + $0x330] sm:$0xff]  ;;  %v2248_v1 = vadd.f32 %v1989_v43, %v482_v38  ;;  %v4123_v38 = vld [vmem:[%s4270_s7 + $0x3e4] sm:$0xf]  ;;  %v3884_v43 = vld [vmem:[%s4270_s7 + $0x3e8] sm:$0xf0] }
 0x1ed   : > { %v3026_v4 = vpack.c.bf16 %v2898_v60, %v2898_v60  ;;  %v2702_v5 = vmul.f32 %v5210_v6, %v2570_v52  ;;  %v2507_v58 = vld [vmem:[#allocation2 + $0x138] sm:$0xff]  ;;  %2440 = vst.msk [vmem:[#allocation2 + $0x338] sm:$0xff] %vm313_vm3, %v2311_v61  ;;  %1858 = vmatmul.bf16.gmra.mxu2 %v3867_v49  ;;  %3993 = vmatmul.msk.bf16.gmra.mxu3 %vm1350_vm2, %v3879_v29 }
 0x1ee   : > { %3218 = vst.msk [vmem:[%s4500_s29 + $0x194] sm:$0xf] %vm3116_vm4, %v3089_v24  ;;  %v2639_v7 = vmul.f32 %v5210_v6, %v2507_v58 }
 0x1ef   : > { %3155 = vst.msk [vmem:[%s4500_s29 + $0x98] sm:$0xf] %vm3116_vm4, %v3026_v4  ;;  %v2834_v9 = vadd.f32 %v5226_v19, %v2702_v5  ;;  %v5386_v10 = vpop.f32.mrf.mxu1  ;;  %v485_v5 = vld [vmem:[#allocation2 + $0x158] sm:$0xff] }
 0x1f0   : > { %v2771_v13 = vadd.f32 %v5226_v19, %v2639_v7  ;;  %2377 = vst.msk [vmem:[#allocation2 + $0x140] sm:$0xff] %vm313_vm3, %v2248_v1  ;;  %v1819_v3 = vpop.f32.mrf.mxu2  ;;  %v548_v1 = vld [vmem:[#allocation2 + $0x350] sm:$0xff] }
 0x1f1   : > { %v1661_v16 = vpop.f32.mrf.mxu0  ;;  %v2962_v2 = vmax.f32 %v2834_v9, 0.0  ;;  %v2149_v0 = vadd.f32 %v2148_v45, %v1819_v3 }
 0x1f2   : > { %v1991_v23 = vadd.f32 %v5347_v17, %v1661_v16  ;;  %v2899_v51 = vmax.f32 %v2771_v13, 0.0  ;;  %v2153_v21 = vpop.f32.mrf.mxu3  ;;  %v3631_v17 = vor.u32 %v4059_v8, %v3628_v37  ;;  %v4061_v16 = vld [vmem:[%s4270_s7 + $0x1f4] sm:$0xf] }
 0x1f3   : > { %v3090_v27 = vpack.c.bf16 %v2962_v2, %v2962_v2  ;;  %v2312_v59 = vadd.f32 %v2149_v0, %v546_v15  ;;  %v3636_v2 = vld [vmem:[%s4270_s7 + $0x1f8] sm:$0xf0] }
 0x1f4   : > { %v3027_v30 = vpack.c.bf16 %v2899_v51, %v2899_v51  ;;  %v2571_v31 = vld [vmem:[#allocation2 + $0x338] sm:$0xff]  ;;  %v2249_v32 = vadd.f32 %v1991_v23, %v483_v22  ;;  %v3626_v22 = vld [vmem:[%s4270_s7 + $0x1e0] sm:$0xf]  ;;  %v4060_v23 = vld [vmem:[%s4270_s7 + $0x1e4] sm:$0xf0] }
 0x1f5   : > { %3219 = vst.msk [vmem:[%s4500_s29 + $0x198] sm:$0xf] %vm3116_vm4, %v3090_v27  ;;  %v2703_v35 = vmul.f32 %v5210_v6, %v2571_v31  ;;  %v3882_v31 = vld [vmem:[%s4270_s7 + $0x3e0] sm:$0xf] }
 0x1f6   : > { %3156 = vst.msk [vmem:[%s4500_s29 + $0x9c] sm:$0xf] %vm3116_vm4, %v3027_v30  ;;  %v3639_v30 = vor.u32 %v4061_v16, %v3636_v2  ;;  %v4062_v16 = vld [vmem:[%s4270_s7 + $0x1f4] sm:$0xf0] }
 0x1f7   : > { %v2835_v41 = vadd.f32 %v5226_v19, %v2703_v35  ;;  %v2508_v42 = vld [vmem:[#allocation2 + $0x140] sm:$0xff]  ;;  %2441 = vst.msk [vmem:[#allocation2 + $0x340] sm:$0xff] %vm313_vm3, %v2312_v59  ;;  %v5405_v45 = vpop.f32.mrf.mxu1  ;;  %v3627_v35 = vor.u32 %v4060_v23, %v3626_v22  ;;  %v3890_v22 = vld [vmem:[%s4270_s7 + $0x3f0] sm:$0xf]  ;;  %v4126_v23 = vld [vmem:[%s4270_s7 + $0x3f4] sm:$0xf0] }
 0x1f8   : > { %v2640_v62 = vmul.f32 %v5210_v6, %v2508_v42  ;;  %2378 = vst.msk [vmem:[#allocation2 + $0x148] sm:$0xff] %vm313_vm3, %v2249_v32  ;;  %v1821_v25 = vpop.f32.mrf.mxu2  ;;  %v4124_v32 = vld [vmem:[%s4270_s7 + $0x3e4] sm:$0xf0] }
 0x1f9   : > { %v1664_v48 = vpop.f32.mrf.mxu0  ;;  %v2963_v11 = vmax.f32 %v2835_v41, 0.0  ;;  %v2151_v50 = vadd.f32 %v2150_v46, %v1821_v25 }
 0x1fa   : > { %v1994_v54 = vadd.f32 %v5368_v34, %v1664_v48  ;;  %v2772_v55 = vadd.f32 %v5226_v19, %v2640_v62  ;;  %3962 = vmatmul.msk.bf16.gmra.mxu1 %vm1350_vm2, %v3631_v17  ;;  %v2155_v28 = vpop.f32.mrf.mxu3  ;;  %v3887_v34 = vor.u32 %v4123_v38, %v3884_v43  ;;  %v549_v17 = vld [vmem:[#allocation2 + $0x358] sm:$0xff] }
 0x1fb   : > { %v3091_v56 = vpack.c.bf16 %v2963_v11, %v2963_v11  ;;  %v2313_v57 = vadd.f32 %v2151_v50, %v547_v44  ;;  %v3883_v44 = vor.u32 %v4124_v32, %v3882_v31  ;;  %v4125_v11 = vld [vmem:[%s4270_s7 + $0x3f4] sm:$0xf]  ;;  %v3892_v50 = vld [vmem:[%s4270_s7 + $0x3f8] sm:$0xf0] }
 0x1fc   : > { %v2250_v26 = vadd.f32 %v1994_v54, %v484_v47  ;;  %1703 = vmatmul.bf16.gmra.mxu0 %v3619_v14  ;;  %v2900_v49 = vmax.f32 %v2772_v55, 0.0  ;;  %v486_v14 = vld [vmem:[#allocation2 + $0x160] sm:$0xff]  ;;  %v3895_v43 = vor.u32 %v4125_v11, %v3892_v50  ;;  %v488_v31 = vld [vmem:[#allocation2 + $0x170] sm:$0xff] }
 0x1fd   : > { %3220 = vst.msk [vmem:[%s4500_s29 + $0x19c] sm:$0xf] %vm3116_vm4, %v3091_v56  ;;  %1863 = vmatmul.bf16.gmra.mxu2 %v3875_v36  ;;  %3994 = vmatmul.msk.bf16.gmra.mxu3 %vm1350_vm2, %v3887_v34  ;;  %v552_v50 = vld [vmem:[#allocation2 + $0x370] sm:$0xff] }
 0x1fe   : > { %v3028_v60 = vpack.c.bf16 %v2900_v49, %v2900_v49  ;;  %v2572_v61 = vld [vmem:[#allocation2 + $0x340] sm:$0xff]  ;;  %2442 = vst.msk [vmem:[#allocation2 + $0x348] sm:$0xff] %vm313_vm3, %v2313_v57 }
 0x1ff   : > { %v2704_v63 = vmul.f32 %v5210_v6, %v2572_v61  ;;  %v2509_v53 = vld [vmem:[#allocation2 + $0x148] sm:$0xff]  ;;  %2379 = vst.msk [vmem:[#allocation2 + $0x150] sm:$0xff] %vm313_vm3, %v2250_v26  ;;  %v5419_v24 = vpop.f32.mrf.mxu1  ;;  %v550_v61 = vld [vmem:[#allocation2 + $0x360] sm:$0xff] }
 0x200   : > { %3157 = vst.msk [vmem:[%s4500_s29 + $0xa0] sm:$0xf] %vm3116_vm4, %v3028_v60  ;;  %v2641_v52 = vmul.f32 %v5210_v6, %v2509_v53  ;;  %v1824_v4 = vpop.f32.mrf.mxu2 }
 0x201   : > { %v1666_v58 = vpop.f32.mrf.mxu0  ;;  %v2836_v46 = vadd.f32 %v5226_v19, %v2704_v63  ;;  %v2154_v7 = vadd.f32 %v2153_v21, %v1824_v4 }
 0x202   : > { %v1996_v29 = vadd.f32 %v5386_v10, %v1666_v58  ;;  %v2773_v9 = vadd.f32 %v5226_v19, %v2641_v52  ;;  %v2158_v10 = vpop.f32.mrf.mxu3 }
 0x203   : > { %v2964_v13 = vmax.f32 %v2836_v46, 0.0  ;;  %v2314_v15 = vadd.f32 %v2154_v7, %v548_v1  ;;  %v487_v1 = vld [vmem:[#allocation2 + $0x168] sm:$0xff]  ;;  %v4063_v7 = vld [vmem:[%s4270_s7 + $0x204] sm:$0xf] }
 0x204   : > { %v2251_v3 = vadd.f32 %v1996_v29, %v485_v5  ;;  %v2901_v0 = vmax.f32 %v2773_v9, 0.0  ;;  %v3644_v29 = vld [vmem:[%s4270_s7 + $0x208] sm:$0xf0] }
 0x205   : > { %v3092_v51 = vpack.c.bf16 %v2964_v13, %v2964_v13  ;;  %v2573_v27 = vld [vmem:[#allocation2 + $0x348] sm:$0xff]  ;;  %2443 = vst.msk [vmem:[#allocation2 + $0x350] sm:$0xff] %vm313_vm3, %v2314_v15 }
 0x206   : > { %v3029_v59 = vpack.c.bf16 %v2901_v0, %v2901_v0  ;;  %v2705_v8 = vmul.f32 %v5210_v6, %v2573_v27  ;;  %v2510_v37 = vld [vmem:[#allocation2 + $0x150] sm:$0xff]  ;;  %2380 = vst.msk [vmem:[#allocation2 + $0x158] sm:$0xff] %vm313_vm3, %v2251_v3 }
 0x207   : > { %3221 = vst.msk [vmem:[%s4500_s29 + $0x1a0] sm:$0xf] %vm3116_vm4, %v3092_v51  ;;  %v2642_v18 = vmul.f32 %v5210_v6, %v2510_v37  ;;  %v5440_v33 = vpop.f32.mrf.mxu1  ;;  %v3634_v3 = vld [vmem:[%s4270_s7 + $0x1f0] sm:$0xf]  ;;  %v551_v37 = vld [vmem:[#allocation2 + $0x368] sm:$0xff] }
 0x208   : > { %3158 = vst.msk [vmem:[%s4500_s29 + $0xa4] sm:$0xf] %vm3116_vm4, %v3029_v59  ;;  %v2837_v21 = vadd.f32 %v5226_v19, %v2705_v8  ;;  %v1826_v39 = vpop.f32.mrf.mxu2  ;;  %v3635_v59 = vor.u32 %v4062_v16, %v3634_v3 }
 0x209   : > { %v1669_v40 = vpop.f32.mrf.mxu0  ;;  %v2774_v41 = vadd.f32 %v5226_v19, %v2642_v18  ;;  %v2156_v42 = vadd.f32 %v2155_v28, %v1826_v39 }
 0x20a   : > { %v1999_v62 = vadd.f32 %v5405_v45, %v1669_v40  ;;  %v2965_v25 = vmax.f32 %v2837_v21, 0.0  ;;  %3963 = vmatmul.msk.bf16.gmra.mxu1 %vm1350_vm2, %v3639_v30  ;;  %v2160_v45 = vpop.f32.mrf.mxu3 }
 0x20b   : > { %v2902_v47 = vmax.f32 %v2774_v41, 0.0  ;;  %v2315_v48 = vadd.f32 %v2156_v42, %v549_v17  ;;  %v3891_v17 = vor.u32 %v4126_v23, %v3890_v22  ;;  %v5506_v23 = vld [vmem:[%s5713_s2] ss:$0 sm:$0xff] }
 0x20c   : > { %1708 = vmatmul.bf16.gmra.mxu0 %v3627_v35  ;;  %v3093_v54 = vpack.c.bf16 %v2965_v25, %v2965_v25  ;;  %v2574_v36 = vld [vmem:[#allocation2 + $0x350] sm:$0xff]  ;;  %v2252_v55 = vadd.f32 %v1999_v62, %v486_v14 }
 0x20d   : > { %v3030_v56 = vpack.c.bf16 %v2902_v47, %v2902_v47  ;;  %v2706_v57 = vmul.f32 %v5210_v6, %v2574_v36  ;;  %v2511_v26 = vld [vmem:[#allocation2 + $0x158] sm:$0xff]  ;;  %2444 = vst.msk [vmem:[#allocation2 + $0x358] sm:$0xff] %vm313_vm3, %v2315_v48  ;;  %1868 = vmatmul.bf16.gmra.mxu2 %v3883_v44  ;;  %3995 = vmatmul.msk.bf16.gmra.mxu3 %vm1350_vm2, %v3895_v43 }
 0x20e   : > { %3222 = vst.msk [vmem:[%s4500_s29 + $0x1a4] sm:$0xf] %vm3116_vm4, %v3093_v54  ;;  %v2643_v38 = vmul.f32 %v5210_v6, %v2511_v26  ;;  %v489_v36 = vld [vmem:[#allocation2 + $0x178] sm:$0xff] }
 0x20f   : > { %3159 = vst.msk [vmem:[%s4500_s29 + $0xa8] sm:$0xf] %vm3116_vm4, %v3030_v56  ;;  %v2838_v49 = vadd.f32 %v5226_v19, %v2706_v57  ;;  %v5458_v28 = vpop.f32.mrf.mxu1 }
 0x210   : > { %v2775_v60 = vadd.f32 %v5226_v19, %v2643_v38  ;;  %2381 = vst.msk [vmem:[#allocation2 + $0x160] sm:$0xff] %vm313_vm3, %v2252_v55  ;;  %v1829_v34 = vpop.f32.mrf.mxu2 }
 0x211   : > { %v1671_v63 = vpop.f32.mrf.mxu0  ;;  %v2966_v53 = vmax.f32 %v2838_v49, 0.0  ;;  %v2159_v52 = vadd.f32 %v2158_v10, %v1829_v34 }
 0x212   : > { %v2001_v4 = vadd.f32 %v5419_v24, %v1671_v63  ;;  %v2903_v5 = vmax.f32 %v2775_v60, 0.0  ;;  %v2163_v0 = vpop.f32.mrf.mxu3  ;;  %v3647_v24 = vor.u32 %v4063_v7, %v3644_v29 }
 0x213   : > { %v3094_v58 = vpack.c.bf16 %v2966_v53, %v2966_v53  ;;  %v2316_v46 = vadd.f32 %v2159_v52, %v550_v61 }
 0x214   : > { %v3031_v9 = vpack.c.bf16 %v2903_v5, %v2903_v5  ;;  %v2575_v13 = vld [vmem:[#allocation2 + $0x358] sm:$0xff]  ;;  %v2253_v15 = vadd.f32 %v2001_v4, %v487_v1 }
 0x215   : > { %3223 = vst.msk [vmem:[%s4500_s29 + $0x1a8] sm:$0xf] %vm3116_vm4, %v3094_v58  ;;  %v2707_v2 = vmul.f32 %v5210_v6, %v2575_v13  ;;  %v553_v58 = vld [vmem:[#allocation2 + $0x378] sm:$0xff]  ;;  %v490_v13 = vld [vmem:[#allocation2 + $0x180] sm:$0xff] }
 0x216   : > { %3160 = vst.msk [vmem:[%s4500_s29 + $0xac] sm:$0xf] %vm3116_vm4, %v3031_v9 }
 0x217   : > { %v2839_v51 = vadd.f32 %v5226_v19, %v2707_v2  ;;  %v2512_v27 = vld [vmem:[#allocation2 + $0x160] sm:$0xff]  ;;  %2445 = vst.msk [vmem:[#allocation2 + $0x360] sm:$0xff] %vm313_vm3, %v2316_v46  ;;  %v2008_v10 = vpop.f32.mrf.mxu1 }
 0x218   : > { %v2644_v8 = vmul.f32 %v5210_v6, %v2512_v27  ;;  %2382 = vst.msk [vmem:[#allocation2 + $0x168] sm:$0xff] %vm313_vm3, %v2253_v15  ;;  %v1831_v30 = vpop.f32.mrf.mxu2 }
 0x219   : > { %v1674_v32 = vpop.f32.mrf.mxu0  ;;  %v2967_v18 = vmax.f32 %v2839_v51, 0.0  ;;  %v2161_v35 = vadd.f32 %v2160_v45, %v1831_v30 }
 0x21a   : > { %v2004_v21 = vadd.f32 %v5440_v33, %v1674_v32  ;;  %v2776_v39 = vadd.f32 %v5226_v19, %v2644_v8  ;;  %3964 = vmatmul.msk.bf16.gmra.mxu1 %vm1350_vm2, %v3647_v24  ;;  %v2165_v62 = vpop.f32.mrf.mxu3 }
 0x21b   : > { %v3095_v40 = vpack.c.bf16 %v2967_v18, %v2967_v18  ;;  %v2317_v41 = vadd.f32 %v2161_v35, %v551_v37 }
 0x21c   : > { %v2254_v42 = vadd.f32 %v2004_v21, %v488_v31  ;;  %1713 = vmatmul.bf16.gmra.mxu0 %v3635_v59  ;;  %v2904_v14 = vmax.f32 %v2776_v39, 0.0  ;;  %v5518_v59 = vld [vmem:[%s5714_s3] ss:$0 sm:$0xff] }
 0x21d   : > { %3224 = vst.msk [vmem:[%s4500_s29 + $0x1ac] sm:$0xf] %vm3116_vm4, %v3095_v40  ;;  %1873 = vmatmul.bf16.gmra.mxu2 %v3891_v17  ;;  %v554_v31 = vld [vmem:[#allocation2 + $0x380] sm:$0xff]  ;;  %v491_v17 = vld [vmem:[#allocation2 + $0x188] sm:$0xff] }
 0x21e   : > { %v3032_v44 = vpack.c.bf16 %v2904_v14, %v2904_v14  ;;  %v2576_v25 = vld [vmem:[#allocation2 + $0x360] sm:$0xff]  ;;  %2446 = vst.msk [vmem:[#allocation2 + $0x368] sm:$0xff] %vm313_vm3, %v2317_v41 }
 0x21f   : > { %v2708_v33 = vmul.f32 %v5210_v6, %v2576_v25  ;;  %v2513_v47 = vld [vmem:[#allocation2 + $0x168] sm:$0xff]  ;;  %2383 = vst.msk [vmem:[#allocation2 + $0x170] sm:$0xff] %vm313_vm3, %v2254_v42  ;;  %v2010_v48 = vpop.f32.mrf.mxu1 }
 0x220   : > { %3161 = vst.msk [vmem:[%s4500_s29 + $0xb0] sm:$0xf] %vm3116_vm4, %v3032_v44  ;;  %v2645_v11 = vmul.f32 %v5210_v6, %v2513_v47  ;;  %v1834_v54 = vpop.f32.mrf.mxu2 }
 0x221   : > { %v1676_v55 = vpop.f32.mrf.mxu0  ;;  %v2840_v56 = vadd.f32 %v5226_v19, %v2708_v33  ;;  %v2164_v57 = vadd.f32 %v2163_v0, %v1834_v54  ;;  %v555_v54 = vld [vmem:[#allocation2 + $0x388] sm:$0xff] }
 0x222   : > { %v2006_v26 = vadd.f32 %v5458_v28, %v1676_v55  ;;  %v2777_v45 = vadd.f32 %v5226_v19, %v2645_v11  ;;  %v2168_v63 = vpop.f32.mrf.mxu3  ;;  %v492_v55 = vld [vmem:[#allocation2 + $0x190] sm:$0xff] }
 0x223   : > { %v2968_v38 = vmax.f32 %v2840_v56, 0.0  ;;  %v2318_v43 = vadd.f32 %v2164_v57, %v552_v50 }
 0x224   : > { %v2255_v49 = vadd.f32 %v2006_v26, %v489_v36  ;;  %v2905_v60 = vmax.f32 %v2777_v45, 0.0 }
 0x225   : > { %v3096_v61 = vpack.c.bf16 %v2968_v38, %v2968_v38  ;;  %v2577_v34 = vld [vmem:[#allocation2 + $0x368] sm:$0xff]  ;;  %2447 = vst.msk [vmem:[#allocation2 + $0x370] sm:$0xff] %vm313_vm3, %v2318_v43 }
 0x226   : > { %v3033_v53 = vpack.c.bf16 %v2905_v60, %v2905_v60  ;;  %v2709_v52 = vmul.f32 %v5210_v6, %v2577_v34  ;;  %v2514_v1 = vld [vmem:[#allocation2 + $0x170] sm:$0xff]  ;;  %2384 = vst.msk [vmem:[#allocation2 + $0x178] sm:$0xff] %vm313_vm3, %v2255_v49 }
 0x227   : > { %3225 = vst.msk [vmem:[%s4500_s29 + $0x1b0] sm:$0xf] %vm3116_vm4, %v3096_v61  ;;  %v2646_v28 = vmul.f32 %v5210_v6, %v2514_v1  ;;  %v2013_v4 = vpop.f32.mrf.mxu1 }
 0x228   : > { %3162 = vst.msk [vmem:[%s4500_s29 + $0xb4] sm:$0xf] %vm3116_vm4, %v3033_v53  ;;  %v2841_v5 = vadd.f32 %v5226_v19, %v2709_v52  ;;  %v1836_v46 = vpop.f32.mrf.mxu2 }
 0x229   : > { %v1679_v7 = vpop.f32.mrf.mxu0  ;;  %v2778_v29 = vadd.f32 %v5226_v19, %v2646_v28  ;;  %v2166_v9 = vadd.f32 %v2165_v62, %v1836_v46  ;;  %v493_v46 = vld [vmem:[#allocation2 + $0x198] sm:$0xff] }
 0x22a   : > { %v2009_v15 = vadd.f32 %v2008_v10, %v1679_v7  ;;  %v2969_v3 = vmax.f32 %v2841_v5, 0.0  ;;  %v2170_v27 = vpop.f32.mrf.mxu3  ;;  %v556_v5 = vld [vmem:[#allocation2 + $0x390] sm:$0xff] }
 0x22b   : > { %v2906_v16 = vmax.f32 %v2778_v29, 0.0  ;;  %v2319_v2 = vadd.f32 %v2166_v9, %v553_v58 }
 0x22c   : > { %v3097_v0 = vpack.c.bf16 %v2969_v3, %v2969_v3  ;;  %v2578_v6 = vld [vmem:[#allocation2 + $0x370] sm:$0xff]  ;;  %v2256_v24 = vadd.f32 %v2009_v15, %v490_v13 }
 0x22d   : > { %v3034_v22 = vpack.c.bf16 %v2906_v16, %v2906_v16  ;;  %v2710_v51 = vmul.f32 %v5506_v23, %v2578_v6  ;;  %v2515_v19 = vld [vmem:[#allocation2 + $0x178] sm:$0xff]  ;;  %2448 = vst.msk [vmem:[#allocation2 + $0x378] sm:$0xff] %vm313_vm3, %v2319_v2 }
 0x22e   : > { %3226 = vst.msk [vmem:[%s4500_s29 + $0x1b4] sm:$0xf] %vm3116_vm4, %v3097_v0  ;;  %v2647_v10 = vmul.f32 %v5506_v23, %v2515_v19 }
 0x22f   : > { %3163 = vst.msk [vmem:[%s4500_s29 + $0xb8] sm:$0xf] %vm3116_vm4, %v3034_v22  ;;  %v2842_v8 = vadd.f32 %v5518_v59, %v2710_v51  ;;  %v2015_v37 = vpop.f32.mrf.mxu1 }
 0x230   : > { %v2779_v30 = vadd.f32 %v5518_v59, %v2647_v10  ;;  %2385 = vst.msk [vmem:[#allocation2 + $0x180] sm:$0xff] %vm313_vm3, %v2256_v24  ;;  %v1839_v32 = vpop.f32.mrf.mxu2 }
 0x231   : > { %v1681_v18 = vpop.f32.mrf.mxu0  ;;  %v2970_v35 = vmax.f32 %v2842_v8, 0.0  ;;  %v2169_v21 = vadd.f32 %v2168_v63, %v1839_v32 }
 0x232   : > { %v2011_v39 = vadd.f32 %v2010_v48, %v1681_v18  ;;  %v2907_v40 = vmax.f32 %v2779_v30, 0.0  ;;  %v2173_v33 = vpop.f32.mrf.mxu3  ;;  %v557_v30 = vld [vmem:[#allocation2 + $0x398] sm:$0xff] }
 0x233   : > { %v3098_v41 = vpack.c.bf16 %v2970_v35, %v2970_v35  ;;  %v2320_v42 = vadd.f32 %v2169_v21, %v554_v31  ;;  %v494_v21 = vld [vmem:[#allocation2 + $0x1a0] sm:$0xff] }
 0x234   : > { %v3035_v14 = vpack.c.bf16 %v2907_v40, %v2907_v40  ;;  %v2579_v62 = vld [vmem:[#allocation2 + $0x378] sm:$0xff]  ;;  %v2257_v44 = vadd.f32 %v2011_v39, %v491_v17 }
 0x235   : > { %3227 = vst.msk [vmem:[%s4500_s29 + $0x1b8] sm:$0xf] %vm3116_vm4, %v3098_v41  ;;  %v2711_v25 = vmul.f32 %v5506_v23, %v2579_v62 }
 0x236   : > { %3164 = vst.msk [vmem:[%s4500_s29 + $0xbc] sm:$0xf] %vm3116_vm4, %v3035_v14 }
 0x237   : > { %v2843_v47 = vadd.f32 %v5518_v59, %v2711_v25  ;;  %v2516_v11 = vld [vmem:[#allocation2 + $0x180] sm:$0xff]  ;;  %2449 = vst.msk [vmem:[#allocation2 + $0x380] sm:$0xff] %vm313_vm3, %v2320_v42  ;;  %v2018_v48 = vpop.f32.mrf.mxu1 }
 0x238   : > { %v2648_v50 = vmul.f32 %v5506_v23, %v2516_v11  ;;  %2386 = vst.msk [vmem:[#allocation2 + $0x188] sm:$0xff] %vm313_vm3, %v2257_v44  ;;  %v1841_v36 = vpop.f32.mrf.mxu2 }
 0x239   : > { %v1684_v56 = vpop.f32.mrf.mxu0  ;;  %v2971_v57 = vmax.f32 %v2843_v47, 0.0  ;;  %v2171_v26 = vadd.f32 %v2170_v27, %v1841_v36  ;;  %v558_v36 = vld [vmem:[#allocation2 + $0x3a0] sm:$0xff] }
 0x23a   : > { %v2014_v45 = vadd.f32 %v2013_v4, %v1684_v56  ;;  %v2780_v38 = vadd.f32 %v5518_v59, %v2648_v50  ;;  %v2175_v34 = vpop.f32.mrf.mxu3 }
 0x23b   : > { %v3099_v43 = vpack.c.bf16 %v2971_v57, %v2971_v57  ;;  %v2321_v49 = vadd.f32 %v2171_v26, %v555_v54 }
 0x23c   : > { %v2258_v60 = vadd.f32 %v2014_v45, %v492_v55  ;;  %v2908_v61 = vmax.f32 %v2780_v38, 0.0  ;;  %v495_v45 = vld [vmem:[#allocation2 + $0x1a8] sm:$0xff] }
 0x23d   : > { %3228 = vst.msk [vmem:[%s4500_s29 + $0x1bc] sm:$0xf] %vm3116_vm4, %v3099_v43 }
 0x23e   : > { %v3036_v63 = vpack.c.bf16 %v2908_v61, %v2908_v61  ;;  %v2580_v53 = vld [vmem:[#allocation2 + $0x380] sm:$0xff]  ;;  %2450 = vst.msk [vmem:[#allocation2 + $0x388] sm:$0xff] %vm313_vm3, %v2321_v49 }
 0x23f   : > { %v2712_v52 = vmul.f32 %v5506_v23, %v2580_v53  ;;  %v2517_v1 = vld [vmem:[#allocation2 + $0x188] sm:$0xff]  ;;  %2387 = vst.msk [vmem:[#allocation2 + $0x190] sm:$0xff] %vm313_vm3, %v2258_v60  ;;  %v2020_v28 = vpop.f32.mrf.mxu1 }
 0x240   : > { %3165 = vst.msk [vmem:[%s4500_s29 + $0xc0] sm:$0xf] %vm3116_vm4, %v3036_v63  ;;  %v2649_v4 = vmul.f32 %v5506_v23, %v2517_v1  ;;  %v1844_v58 = vpop.f32.mrf.mxu2 }
 0x241   : > { %v1686_v7 = vpop.f32.mrf.mxu0  ;;  %v2844_v29 = vadd.f32 %v5518_v59, %v2712_v52  ;;  %v2174_v9 = vadd.f32 %v2173_v33, %v1844_v58  ;;  %v559_v58 = vld [vmem:[#allocation2 + $0x3a8] sm:$0xff] }
 0x242   : > { %v2016_v13 = vadd.f32 %v2015_v37, %v1686_v7  ;;  %v2781_v15 = vadd.f32 %v5518_v59, %v2649_v4  ;;  %v2178_v22 = vpop.f32.mrf.mxu3  ;;  %v496_v7 = vld [vmem:[#allocation2 + $0x1b0] sm:$0xff] }
 0x243   : > { %v2972_v3 = vmax.f32 %v2844_v29, 0.0  ;;  %v2322_v16 = vadd.f32 %v2174_v9, %v556_v5 }
 0x244   : > { %v2259_v2 = vadd.f32 %v2016_v13, %v493_v46  ;;  %v2909_v0 = vmax.f32 %v2781_v15, 0.0 }
 0x245   : > { %v3100_v6 = vpack.c.bf16 %v2972_v3, %v2972_v3  ;;  %v2581_v24 = vld [vmem:[#allocation2 + $0x388] sm:$0xff]  ;;  %2451 = vst.msk [vmem:[#allocation2 + $0x390] sm:$0xff] %vm313_vm3, %v2322_v16 }
 0x246   : > { %v3037_v51 = vpack.c.bf16 %v2909_v0, %v2909_v0  ;;  %v2713_v19 = vmul.f32 %v5506_v23, %v2581_v24  ;;  %v2518_v27 = vld [vmem:[#allocation2 + $0x190] sm:$0xff]  ;;  %2388 = vst.msk [vmem:[#allocation2 + $0x198] sm:$0xff] %vm313_vm3, %v2259_v2 }
 0x247   : > { %3229 = vst.msk [vmem:[%s4500_s29 + $0x1c0] sm:$0xf] %vm3116_vm4, %v3100_v6  ;;  %v2650_v10 = vmul.f32 %v5506_v23, %v2518_v27  ;;  %v2023_v8 = vpop.f32.mrf.mxu1 }
 0x248   : > { %3166 = vst.msk [vmem:[%s4500_s29 + $0xc4] sm:$0xf] %vm3116_vm4, %v3037_v51  ;;  %v2845_v37 = vadd.f32 %v5518_v59, %v2713_v19  ;;  %v1846_v31 = vpop.f32.mrf.mxu2 }
 0x249   : > { %v1689_v32 = vpop.f32.mrf.mxu0  ;;  %v2782_v18 = vadd.f32 %v5518_v59, %v2650_v10  ;;  %v2176_v35 = vadd.f32 %v2175_v34, %v1846_v31  ;;  %v497_v31 = vld [vmem:[#allocation2 + $0x1b8] sm:$0xff] }
 0x24a   : > { %v2019_v17 = vadd.f32 %v2018_v48, %v1689_v32  ;;  %v2973_v39 = vmax.f32 %v2845_v37, 0.0  ;;  %v2180_v47 = vpop.f32.mrf.mxu3  ;;  %v560_v37 = vld [vmem:[#allocation2 + $0x3b0] sm:$0xff] }
 0x24b   : > { %v2910_v40 = vmax.f32 %v2782_v18, 0.0  ;;  %v2323_v41 = vadd.f32 %v2176_v35, %v557_v30 }
 0x24c   : > { %v3101_v42 = vpack.c.bf16 %v2973_v39, %v2973_v39  ;;  %v2582_v14 = vld [vmem:[#allocation2 + $0x390] sm:$0xff]  ;;  %v2260_v62 = vadd.f32 %v2019_v17, %v494_v21 }
 0x24d   : > { %v3038_v44 = vpack.c.bf16 %v2910_v40, %v2910_v40  ;;  %v2714_v25 = vmul.f32 %v5506_v23, %v2582_v14  ;;  %v2519_v33 = vld [vmem:[#allocation2 + $0x198] sm:$0xff]  ;;  %2452 = vst.msk [vmem:[#allocation2 + $0x398] sm:$0xff] %vm313_vm3, %v2323_v41 }
 0x24e   : > { %3230 = vst.msk [vmem:[%s4500_s29 + $0x1c4] sm:$0xf] %vm3116_vm4, %v3101_v42  ;;  %v2651_v11 = vmul.f32 %v5506_v23, %v2519_v33 }
 0x24f   : > { %3167 = vst.msk [vmem:[%s4500_s29 + $0xc8] sm:$0xf] %vm3116_vm4, %v3038_v44  ;;  %v2846_v48 = vadd.f32 %v5518_v59, %v2714_v25  ;;  %v2025_v50 = vpop.f32.mrf.mxu1 }
 0x250   : > { %v2783_v54 = vadd.f32 %v5518_v59, %v2651_v11  ;;  %2389 = vst.msk [vmem:[#allocation2 + $0x1a0] sm:$0xff] %vm313_vm3, %v2260_v62  ;;  %v1849_v55 = vpop.f32.mrf.mxu2 }
 0x251   : > { %v1691_v56 = vpop.f32.mrf.mxu0  ;;  %v2974_v57 = vmax.f32 %v2846_v48, 0.0  ;;  %v2179_v26 = vadd.f32 %v2178_v22, %v1849_v55 }
 0x252   : > { %v2021_v38 = vadd.f32 %v2020_v28, %v1691_v56  ;;  %v2911_v43 = vmax.f32 %v2783_v54, 0.0  ;;  %v2183_v52 = vpop.f32.mrf.mxu3  ;;  %v561_v54 = vld [vmem:[#allocation2 + $0x3b8] sm:$0xff] }
 0x253   : > { %v3102_v49 = vpack.c.bf16 %v2974_v57, %v2974_v57  ;;  %v2324_v60 = vadd.f32 %v2179_v26, %v558_v36  ;;  %v498_v26 = vld [vmem:[#allocation2 + $0x1c0] sm:$0xff] }
 0x254   : > { %v3039_v61 = vpack.c.bf16 %v2911_v43, %v2911_v43  ;;  %v2583_v34 = vld [vmem:[#allocation2 + $0x398] sm:$0xff]  ;;  %v2261_v63 = vadd.f32 %v2021_v38, %v495_v45 }
 0x255   : > { %3231 = vst.msk [vmem:[%s4500_s29 + $0x1c8] sm:$0xf] %vm3116_vm4, %v3102_v49  ;;  %v2715_v53 = vmul.f32 %v5506_v23, %v2583_v34 }
 0x256   : > { %3168 = vst.msk [vmem:[%s4500_s29 + $0xcc] sm:$0xf] %vm3116_vm4, %v3039_v61 }
 0x257   : > { %v2847_v1 = vadd.f32 %v5518_v59, %v2715_v53  ;;  %v2520_v4 = vld [vmem:[#allocation2 + $0x1a0] sm:$0xff]  ;;  %2453 = vst.msk [vmem:[#allocation2 + $0x3a0] sm:$0xff] %vm313_vm3, %v2324_v60  ;;  %v2028_v28 = vpop.f32.mrf.mxu1 }
 0x258   : > { %v2652_v5 = vmul.f32 %v5506_v23, %v2520_v4  ;;  %2390 = vst.msk [vmem:[#allocation2 + $0x1a8] sm:$0xff] %vm313_vm3, %v2261_v63  ;;  %v1851_v46 = vpop.f32.mrf.mxu2 }
 0x259   : > { %v1694_v29 = vpop.f32.mrf.mxu0  ;;  %v2975_v9 = vmax.f32 %v2847_v1, 0.0  ;;  %v2181_v13 = vadd.f32 %v2180_v47, %v1851_v46  ;;  %v562_v46 = vld [vmem:[#allocation2 + $0x3c0] sm:$0xff] }
 0x25a   : > { %v2024_v15 = vadd.f32 %v2023_v8, %v1694_v29  ;;  %v2784_v3 = vadd.f32 %v5518_v59, %v2652_v5  ;;  %v2185_v24 = vpop.f32.mrf.mxu3 }
 0x25b   : > { %v3103_v16 = vpack.c.bf16 %v2975_v9, %v2975_v9  ;;  %v2325_v2 = vadd.f32 %v2181_v13, %v559_v58 }
 0x25c   : > { %v2262_v0 = vadd.f32 %v2024_v15, %v496_v7  ;;  %v2912_v6 = vmax.f32 %v2784_v3, 0.0  ;;  %v499_v15 = vld [vmem:[#allocation2 + $0x1c8] sm:$0xff] }
 0x25d   : > { %3232 = vst.msk [vmem:[%s4500_s29 + $0x1cc] sm:$0xf] %vm3116_vm4, %v3103_v16 }
 0x25e   : > { %v3040_v22 = vpack.c.bf16 %v2912_v6, %v2912_v6  ;;  %v2584_v51 = vld [vmem:[#allocation2 + $0x3a0] sm:$0xff]  ;;  %2454 = vst.msk [vmem:[#allocation2 + $0x3a8] sm:$0xff] %vm313_vm3, %v2325_v2 }
 0x25f   : > { %v2716_v19 = vmul.f32 %v5506_v23, %v2584_v51  ;;  %v2521_v27 = vld [vmem:[#allocation2 + $0x1a8] sm:$0xff]  ;;  %2391 = vst.msk [vmem:[#allocation2 + $0x1b0] sm:$0xff] %vm313_vm3, %v2262_v0  ;;  %v2030_v10 = vpop.f32.mrf.mxu1 }
 0x260   : > { %3169 = vst.msk [vmem:[%s4500_s29 + $0xd0] sm:$0xf] %vm3116_vm4, %v3040_v22  ;;  %v2653_v8 = vmul.f32 %v5506_v23, %v2521_v27  ;;  %v1854_v30 = vpop.f32.mrf.mxu2 }
 0x261   : > { %v1696_v32 = vpop.f32.mrf.mxu0  ;;  %v2848_v18 = vadd.f32 %v5518_v59, %v2716_v19  ;;  %v2184_v35 = vadd.f32 %v2183_v52, %v1854_v30  ;;  %v563_v30 = vld [vmem:[#allocation2 + $0x3c8] sm:$0xff] }
 0x262   : > { %v2026_v21 = vadd.f32 %v2025_v50, %v1696_v32  ;;  %v2785_v17 = vadd.f32 %v5518_v59, %v2653_v8  ;;  %v2188_v44 = vpop.f32.mrf.mxu3  ;;  %v500_v32 = vld [vmem:[#allocation2 + $0x1d0] sm:$0xff] }
 0x263   : > { %v2976_v39 = vmax.f32 %v2848_v18, 0.0  ;;  %v2326_v40 = vadd.f32 %v2184_v35, %v560_v37 }
 0x264   : > { %v2263_v41 = vadd.f32 %v2026_v21, %v497_v31  ;;  %v2913_v42 = vmax.f32 %v2785_v17, 0.0 }
 0x265   : > { %v3104_v14 = vpack.c.bf16 %v2976_v39, %v2976_v39  ;;  %v2585_v62 = vld [vmem:[#allocation2 + $0x3a8] sm:$0xff]  ;;  %2455 = vst.msk [vmem:[#allocation2 + $0x3b0] sm:$0xff] %vm313_vm3, %v2326_v40 }
 0x266   : > { %v3041_v25 = vpack.c.bf16 %v2913_v42, %v2913_v42  ;;  %v2717_v33 = vmul.f32 %v5506_v23, %v2585_v62  ;;  %v2522_v47 = vld [vmem:[#allocation2 + $0x1b0] sm:$0xff]  ;;  %2392 = vst.msk [vmem:[#allocation2 + $0x1b8] sm:$0xff] %vm313_vm3, %v2263_v41 }
 0x267   : > { %3233 = vst.msk [vmem:[%s4500_s29 + $0x1d0] sm:$0xf] %vm3116_vm4, %v3104_v14  ;;  %v2654_v11 = vmul.f32 %v5506_v23, %v2522_v47  ;;  %v2033_v48 = vpop.f32.mrf.mxu1 }
 0x268   : > { %3170 = vst.msk [vmem:[%s4500_s29 + $0xd4] sm:$0xf] %vm3116_vm4, %v3041_v25  ;;  %v2849_v50 = vadd.f32 %v5518_v59, %v2717_v33  ;;  %v1856_v36 = vpop.f32.mrf.mxu2 }
 0x269   : > { %v1699_v55 = vpop.f32.mrf.mxu0  ;;  %v2786_v56 = vadd.f32 %v5518_v59, %v2654_v11  ;;  %v2186_v57 = vadd.f32 %v2185_v24, %v1856_v36  ;;  %v501_v36 = vld [vmem:[#allocation2 + $0x1d8] sm:$0xff] }
 0x26a   : > { %v2029_v45 = vadd.f32 %v2028_v28, %v1699_v55  ;;  %v2977_v38 = vmax.f32 %v2849_v50, 0.0  ;;  %v2190_v1 = vpop.f32.mrf.mxu3  ;;  %v564_v50 = vld [vmem:[#allocation2 + $0x3d0] sm:$0xff] }
 0x26b   : > { %v2914_v43 = vmax.f32 %v2786_v56, 0.0  ;;  %v2327_v49 = vadd.f32 %v2186_v57, %v561_v54 }
 0x26c   : > { %v3105_v60 = vpack.c.bf16 %v2977_v38, %v2977_v38  ;;  %v2586_v61 = vld [vmem:[#allocation2 + $0x3b0] sm:$0xff]  ;;  %v2264_v34 = vadd.f32 %v2029_v45, %v498_v26 }
 0x26d   : > { %v3042_v63 = vpack.c.bf16 %v2914_v43, %v2914_v43  ;;  %v2718_v53 = vmul.f32 %v5506_v23, %v2586_v61  ;;  %v2523_v52 = vld [vmem:[#allocation2 + $0x1b8] sm:$0xff]  ;;  %2456 = vst.msk [vmem:[#allocation2 + $0x3b8] sm:$0xff] %vm313_vm3, %v2327_v49 }
 0x26e   : > { %3234 = vst.msk [vmem:[%s4500_s29 + $0x1d4] sm:$0xf] %vm3116_vm4, %v3105_v60  ;;  %v2655_v4 = vmul.f32 %v5506_v23, %v2523_v52 }
 0x26f   : > { %3171 = vst.msk [vmem:[%s4500_s29 + $0xd8] sm:$0xf] %vm3116_vm4, %v3042_v63  ;;  %v2850_v28 = vadd.f32 %v5518_v59, %v2718_v53  ;;  %v2035_v5 = vpop.f32.mrf.mxu1 }
 0x270   : > { %v2787_v58 = vadd.f32 %v5518_v59, %v2655_v4  ;;  %2393 = vst.msk [vmem:[#allocation2 + $0x1c0] sm:$0xff] %vm313_vm3, %v2264_v34  ;;  %v1859_v7 = vpop.f32.mrf.mxu2 }
 0x271   : > { %v1701_v29 = vpop.f32.mrf.mxu0  ;;  %v2978_v9 = vmax.f32 %v2850_v28, 0.0  ;;  %v2189_v13 = vadd.f32 %v2188_v44, %v1859_v7 }
 0x272   : > { %v2031_v3 = vadd.f32 %v2030_v10, %v1701_v29  ;;  %v2915_v16 = vmax.f32 %v2787_v58, 0.0  ;;  %v2193_v19 = vpop.f32.mrf.mxu3 }
 0x273   : > { %v3106_v2 = vpack.c.bf16 %v2978_v9, %v2978_v9  ;;  %v2328_v0 = vadd.f32 %v2189_v13, %v562_v46  ;;  %v502_v9 = vld [vmem:[#allocation2 + $0x1e0] sm:$0xff] }
 0x274   : > { %v3043_v6 = vpack.c.bf16 %v2915_v16, %v2915_v16  ;;  %v2587_v24 = vld [vmem:[#allocation2 + $0x3b8] sm:$0xff]  ;;  %v2265_v22 = vadd.f32 %v2031_v3, %v499_v15 }
 0x275   : > { %3235 = vst.msk [vmem:[%s4500_s29 + $0x1d8] sm:$0xf] %vm3116_vm4, %v3106_v2  ;;  %v2719_v51 = vmul.f32 %v5506_v23, %v2587_v24 }
 0x276   : > { %3172 = vst.msk [vmem:[%s4500_s29 + $0xdc] sm:$0xf] %vm3116_vm4, %v3043_v6 }
 0x277   : > { %v2851_v27 = vadd.f32 %v5518_v59, %v2719_v51  ;;  %v2524_v8 = vld [vmem:[#allocation2 + $0x1c0] sm:$0xff]  ;;  %2457 = vst.msk [vmem:[#allocation2 + $0x3c0] sm:$0xff] %vm313_vm3, %v2328_v0  ;;  %v2038_v10 = vpop.f32.mrf.mxu1 }
 0x278   : > { %v2656_v37 = vmul.f32 %v5506_v23, %v2524_v8  ;;  %2394 = vst.msk [vmem:[#allocation2 + $0x1c8] sm:$0xff] %vm313_vm3, %v2265_v22  ;;  %v1861_v31 = vpop.f32.mrf.mxu2 }
 0x279   : > { %v1704_v18 = vpop.f32.mrf.mxu0  ;;  %v2979_v35 = vmax.f32 %v2851_v27, 0.0  ;;  %v2191_v21 = vadd.f32 %v2190_v1, %v1861_v31 }
 0x27a   : > { %v2034_v17 = vadd.f32 %v2033_v48, %v1704_v18  ;;  %v2788_v39 = vadd.f32 %v5518_v59, %v2656_v37  ;;  %v2195_v11 = vpop.f32.mrf.mxu3 }
 0x27b   : > { %v3107_v40 = vpack.c.bf16 %v2979_v35, %v2979_v35  ;;  %v2329_v41 = vadd.f32 %v2191_v21, %v563_v30  ;;  %v566_v30 = vld [vmem:[#allocation2 + $0x3e0] sm:$0xff]  ;;  %v503_v21 = vld [vmem:[#allocation2 + $0x1e8] sm:$0xff] }
 0x27c   : > { %v2266_v42 = vadd.f32 %v2034_v17, %v500_v32  ;;  %v2916_v14 = vmax.f32 %v2788_v39, 0.0 }
 0x27d   : > { %3236 = vst.msk [vmem:[%s4500_s29 + $0x1dc] sm:$0xf] %vm3116_vm4, %v3107_v40 }
 0x27e   : > { %v3044_v62 = vpack.c.bf16 %v2916_v14, %v2916_v14  ;;  %v2588_v44 = vld [vmem:[#allocation2 + $0x3c0] sm:$0xff]  ;;  %2458 = vst.msk [vmem:[#allocation2 + $0x3c8] sm:$0xff] %vm313_vm3, %v2329_v41 }
 0x27f   : > { %v2720_v25 = vmul.f32 %v5506_v23, %v2588_v44  ;;  %v2525_v33 = vld [vmem:[#allocation2 + $0x1c8] sm:$0xff]  ;;  %2395 = vst.msk [vmem:[#allocation2 + $0x1d0] sm:$0xff] %vm313_vm3, %v2266_v42  ;;  %v2040_v47 = vpop.f32.mrf.mxu1 }
 0x280   : > { %3173 = vst.msk [vmem:[%s4500_s29 + $0xe0] sm:$0xf] %vm3116_vm4, %v3044_v62  ;;  %v2657_v48 = vmul.f32 %v5506_v23, %v2525_v33  ;;  %v1864_v54 = vpop.f32.mrf.mxu2 }
 0x281   : > { %v1706_v55 = vpop.f32.mrf.mxu0  ;;  %v2852_v56 = vadd.f32 %v5518_v59, %v2720_v25  ;;  %v2194_v57 = vadd.f32 %v2193_v19, %v1864_v54 }
 0x282   : > { %v2036_v26 = vadd.f32 %v2035_v5, %v1706_v55  ;;  %v2789_v45 = vadd.f32 %v5518_v59, %v2657_v48  ;;  %v565_v5 = vld [vmem:[#allocation2 + $0x3d8] sm:$0xff]  ;;  %v2198_v3 = vpop.f32.mrf.mxu3  ;;  %v506_v48 = vld [vmem:[#allocation2 + $0x200] sm:$0xff] }
 0x283   : > { %v2980_v38 = vmax.f32 %v2852_v56, 0.0  ;;  %v2330_v43 = vadd.f32 %v2194_v57, %v564_v50  ;;  %v504_v56 = vld [vmem:[#allocation2 + $0x1f0] sm:$0xff] }
 0x284   : > { %v2267_v49 = vadd.f32 %v2036_v26, %v501_v36  ;;  %v2917_v60 = vmax.f32 %v2789_v45, 0.0  ;;  %v567_v36 = vld [vmem:[#allocation2 + $0x3e8] sm:$0xff] }
 0x285   : > { %v3108_v61 = vpack.c.bf16 %v2980_v38, %v2980_v38  ;;  %v2589_v34 = vld [vmem:[#allocation2 + $0x3c8] sm:$0xff]  ;;  %2459 = vst.msk [vmem:[#allocation2 + $0x3d0] sm:$0xff] %vm313_vm3, %v2330_v43 }
 0x286   : > { %v3045_v63 = vpack.c.bf16 %v2917_v60, %v2917_v60  ;;  %v2721_v53 = vmul.f32 %v5506_v23, %v2589_v34  ;;  %v2526_v52 = vld [vmem:[#allocation2 + $0x1d0] sm:$0xff]  ;;  %2396 = vst.msk [vmem:[#allocation2 + $0x1d8] sm:$0xff] %vm313_vm3, %v2267_v49 }
 0x287   : > { %3237 = vst.msk [vmem:[%s4500_s29 + $0x1e0] sm:$0xf] %vm3116_vm4, %v3108_v61  ;;  %v2658_v1 = vmul.f32 %v5506_v23, %v2526_v52  ;;  %v2043_v4 = vpop.f32.mrf.mxu1 }
 0x288   : > { %3174 = vst.msk [vmem:[%s4500_s29 + $0xe4] sm:$0xf] %vm3116_vm4, %v3045_v63  ;;  %v2853_v28 = vadd.f32 %v5518_v59, %v2721_v53  ;;  %v1866_v58 = vpop.f32.mrf.mxu2 }
 0x289   : > { %v1709_v46 = vpop.f32.mrf.mxu0  ;;  %v2790_v7 = vadd.f32 %v5518_v59, %v2658_v1  ;;  %v2196_v29 = vadd.f32 %v2195_v11, %v1866_v58 }
 0x28a   : > { %v2039_v13 = vadd.f32 %v2038_v10, %v1709_v46  ;;  %v2981_v15 = vmax.f32 %v2853_v28, 0.0  ;;  %v2200_v62 = vpop.f32.mrf.mxu3  ;;  %v507_v28 = vld [vmem:[#allocation2 + $0x208] sm:$0xff] }
 0x28b   : > { %v2918_v16 = vmax.f32 %v2790_v7, 0.0  ;;  %v2331_v2 = vadd.f32 %v2196_v29, %v565_v5  ;;  %v568_v7 = vld [vmem:[#allocation2 + $0x3f0] sm:$0xff] }
 0x28c   : > { %v3109_v0 = vpack.c.bf16 %v2981_v15, %v2981_v15  ;;  %v2590_v6 = vld [vmem:[#allocation2 + $0x3d0] sm:$0xff]  ;;  %v2268_v24 = vadd.f32 %v2039_v13, %v502_v9  ;;  %v505_v9 = vld [vmem:[#allocation2 + $0x1f8] sm:$0xff] }
 0x28d   : > { %v3046_v22 = vpack.c.bf16 %v2918_v16, %v2918_v16  ;;  %v2722_v51 = vmul.f32 %v5506_v23, %v2590_v6  ;;  %v2527_v19 = vld [vmem:[#allocation2 + $0x1d8] sm:$0xff]  ;;  %2460 = vst.msk [vmem:[#allocation2 + $0x3d8] sm:$0xff] %vm313_vm3, %v2331_v2 }
 0x28e   : > { %3238 = vst.msk [vmem:[%s4500_s29 + $0x1e4] sm:$0xf] %vm3116_vm4, %v3109_v0  ;;  %v2659_v27 = vmul.f32 %v5506_v23, %v2527_v19 }
 0x28f   : > { %3175 = vst.msk [vmem:[%s4500_s29 + $0xe8] sm:$0xf] %vm3116_vm4, %v3046_v22  ;;  %v2854_v8 = vadd.f32 %v5518_v59, %v2722_v51  ;;  %v2045_v10 = vpop.f32.mrf.mxu1 }
 0x290   : > { %v2791_v37 = vadd.f32 %v5518_v59, %v2659_v27  ;;  %2397 = vst.msk [vmem:[#allocation2 + $0x1e0] sm:$0xff] %vm313_vm3, %v2268_v24  ;;  %v1869_v31 = vpop.f32.mrf.mxu2 }
 0x291   : > { %v1711_v32 = vpop.f32.mrf.mxu0  ;;  %v2982_v18 = vmax.f32 %v2854_v8, 0.0  ;;  %v2199_v35 = vadd.f32 %v2198_v3, %v1869_v31 }
 0x292   : > { %v2041_v17 = vadd.f32 %v2040_v47, %v1711_v32  ;;  %v2919_v39 = vmax.f32 %v2791_v37, 0.0  ;;  %v2203_v52 = vpop.f32.mrf.mxu3 }
 0x293   : > { %v3110_v40 = vpack.c.bf16 %v2982_v18, %v2982_v18  ;;  %v2332_v41 = vadd.f32 %v2199_v35, %v566_v30 }
 0x294   : > { %v3047_v42 = vpack.c.bf16 %v2919_v39, %v2919_v39  ;;  %v2591_v14 = vld [vmem:[#allocation2 + $0x3d8] sm:$0xff]  ;;  %v2269_v44 = vadd.f32 %v2041_v17, %v503_v21 }
 0x295   : > { %3239 = vst.msk [vmem:[%s4500_s29 + $0x1e8] sm:$0xf] %vm3116_vm4, %v3110_v40  ;;  %v2723_v25 = vmul.f32 %v5506_v23, %v2591_v14  ;;  %v569_v17 = vld [vmem:[#allocation2 + $0x3f8] sm:$0xff] }
 0x296   : > { %3176 = vst.msk [vmem:[%s4500_s29 + $0xec] sm:$0xf] %vm3116_vm4, %v3047_v42 }
 0x297   : > { %v2855_v33 = vadd.f32 %v5518_v59, %v2723_v25  ;;  %v2528_v11 = vld [vmem:[#allocation2 + $0x1e0] sm:$0xff]  ;;  %2461 = vst.msk [vmem:[#allocation2 + $0x3e0] sm:$0xff] %vm313_vm3, %v2332_v41  ;;  %v2048_v47 = vpop.f32.mrf.mxu1 }
 0x298   : > { %v2660_v50 = vmul.f32 %v5506_v23, %v2528_v11  ;;  %2398 = vst.msk [vmem:[#allocation2 + $0x1e8] sm:$0xff] %vm313_vm3, %v2269_v44  ;;  %v2049_v54 = vadd.f32 %v2048_v47, %v4580_v12  ;;  %v1871_v55 = vpop.f32.mrf.mxu2 }
 0x299   : > { %v1714_v57 = vpop.f32.mrf.mxu0  ;;  %v2983_v26 = vmax.f32 %v2855_v33, 0.0  ;;  %v2201_v45 = vadd.f32 %v2200_v62, %v1871_v55 }
 0x29a   : > { %v2044_v38 = vadd.f32 %v2043_v4, %v1714_v57  ;;  %v2792_v43 = vadd.f32 %v5518_v59, %v2660_v50  ;;  %v2272_v49 = vadd.f32 %v2049_v54, %v506_v48  ;;  %v2205_v21 = vpop.f32.mrf.mxu3 }
 0x29b   : > { %v3111_v60 = vpack.c.bf16 %v2983_v26, %v2983_v26  ;;  %v2333_v61 = vadd.f32 %v2201_v45, %v567_v36 }
 0x29c   : > { %v2270_v34 = vadd.f32 %v2044_v38, %v504_v56  ;;  %v2920_v63 = vmax.f32 %v2792_v43, 0.0  ;;  %2401 = vst.msk [vmem:[#allocation2 + $0x200] sm:$0xff] %vm313_vm3, %v2272_v49 }
 0x29d   : > { %3240 = vst.msk [vmem:[%s4500_s29 + $0x1ec] sm:$0xf] %vm3116_vm4, %v3111_v60 }
 0x29e   : > { %v3048_v12 = vpack.c.bf16 %v2920_v63, %v2920_v63  ;;  %v2592_v53 = vld [vmem:[#allocation2 + $0x3e0] sm:$0xff]  ;;  %2462 = vst.msk [vmem:[#allocation2 + $0x3e8] sm:$0xff] %vm313_vm3, %v2333_v61 }
 0x29f   : > { %v2724_v1 = vmul.f32 %v5506_v23, %v2592_v53  ;;  %v2529_v4 = vld [vmem:[#allocation2 + $0x1e8] sm:$0xff]  ;;  %2399 = vst.msk [vmem:[#allocation2 + $0x1f0] sm:$0xff] %vm313_vm3, %v2270_v34  ;;  %v2050_v5 = vpop.f32.mrf.mxu1 }
 0x2a0   : > { %3177 = vst.msk [vmem:[%s4500_s29 + $0xf0] sm:$0xf] %vm3116_vm4, %v3048_v12  ;;  %v2661_v58 = vmul.f32 %v5506_v23, %v2529_v4  ;;  %v2051_v46 = vadd.f32 %v2050_v5, %v4611_v20  ;;  %v1874_v29 = vpop.f32.mrf.mxu2 }
 0x2a1   : > { %v1716_v13 = vpop.f32.mrf.mxu0  ;;  %v2856_v15 = vadd.f32 %v5518_v59, %v2724_v1  ;;  %v2204_v3 = vadd.f32 %v2203_v52, %v1874_v29 }
 0x2a2   : > { %v2046_v16 = vadd.f32 %v2045_v10, %v1716_v13  ;;  %v2793_v2 = vadd.f32 %v5518_v59, %v2661_v58  ;;  %v2273_v0 = vadd.f32 %v2051_v46, %v507_v28 }
 0x2a3   : > { %v2984_v6 = vmax.f32 %v2856_v15, 0.0  ;;  %v2532_v24 = vld [vmem:[#allocation2 + $0x200] sm:$0xff]  ;;  %v2334_v22 = vadd.f32 %v2204_v3, %v568_v7 }
 0x2a4   : > { %v2271_v51 = vadd.f32 %v2046_v16, %v505_v9  ;;  %v2921_v19 = vmax.f32 %v2793_v2, 0.0  ;;  %v2664_v20 = vmul.f32 %v5506_v23, %v2532_v24  ;;  %2402 = vst.msk [vmem:[#allocation2 + $0x208] sm:$0xff] %vm313_vm3, %v2273_v0 }
 0x2a5   : > { %v3112_v27 = vpack.c.bf16 %v2984_v6, %v2984_v6  ;;  %v2593_v8 = vld [vmem:[#allocation2 + $0x3e8] sm:$0xff]  ;;  %2463 = vst.msk [vmem:[#allocation2 + $0x3f0] sm:$0xff] %vm313_vm3, %v2334_v22 }
 0x2a6   : > { %v3049_v37 = vpack.c.bf16 %v2921_v19, %v2921_v19  ;;  %v2796_v10 = vadd.f32 %v5518_v59, %v2664_v20  ;;  %v2725_v30 = vmul.f32 %v5506_v23, %v2593_v8  ;;  %v2530_v31 = vld [vmem:[#allocation2 + $0x1f0] sm:$0xff]  ;;  %2400 = vst.msk [vmem:[#allocation2 + $0x1f8] sm:$0xff] %vm313_vm3, %v2271_v51 }
 0x2a7   : > { %3241 = vst.msk [vmem:[%s4500_s29 + $0x1f0] sm:$0xf] %vm3116_vm4, %v3112_v27  ;;  %v2662_v32 = vmul.f32 %v5506_v23, %v2530_v31 }
 0x2a8   : > { %3178 = vst.msk [vmem:[%s4500_s29 + $0xf4] sm:$0xf] %vm3116_vm4, %v3049_v37  ;;  %v2924_v18 = vmax.f32 %v2796_v10, 0.0  ;;  %v2857_v35 = vadd.f32 %v5518_v59, %v2725_v30  ;;  %v1876_v39 = vpop.f32.mrf.mxu2 }
 0x2a9   : > { %v2794_v40 = vadd.f32 %v5518_v59, %v2662_v32  ;;  %v2206_v41 = vadd.f32 %v2205_v21, %v1876_v39 }
 0x2aa   : > { %v3052_v42 = vpack.c.bf16 %v2924_v18, %v2924_v18  ;;  %v2985_v14 = vmax.f32 %v2857_v35, 0.0 }
 0x2ab   : > { %v2922_v62 = vmax.f32 %v2794_v40, 0.0  ;;  %v2533_v44 = vld [vmem:[#allocation2 + $0x208] sm:$0xff]  ;;  %v2335_v25 = vadd.f32 %v2206_v41, %v569_v17 }
 0x2ac   : > { %3181 = vst.msk [vmem:[%s4500_s29 + $0x100] sm:$0xf] %vm3116_vm4, %v3052_v42  ;;  %v3113_v33 = vpack.c.bf16 %v2985_v14, %v2985_v14  ;;  %v2665_v11 = vmul.f32 %v5506_v23, %v2533_v44  ;;  %v2594_v48 = vld [vmem:[#allocation2 + $0x3f0] sm:$0xff] }
 0x2ad   : > { %v3050_v47 = vpack.c.bf16 %v2922_v62, %v2922_v62  ;;  %v2726_v50 = vmul.f32 %v5506_v23, %v2594_v48  ;;  %v2531_v54 = vld [vmem:[#allocation2 + $0x1f8] sm:$0xff]  ;;  %2464 = vst.msk [vmem:[#allocation2 + $0x3f8] sm:$0xff] %vm313_vm3, %v2335_v25 }
 0x2ae   : > { %3242 = vst.msk [vmem:[%s4500_s29 + $0x1f4] sm:$0xf] %vm3116_vm4, %v3113_v33  ;;  %v2797_v36 = vadd.f32 %v5518_v59, %v2665_v11  ;;  %v2663_v55 = vmul.f32 %v5506_v23, %v2531_v54 }
 0x2af   : > { %3179 = vst.msk [vmem:[%s4500_s29 + $0xf8] sm:$0xf] %vm3116_vm4, %v3050_v47  ;;  %v2858_v56 = vadd.f32 %v5518_v59, %v2726_v50 }
 0x2b0   : > { %v2925_v57 = vmax.f32 %v2797_v36, 0.0  ;;  %v2795_v26 = vadd.f32 %v5518_v59, %v2663_v55 }
 0x2b1   : > { %v2986_v45 = vmax.f32 %v2858_v56, 0.0 }
 0x2b2   : > { %v3053_v38 = vpack.c.bf16 %v2925_v57, %v2925_v57  ;;  %v2923_v43 = vmax.f32 %v2795_v26, 0.0 }
 0x2b3   : > { %v3114_v49 = vpack.c.bf16 %v2986_v45, %v2986_v45 }
 0x2b4   : > { %3182 = vst.msk [vmem:[%s4500_s29 + $0x104] sm:$0xf] %vm3116_vm4, %v3053_v38  ;;  %v3051_v60 = vpack.c.bf16 %v2923_v43, %v2923_v43  ;;  %v2595_v61 = vld [vmem:[#allocation2 + $0x3f8] sm:$0xff] }
 0x2b5   : > { %3243 = vst.msk [vmem:[%s4500_s29 + $0x1f8] sm:$0xf] %vm3116_vm4, %v3114_v49  ;;  %v2727_v34 = vmul.f32 %v5506_v23, %v2595_v61 }
 0x2b6   : > { %3180 = vst.msk [vmem:[%s4500_s29 + $0xfc] sm:$0xf] %vm3116_vm4, %v3051_v60 }
 0x2b7   : > { %v2859_v63 = vadd.f32 %v5518_v59, %v2727_v34 }
 0x2b9   : > { %v2987_v12 = vmax.f32 %v2859_v63, 0.0 }
 0x2bb   : > { %v3115_v53 = vpack.c.bf16 %v2987_v12, %v2987_v12 }
 0x2bd   : > { %3244 = vst.msk [vmem:[%s4500_s29 + $0x1fc] sm:$0xf] %vm3116_vm4, %v3115_v53 }
 0x2be PF: > { %s14_s17 = sadd.s32 1, %s4202_s17   ;;  %s5716_s15 = smov %s4198_s16 }
 0x2bf   : > { %p11_p5 = scmp.ge.s32.totalorder %s14_s17, 4   ;;  %s5717_s16 = smov %s5719_s18 }
 0x2c1   :  { %13 = sbr.rel (!%p11_p5) target bundleno = 2 (0x2), region = 83 }

</bundles_post_ra>
